<compile_context>
chip_gen: v7x
topology: tpu7x:2x2x1
jax: 0.10.0
libtpu: 0.0.40
codegen_flags: <defaults>
</compile_context>

<pallas_src>
import functools
import math

import jax
import jax.numpy as jnp
from jax.experimental import pallas as pl
from jax.experimental.pallas import tpu as pltpu

_VMEM_LIMIT = 32 * 1024 * 1024   # safe on v5e/v6e/v7x scoped limits at these shapes
_LN_EPS = 1e-5


def _rep_spec(shape):
    """BlockSpec for a grid-invariant (weight) operand: full array, constant index."""
    nd = len(shape)

    def idx(b):
        return (0,) * nd

    return pl.BlockSpec(shape, idx)


# ----------------------------- Pallas kernels -----------------------------

def _xattn_ffn_kernel(xq_ref, xkv_ref, mask_ref,
                      wq_ref, bq_ref, wkv_ref, bkv_ref, wo_ref, bo_ref,
                      g1_ref, be1_ref, w1_ref, fb1_ref, w2_ref, fb2_ref,
                      g2_ref, be2_ref, o_ref, *, num_heads, scale):
    """One batch element per grid step.

    out = LN2( att + FFN(att) ) + x_q,   att = LN1( x_q + MHA(x_q, x_kv, key_pad_mask) )
    """
    xq = xq_ref[0].astype(jnp.float32)                      # (Lq, D) residual stream
    xq_bf = xq_ref[0].astype(jnp.bfloat16)
    xkv_bf = xkv_ref[0].astype(jnp.bfloat16)
    neg_bias = mask_ref[0] * jnp.float32(-1e9)               # (1, Lk) key-padding bias

    d = xq.shape[-1]
    hd = d // num_heads

    # Fused lane-dense projections: (Lq,D)x(D,D) and (Lk,D)x(D,2D) on the MXU.
    q = ((jnp.dot(xq_bf, wq_ref[...], preferred_element_type=jnp.float32)
          + bq_ref[...]) * scale).astype(jnp.bfloat16)       # (Lq, D)
    kv = (jnp.dot(xkv_bf, wkv_ref[...], preferred_element_type=jnp.float32)
          + bkv_ref[...]).astype(jnp.bfloat16)                # (Lk, 2D)

    # Per-head softmax attention (f32 softmax math); only small tiles live per step.
    ctx_parts = []
    for h in range(num_heads):
        qh = q[:, h * hd:(h + 1) * hd]
        kh = kv[:, h * hd:(h + 1) * hd]
        vh = kv[:, d + h * hd: d + (h + 1) * hd]
        s = jax.lax.dot_general(qh, kh, (((1,), (1,)), ((), ())),
                                preferred_element_type=jnp.float32) + neg_bias
        m = jnp.max(s, axis=-1, keepdims=True)
        p = jnp.exp(s - m)
        denom = jnp.sum(p, axis=-1, keepdims=True)
        ctx_parts.append(
            jnp.dot(p.astype(jnp.bfloat16), vh,
                    preferred_element_type=jnp.float32) / denom)
    ctx = jnp.concatenate(ctx_parts, axis=-1)                 # (Lq, D), head-major

    # Single DxD output projection + residual + LayerNorm (f32).
    attn = jnp.dot(ctx.astype(jnp.bfloat16), wo_ref[...],
                   preferred_element_type=jnp.float32) + bo_ref[...]
    s1 = xq + attn
    mu = jnp.mean(s1, axis=-1, keepdims=True)
    c = s1 - mu
    var = jnp.mean(c * c, axis=-1, keepdims=True)
    att = c * jax.lax.rsqrt(var + _LN_EPS) * g1_ref[...] + be1_ref[...]

    # FFN (bf16 operands, f32 accumulation) + add & LayerNorm.
    h1 = jnp.maximum(
        jnp.dot(att.astype(jnp.bfloat16), w1_ref[...],
                preferred_element_type=jnp.float32) + fb1_ref[...], 0.0)
    f = jnp.dot(h1.astype(jnp.bfloat16), w2_ref[...],
                preferred_element_type=jnp.float32) + fb2_ref[...]
    s2 = att + f
    mu2 = jnp.mean(s2, axis=-1, keepdims=True)
    c2 = s2 - mu2
    var2 = jnp.mean(c2 * c2, axis=-1, keepdims=True)
    y = c2 * jax.lax.rsqrt(var2 + _LN_EPS) * g2_ref[...] + be2_ref[...]

    # Outer residual (the model adds the pre-layer embedding after the block).
    o_ref[0] = (y + xq).astype(o_ref.dtype)


def _proj_kernel(x_ref, w_ref, b_ref, o_ref):
    """project_to_common: y = x @ W + b  (one batch element per grid step)."""
    o_ref[0] = (jnp.dot(x_ref[0].astype(jnp.bfloat16), w_ref[...],
                        preferred_element_type=jnp.float32)
                + b_ref[...]).astype(o_ref.dtype)


def _pool_head_kernel(m1_ref, m2_ref, mask1_ref, mask2_ref,
                      w1a_ref, w1b_ref, b1_ref, w2_ref, b2_ref,
                      o_ref, *, inv_l1, inv_l2):
    """Masked mean pool (divide by FULL seq len, matching the reference's .mean(dim=1)
       on a zeroed tensor) of both modalities, implicit concat via a split first-layer
       weight, then the head MLP -> logit (1, 1) per batch element."""
    keep1 = (1.0 - mask1_ref[0]).astype(jnp.bfloat16)           # (1, L1)
    keep2 = (1.0 - mask2_ref[0]).astype(jnp.bfloat16)           # (1, L2)
    # masked sums as (1,L)x(L,D) MXU matmuls
    p1 = jnp.dot(keep1, m1_ref[0].astype(jnp.bfloat16),
                 preferred_element_type=jnp.float32) * inv_l1   # (1, D)
    p2 = jnp.dot(keep2, m2_ref[0].astype(jnp.bfloat16),
                 preferred_element_type=jnp.float32) * inv_l2   # (1, D)
    # concat([p1, p2]) @ W1 == p1 @ W1[:D] + p2 @ W1[D:]
    h = jnp.maximum(
        jnp.dot(p1.astype(jnp.bfloat16), w1a_ref[...],
                preferred_element_type=jnp.float32)
        + jnp.dot(p2.astype(jnp.bfloat16), w1b_ref[...],
                  preferred_element_type=jnp.float32)
        + b1_ref[...], 0.0)
    o_ref[0] = (jnp.dot(h.astype(jnp.bfloat16), w2_ref[...],
                        preferred_element_type=jnp.float32)
                + b2_ref[...]).astype(o_ref.dtype)


# --------------------------- pallas_call wrappers --------------------------

def xattn_ffn_block(q_in, kv_in, mask3, dp, num_heads):
    """Fused CrossAttentionBlock direction:
       MHA + add&LN + FFN + add&LN + outer residual, one kernel, grid=(B,)."""
    B, Lq, D = q_in.shape
    Lk = kv_in.shape[1]
    hd = D // num_heads
    kernel = functools.partial(_xattn_ffn_kernel, num_heads=num_heads,
                               scale=1.0 / math.sqrt(hd))
    weight_names = ('wq', 'bq', 'wkv', 'bkv', 'wo', 'bo',
                    'ln1_g', 'ln1_b', 'w1', 'b1', 'w2', 'b2', 'ln2_g', 'ln2_b')
    weights = [dp[n] for n in weight_names]
    return pl.pallas_call(
        kernel,
        out_shape=jax.ShapeDtypeStruct((B, Lq, D), q_in.dtype),
        grid=(B,),
        in_specs=[pl.BlockSpec((1, Lq, D), lambda b: (b, 0, 0)),
                  pl.BlockSpec((1, Lk, D), lambda b: (b, 0, 0)),
                  pl.BlockSpec((1, 1, Lk), lambda b: (b, 0, 0)),
                  ] + [_rep_spec(w.shape) for w in weights],
        out_specs=pl.BlockSpec((1, Lq, D), lambda b: (b, 0, 0)),
        compiler_params=pltpu.CompilerParams(
            dimension_semantics=("parallel",),
            vmem_limit_bytes=_VMEM_LIMIT),
    )(q_in, kv_in, mask3, *weights)


def project_to_common(x, w, b):
    B, L, Din = x.shape
    Dout = w.shape[1]
    return pl.pallas_call(
        _proj_kernel,
        out_shape=jax.ShapeDtypeStruct((B, L, Dout), x.dtype),
        grid=(B,),
        in_specs=[pl.BlockSpec((1, L, Din), lambda b: (b, 0, 0)),
                  _rep_spec(w.shape), _rep_spec(b.shape)],
        out_specs=pl.BlockSpec((1, L, Dout), lambda b: (b, 0, 0)),
        compiler_params=pltpu.CompilerParams(
            dimension_semantics=("parallel",),
            vmem_limit_bytes=_VMEM_LIMIT),
    )(x, w, b)


def pool_and_head(m1, m2, mask3_1, mask3_2, pp):
    B, L1, D = m1.shape
    L2 = m2.shape[1]
    kernel = functools.partial(_pool_head_kernel,
                               inv_l1=1.0 / float(L1), inv_l2=1.0 / float(L2))
    weights = [pp['head_w1a'], pp['head_w1b'], pp['head_b1'],
               pp['head_w2'], pp['head_b2']]
    logits3 = pl.pallas_call(
        kernel,
        out_shape=jax.ShapeDtypeStruct((B, 1, 1), m1.dtype),
        grid=(B,),
        in_specs=[pl.BlockSpec((1, L1, D), lambda b: (b, 0, 0)),
                  pl.BlockSpec((1, L2, D), lambda b: (b, 0, 0)),
                  pl.BlockSpec((1, 1, L1), lambda b: (b, 0, 0)),
                  pl.BlockSpec((1, 1, L2), lambda b: (b, 0, 0)),
                  ] + [_rep_spec(w.shape) for w in weights],
        out_specs=pl.BlockSpec((1, 1, 1), lambda b: (b, 0, 0)),
        compiler_params=pltpu.CompilerParams(
            dimension_semantics=("parallel",),
            vmem_limit_bytes=_VMEM_LIMIT),
    )(m1, m2, mask3_1, mask3_2, *weights)
    return logits3.reshape(B, 1)


# ------------------------------ model forward ------------------------------

def bi_cross_attention_forward(prepared, m1_emb, m2_emb, mask1, mask2, num_heads):
    B, L1, _ = m1_emb.shape
    _, L2, _ = m2_emb.shape
    maskf1 = mask1.astype(jnp.float32).reshape(B, 1, L1)   # 1.0 at special/pad tokens
    maskf2 = mask2.astype(jnp.float32).reshape(B, 1, L2)

    # project modality2 embedding into the common (modality1) dimension
    m2 = project_to_common(m2_emb, prepared['proj_w'], prepared['proj_b'])
    m1 = m1_emb

    for lp in prepared['layers']:
        # both directions consume the PRE-layer m1/m2 (matches the reference)
        new_m1 = xattn_ffn_block(m1, m2, maskf2, lp['m1_to_m2'], num_heads)
        new_m2 = xattn_ffn_block(m2, m1, maskf1, lp['m2_to_m1'], num_heads)
        m1, m2 = new_m1, new_m2

    return pool_and_head(m1, m2, maskf1, maskf2, prepared)


# ------------------------------- parameters -------------------------------

def init_params(key, d1, d2, num_heads, num_layers, hidden_dim):
    ffn_hidden = 3 * d1
    keys = iter(jax.random.split(key, 256))

    def dense(din, dout):
        w = jax.random.normal(next(keys), (din, dout), jnp.float32) / jnp.sqrt(din)
        return w.astype(jnp.float32), jnp.zeros((dout,), jnp.float32)

    def attn_params():
        wq, bq = dense(d1, d1)
        wk, bk = dense(d1, d1)
        wv, bv = dense(d1, d1)
        wo, bo = dense(d1, d1)
        return dict(wq=wq, bq=bq, wk=wk, bk=bk, wv=wv, bv=bv, wo=wo, bo=bo)

    layers = []
    for _ in range(num_layers):
        f1w1, f1b1 = dense(d1, ffn_hidden)
        f1w2, f1b2 = dense(ffn_hidden, d1)
        f2w1, f2b1 = dense(d1, ffn_hidden)
        f2w2, f2b2 = dense(ffn_hidden, d1)
        layers.append(dict(
            attn_1to2=attn_params(), attn_2to1=attn_params(),
            norm1_g=jnp.ones((d1,), jnp.float32), norm1_b=jnp.zeros((d1,), jnp.float32),
            norm2_g=jnp.ones((d1,), jnp.float32), norm2_b=jnp.zeros((d1,), jnp.float32),
            ffn_norm1_g=jnp.ones((d1,), jnp.float32), ffn_norm1_b=jnp.zeros((d1,), jnp.float32),
            ffn_norm2_g=jnp.ones((d1,), jnp.float32), ffn_norm2_b=jnp.zeros((d1,), jnp.float32),
            ffn1_w1=f1w1, ffn1_b1=f1b1, ffn1_w2=f1w2, ffn1_b2=f1b2,
            ffn2_w1=f2w1, ffn2_b1=f2b1, ffn2_w2=f2w2, ffn2_b2=f2b2,
        ))

    proj_w, proj_b = dense(d2, d1)
    hw1, hb1 = dense(2 * d1, hidden_dim)
    hw2, hb2 = dense(hidden_dim, 1)
    return dict(proj_w=proj_w, proj_b=proj_b, layers=layers,
                head_w1=hw1, head_b1=hb1, head_w2=hw2, head_b2=hb2)


def prepare_params(params):
    """Pack/fuse the weight layouts ONCE (outside jit): [Wk|Wv] fusion, 2D biases,
       bf16 matmul weights (f32 biases / LayerNorm params / accumulation)."""
    bf16 = lambda w: w.astype(jnp.bfloat16)

    def prep_direction(ap, ln1_g, ln1_b, fw1, fb1, fw2, fb2, ln2_g, ln2_b):
        d = ap['wq'].shape[0]
        return dict(
            wq=bf16(ap['wq']),
            bq=ap['bq'].reshape(1, d),
            wkv=bf16(jnp.concatenate([ap['wk'], ap['wv']], axis=1)),
            bkv=jnp.concatenate([ap['bk'], ap['bv']]).reshape(1, 2 * d),
            wo=bf16(ap['wo']),
            bo=ap['bo'].reshape(1, d),
            ln1_g=ln1_g.reshape(1, d), ln1_b=ln1_b.reshape(1, d),
            w1=bf16(fw1), b1=fb1.reshape(1, -1),
            w2=bf16(fw2), b2=fb2.reshape(1, d),
            ln2_g=ln2_g.reshape(1, d), ln2_b=ln2_b.reshape(1, d),
        )

    layers = []
    for lp in params['layers']:
        layers.append(dict(
            m1_to_m2=prep_direction(lp['attn_1to2'], lp['norm1_g'], lp['norm1_b'],
                                    lp['ffn1_w1'], lp['ffn1_b1'],
                                    lp['ffn1_w2'], lp['ffn1_b2'],
                                    lp['ffn_norm1_g'], lp['ffn_norm1_b']),
            m2_to_m1=prep_direction(lp['attn_2to1'], lp['norm2_g'], lp['norm2_b'],
                                    lp['ffn2_w1'], lp['ffn2_b1'],
                                    lp['ffn2_w2'], lp['ffn2_b2'],
                                    lp['ffn_norm2_g'], lp['ffn_norm2_b']),
        ))

    d1 = params['proj_w'].shape[1]
    return dict(
        proj_w=bf16(params['proj_w']),
        proj_b=params['proj_b'].reshape(1, d1),
        layers=layers,
        head_w1a=bf16(params['head_w1'][:d1]),
        head_w1b=bf16(params['head_w1'][d1:]),
        head_b1=params['head_b1'].reshape(1, -1),
        head_w2=bf16(params['head_w2']),
        head_b2=params['head_b2'].reshape(1, 1),
    )


# ---------------------------------- main -----------------------------------

if __name__ == "__main__":
    B, L1, L2 = 2, 8, 12
    D1, D2 = 64, 48                 # modality1 / modality2 hidden sizes (toy)
    NUM_HEADS, NUM_LAYERS, HIDDEN = 8, 2, 32

    key = jax.random.PRNGKey(0)
    k_params, k1, k2 = jax.random.split(key, 3)

    params = init_params(k_params, D1, D2, NUM_HEADS, NUM_LAYERS, HIDDEN)
    prepared = prepare_params(params)     # one-time packing; not re-done per call

    m1_emb = jax.random.normal(k1, (B, L1, D1), jnp.float32)
    m2_emb = jax.random.normal(k2, (B, L2, D2), jnp.float32)

    # special-token masks (True at CLS / EOS positions), as the PyTorch model derives
    # from input_ids == {cls, eos, pad}.
    mask1 = jnp.zeros((B, L1), bool).at[:, 0].set(True).at[:, -1].set(True)
    mask2 = jnp.zeros((B, L2), bool).at[:, 0].set(True).at[:, -1].set(True)

    fwd = jax.jit(bi_cross_attention_forward, static_argnums=5)
    logits = fwd(prepared, m1_emb, m2_emb, mask1, mask2, NUM_HEADS)
    logits = jax.block_until_ready(logits)

    assert logits.shape == (B, 1) and logits.dtype == jnp.float32
    assert bool(jnp.all(jnp.isfinite(logits)))
    print("KERNEL_OK")
</pallas_src>

<mosaic_0001>
module attributes {stable_mosaic.version = 11 : i64} {
  func.func @_proj_kernel(%arg0: i32, %arg1: memref<1x12x48xf32, #tpu.memory_space<vmem>>, %arg2: memref<48x64xbf16, #tpu.memory_space<vmem>>, %arg3: memref<1x64xf32, #tpu.memory_space<vmem>>, %arg4: memref<1x12x64xf32, #tpu.memory_space<vmem>>) attributes {dimension_semantics = [#tpu.dimension_semantics<parallel>], iteration_bounds = array<i64: 2>, scalar_prefetch = 0 : i64, scratch_operands = 0 : i64, tpu.core_type = #tpu.core_type<tc>, window_params = [{transform_indices = @transform_0, window_bounds = array<i64: 1, 12, 48>}, {pipeline_mode = #tpu.pipeline_mode<synchronous>, transform_indices = @transform_1, window_bounds = array<i64: 48, 64>}, {pipeline_mode = #tpu.pipeline_mode<synchronous>, transform_indices = @transform_2, window_bounds = array<i64: 1, 64>}, {transform_indices = @transform_3, window_bounds = array<i64: 1, 12, 64>}]} {
    %c0 = arith.constant 0 : index
    %c0_0 = arith.constant 0 : index
    %c0_1 = arith.constant 0 : index
    %0 = vector.load %arg1[%c0, %c0_0, %c0_1] : memref<1x12x48xf32, #tpu.memory_space<vmem>>, vector<1x12x48xf32>
    %1 = vector.shape_cast %0 : vector<1x12x48xf32> to vector<12x48xf32>
    %2 = arith.truncf %1 : vector<12x48xf32> to vector<12x48xbf16>
    %c0_2 = arith.constant 0 : index
    %c0_3 = arith.constant 0 : index
    %3 = vector.load %arg2[%c0_2, %c0_3] : memref<48x64xbf16, #tpu.memory_space<vmem>>, vector<48x64xbf16>
    %cst = arith.constant dense<0.000000e+00> : vector<12x64xf32>
    %4 = tpu.matmul %2, %3, %cst {dimension_numbers = #tpu.dot_dimension_numbers<[1], [0], [0], [1], [0, 0, 1, 1], [], []>} : vector<12x48xbf16>, vector<48x64xbf16>, vector<12x64xf32> -> vector<12x64xf32>
    %c0_4 = arith.constant 0 : index
    %c0_5 = arith.constant 0 : index
    %5 = vector.load %arg3[%c0_4, %c0_5] : memref<1x64xf32, #tpu.memory_space<vmem>>, vector<1x64xf32>
    %6 = vector.broadcast %5 : vector<1x64xf32> to vector<12x64xf32>
    %7 = arith.addf %4, %6 : vector<12x64xf32>
    %c0_6 = arith.constant 0 : index
    %c0_7 = arith.constant 0 : index
    %c0_8 = arith.constant 0 : index
    %8 = vector.load %arg4[%c0_6, %c0_7, %c0_8] : memref<1x12x64xf32, #tpu.memory_space<vmem>>, vector<1x12x64xf32>
    %9 = vector.shape_cast %8 : vector<1x12x64xf32> to vector<12x64xf32>
    %10 = vector.shape_cast %7 : vector<12x64xf32> to vector<1x12x64xf32>
    tpu.vector_store %arg4[%c0_6, %c0_7, %c0_8], %10 {strides = array<i32>} : memref<1x12x64xf32, #tpu.memory_space<vmem>>, vector<1x12x64xf32>,
    return
  }
  func.func @transform_0(%arg0: i32) -> (i32, i32, i32) {
    %c0_i32 = arith.constant 0 : i32
    %c0_i32_0 = arith.constant 0 : i32
    %c0_i32_1 = arith.constant 0 : i32
    return %arg0, %c0_i32, %c0_i32_0 : i32, i32, i32
  }
  func.func @transform_1(%arg0: i32) -> (i32, i32) {
    %c0_i32 = arith.constant 0 : i32
    %c0_i32_0 = arith.constant 0 : i32
    %c0_i32_1 = arith.constant 0 : i32
    return %c0_i32, %c0_i32_0 : i32, i32
  }
  func.func @transform_2(%arg0: i32) -> (i32, i32) {
    %c0_i32 = arith.constant 0 : i32
    %c0_i32_0 = arith.constant 0 : i32
    %c0_i32_1 = arith.constant 0 : i32
    return %c0_i32, %c0_i32_0 : i32, i32
  }
  func.func @transform_3(%arg0: i32) -> (i32, i32, i32) {
    %c0_i32 = arith.constant 0 : i32
    %c0_i32_0 = arith.constant 0 : i32
    %c0_i32_1 = arith.constant 0 : i32
    return %arg0, %c0_i32, %c0_i32_0 : i32, i32, i32
  }
}

module attributes {stable_mosaic.version = 11 : i64} {
  func.func @_xattn_ffn_kernel(%arg0: i32, %arg1: memref<1x8x64xf32, #tpu.memory_space<vmem>>, %arg2: memref<1x12x64xf32, #tpu.memory_space<vmem>>, %arg3: memref<1x1x12xf32, #tpu.memory_space<vmem>>, %arg4: memref<64x64xbf16, #tpu.memory_space<vmem>>, %arg5: memref<1x64xf32, #tpu.memory_space<vmem>>, %arg6: memref<64x128xbf16, #tpu.memory_space<vmem>>, %arg7: memref<1x128xf32, #tpu.memory_space<vmem>>, %arg8: memref<64x64xbf16, #tpu.memory_space<vmem>>, %arg9: memref<1x64xf32, #tpu.memory_space<vmem>>, %arg10: memref<1x64xf32, #tpu.memory_space<vmem>>, %arg11: memref<1x64xf32, #tpu.memory_space<vmem>>, %arg12: memref<64x192xbf16, #tpu.memory_space<vmem>>, %arg13: memref<1x192xf32, #tpu.memory_space<vmem>>, %arg14: memref<192x64xbf16, #tpu.memory_space<vmem>>, %arg15: memref<1x64xf32, #tpu.memory_space<vmem>>, %arg16: memref<1x64xf32, #tpu.memory_space<vmem>>, %arg17: memref<1x64xf32, #tpu.memory_space<vmem>>, %arg18: memref<1x8x64xf32, #tpu.memory_space<vmem>>) attributes {dimension_semantics = [#tpu.dimension_semantics<parallel>], iteration_bounds = array<i64: 2>, scalar_prefetch = 0 : i64, scratch_operands = 0 : i64, tpu.core_type = #tpu.core_type<tc>, window_params = [{transform_indices = @transform_0, window_bounds = array<i64: 1, 8, 64>}, {transform_indices = @transform_1, window_bounds = array<i64: 1, 12, 64>}, {transform_indices = @transform_2, window_bounds = array<i64: 1, 1, 12>}, {pipeline_mode = #tpu.pipeline_mode<synchronous>, transform_indices = @transform_3, window_bounds = array<i64: 64, 64>}, {pipeline_mode = #tpu.pipeline_mode<synchronous>, transform_indices = @transform_4, window_bounds = array<i64: 1, 64>}, {pipeline_mode = #tpu.pipeline_mode<synchronous>, transform_indices = @transform_5, window_bounds = array<i64: 64, 128>}, {pipeline_mode = #tpu.pipeline_mode<synchronous>, transform_indices = @transform_6, window_bounds = array<i64: 1, 128>}, {pipeline_mode = #tpu.pipeline_mode<synchronous>, transform_indices = @transform_7, window_bounds = array<i64: 64, 64>}, {pipeline_mode = #tpu.pipeline_mode<synchronous>, transform_indices = @transform_8, window_bounds = array<i64: 1, 64>}, {pipeline_mode = #tpu.pipeline_mode<synchronous>, transform_indices = @transform_9, window_bounds = array<i64: 1, 64>}, {pipeline_mode = #tpu.pipeline_mode<synchronous>, transform_indices = @transform_10, window_bounds = array<i64: 1, 64>}, {pipeline_mode = #tpu.pipeline_mode<synchronous>, transform_indices = @transform_11, window_bounds = array<i64: 64, 192>}, {pipeline_mode = #tpu.pipeline_mode<synchronous>, transform_indices = @transform_12, window_bounds = array<i64: 1, 192>}, {pipeline_mode = #tpu.pipeline_mode<synchronous>, transform_indices = @transform_13, window_bounds = array<i64: 192, 64>}, {pipeline_mode = #tpu.pipeline_mode<synchronous>, transform_indices = @transform_14, window_bounds = array<i64: 1, 64>}, {pipeline_mode = #tpu.pipeline_mode<synchronous>, transform_indices = @transform_15, window_bounds = array<i64: 1, 64>}, {pipeline_mode = #tpu.pipeline_mode<synchronous>, transform_indices = @transform_16, window_bounds = array<i64: 1, 64>}, {transform_indices = @transform_17, window_bounds = array<i64: 1, 8, 64>}]} {
    %c0 = arith.constant 0 : index
    %c0_0 = arith.constant 0 : index
    %c0_1 = arith.constant 0 : index
    %0 = vector.load %arg1[%c0, %c0_0, %c0_1] : memref<1x8x64xf32, #tpu.memory_space<vmem>>, vector<1x8x64xf32>
    %1 = vector.shape_cast %0 : vector<1x8x64xf32> to vector<8x64xf32>
    %c0_2 = arith.constant 0 : index
    %c0_3 = arith.constant 0 : index
    %c0_4 = arith.constant 0 : index
    %2 = vector.load %arg1[%c0_2, %c0_3, %c0_4] : memref<1x8x64xf32, #tpu.memory_space<vmem>>, vector<1x8x64xf32>
    %3 = vector.shape_cast %2 : vector<1x8x64xf32> to vector<8x64xf32>
    %4 = arith.truncf %3 : vector<8x64xf32> to vector<8x64xbf16>
    %c0_5 = arith.constant 0 : index
    %c0_6 = arith.constant 0 : index
    %c0_7 = arith.constant 0 : index
    %5 = vector.load %arg2[%c0_5, %c0_6, %c0_7] : memref<1x12x64xf32, #tpu.memory_space<vmem>>, vector<1x12x64xf32>
    %6 = vector.shape_cast %5 : vector<1x12x64xf32> to vector<12x64xf32>
    %7 = arith.truncf %6 : vector<12x64xf32> to vector<12x64xbf16>
    %c0_8 = arith.constant 0 : index
    %c0_9 = arith.constant 0 : index
    %c0_10 = arith.constant 0 : index
    %8 = vector.load %arg3[%c0_8, %c0_9, %c0_10] : memref<1x1x12xf32, #tpu.memory_space<vmem>>, vector<1x1x12xf32>
    %9 = vector.shape_cast %8 : vector<1x1x12xf32> to vector<1x12xf32>
    %cst = arith.constant -1.000000e+09 : f32
    %10 = vector.broadcast %cst : f32 to vector<1x12xf32>
    %11 = arith.mulf %9, %10 : vector<1x12xf32>
    %c0_11 = arith.constant 0 : index
    %c0_12 = arith.constant 0 : index
    %12 = vector.load %arg4[%c0_11, %c0_12] : memref<64x64xbf16, #tpu.memory_space<vmem>>, vector<64x64xbf16>
    %cst_13 = arith.constant dense<0.000000e+00> : vector<8x64xf32>
    %13 = tpu.matmul %4, %12, %cst_13 {dimension_numbers = #tpu.dot_dimension_numbers<[1], [0], [0], [1], [0, 0, 1, 1], [], []>} : vector<8x64xbf16>, vector<64x64xbf16>, vector<8x64xf32> -> vector<8x64xf32>
    %c0_14 = arith.constant 0 : index
    %c0_15 = arith.constant 0 : index
    %14 = vector.load %arg5[%c0_14, %c0_15] : memref<1x64xf32, #tpu.memory_space<vmem>>, vector<1x64xf32>
    %15 = vector.broadcast %14 : vector<1x64xf32> to vector<8x64xf32>
    %16 = arith.addf %13, %15 : vector<8x64xf32>
    %cst_16 = arith.constant 0.353553385 : f32
    %17 = vector.broadcast %cst_16 : f32 to vector<8x64xf32>
    %18 = arith.mulf %16, %17 : vector<8x64xf32>
    %19 = arith.truncf %18 : vector<8x64xf32> to vector<8x64xbf16>
    %c0_17 = arith.constant 0 : index
    %c0_18 = arith.constant 0 : index
    %20 = vector.load %arg6[%c0_17, %c0_18] : memref<64x128xbf16, #tpu.memory_space<vmem>>, vector<64x128xbf16>
    %cst_19 = arith.constant dense<0.000000e+00> : vector<12x128xf32>
    %21 = tpu.matmul %7, %20, %cst_19 {dimension_numbers = #tpu.dot_dimension_numbers<[1], [0], [0], [1], [0, 0, 1, 1], [], []>} : vector<12x64xbf16>, vector<64x128xbf16>, vector<12x128xf32> -> vector<12x128xf32>
    %c0_20 = arith.constant 0 : index
    %c0_21 = arith.constant 0 : index
    %22 = vector.load %arg7[%c0_20, %c0_21] : memref<1x128xf32, #tpu.memory_space<vmem>>, vector<1x128xf32>
    %23 = vector.broadcast %22 : vector<1x128xf32> to vector<12x128xf32>
    %24 = arith.addf %21, %23 : vector<12x128xf32>
    %25 = arith.truncf %24 : vector<12x128xf32> to vector<12x128xbf16>
    %26 = vector.extract_strided_slice %19 {offsets = [0, 0], sizes = [8, 8], strides = [1, 1]} : vector<8x64xbf16> to vector<8x8xbf16>
    %27 = vector.extract_strided_slice %25 {offsets = [0, 0], sizes = [12, 8], strides = [1, 1]} : vector<12x128xbf16> to vector<12x8xbf16>
    %28 = vector.extract_strided_slice %25 {offsets = [0, 64], sizes = [12, 8], strides = [1, 1]} : vector<12x128xbf16> to vector<12x8xbf16>
    %cst_22 = arith.constant dense<0.000000e+00> : vector<8x12xf32>
    %29 = tpu.matmul %26, %27, %cst_22 {dimension_numbers = #tpu.dot_dimension_numbers<[1], [1], [0], [0], [0, 0, 1, 0], [], []>} : vector<8x8xbf16>, vector<12x8xbf16>, vector<8x12xf32> -> vector<8x12xf32>
    %30 = vector.broadcast %11 : vector<1x12xf32> to vector<8x12xf32>
    %31 = arith.addf %29, %30 : vector<8x12xf32>
    %cst_23 = arith.constant dense<0xFF800000> : vector<8xf32>
    %32 = vector.multi_reduction <maximumf>, %31, %cst_23 [1] : vector<8x12xf32> to vector<8xf32>
    %33 = vector.shape_cast %32 : vector<8xf32> to vector<8x1xf32>
    %34 = vector.broadcast %33 : vector<8x1xf32> to vector<8x12xf32>
    %35 = arith.subf %31, %34 : vector<8x12xf32>
    %36 = math.exp %35 : vector<8x12xf32>
    %cst_24 = arith.constant dense<0.000000e+00> : vector<8xf32>
    %37 = vector.multi_reduction <add>, %36, %cst_24 [1] : vector<8x12xf32> to vector<8xf32>
    %38 = vector.shape_cast %37 : vector<8xf32> to vector<8x1xf32>
    %39 = arith.truncf %36 : vector<8x12xf32> to vector<8x12xbf16>
    %cst_25 = arith.constant dense<0.000000e+00> : vector<8x8xf32>
    %40 = tpu.matmul %39, %28, %cst_25 {dimension_numbers = #tpu.dot_dimension_numbers<[1], [0], [0], [1], [0, 0, 1, 1], [], []>} : vector<8x12xbf16>, vector<12x8xbf16>, vector<8x8xf32> -> vector<8x8xf32>
    %41 = vector.broadcast %38 : vector<8x1xf32> to vector<8x8xf32>
    %42 = arith.divf %40, %41 : vector<8x8xf32>
    %43 = vector.extract_strided_slice %19 {offsets = [0, 8], sizes = [8, 8], strides = [1, 1]} : vector<8x64xbf16> to vector<8x8xbf16>
    %44 = vector.extract_strided_slice %25 {offsets = [0, 8], sizes = [12, 8], strides = [1, 1]} : vector<12x128xbf16> to vector<12x8xbf16>
    %45 = vector.extract_strided_slice %25 {offsets = [0, 72], sizes = [12, 8], strides = [1, 1]} : vector<12x128xbf16> to vector<12x8xbf16>
    %cst_26 = arith.constant dense<0.000000e+00> : vector<8x12xf32>
    %46 = tpu.matmul %43, %44, %cst_26 {dimension_numbers = #tpu.dot_dimension_numbers<[1], [1], [0], [0], [0, 0, 1, 0], [], []>} : vector<8x8xbf16>, vector<12x8xbf16>, vector<8x12xf32> -> vector<8x12xf32>
    %47 = vector.broadcast %11 : vector<1x12xf32> to vector<8x12xf32>
    %48 = arith.addf %46, %47 : vector<8x12xf32>
    %cst_27 = arith.constant dense<0xFF800000> : vector<8xf32>
    %49 = vector.multi_reduction <maximumf>, %48, %cst_27 [1] : vector<8x12xf32> to vector<8xf32>
    %50 = vector.shape_cast %49 : vector<8xf32> to vector<8x1xf32>
    %51 = vector.broadcast %50 : vector<8x1xf32> to vector<8x12xf32>
    %52 = arith.subf %48, %51 : vector<8x12xf32>
    %53 = math.exp %52 : vector<8x12xf32>
    %cst_28 = arith.constant dense<0.000000e+00> : vector<8xf32>
    %54 = vector.multi_reduction <add>, %53, %cst_28 [1] : vector<8x12xf32> to vector<8xf32>
    %55 = vector.shape_cast %54 : vector<8xf32> to vector<8x1xf32>
    %56 = arith.truncf %53 : vector<8x12xf32> to vector<8x12xbf16>
    %cst_29 = arith.constant dense<0.000000e+00> : vector<8x8xf32>
    %57 = tpu.matmul %56, %45, %cst_29 {dimension_numbers = #tpu.dot_dimension_numbers<[1], [0], [0], [1], [0, 0, 1, 1], [], []>} : vector<8x12xbf16>, vector<12x8xbf16>, vector<8x8xf32> -> vector<8x8xf32>
    %58 = vector.broadcast %55 : vector<8x1xf32> to vector<8x8xf32>
    %59 = arith.divf %57, %58 : vector<8x8xf32>
    %60 = vector.extract_strided_slice %19 {offsets = [0, 16], sizes = [8, 8], strides = [1, 1]} : vector<8x64xbf16> to vector<8x8xbf16>
    %61 = vector.extract_strided_slice %25 {offsets = [0, 16], sizes = [12, 8], strides = [1, 1]} : vector<12x128xbf16> to vector<12x8xbf16>
    %62 = vector.extract_strided_slice %25 {offsets = [0, 80], sizes = [12, 8], strides = [1, 1]} : vector<12x128xbf16> to vector<12x8xbf16>
    %cst_30 = arith.constant dense<0.000000e+00> : vector<8x12xf32>
    %63 = tpu.matmul %60, %61, %cst_30 {dimension_numbers = #tpu.dot_dimension_numbers<[1], [1], [0], [0], [0, 0, 1, 0], [], []>} : vector<8x8xbf16>, vector<12x8xbf16>, vector<8x12xf32> -> vector<8x12xf32>
    %64 = vector.broadcast %11 : vector<1x12xf32> to vector<8x12xf32>
    %65 = arith.addf %63, %64 : vector<8x12xf32>
    %cst_31 = arith.constant dense<0xFF800000> : vector<8xf32>
    %66 = vector.multi_reduction <maximumf>, %65, %cst_31 [1] : vector<8x12xf32> to vector<8xf32>
    %67 = vector.shape_cast %66 : vector<8xf32> to vector<8x1xf32>
    %68 = vector.broadcast %67 : vector<8x1xf32> to vector<8x12xf32>
    %69 = arith.subf %65, %68 : vector<8x12xf32>
    %70 = math.exp %69 : vector<8x12xf32>
    %cst_32 = arith.constant dense<0.000000e+00> : vector<8xf32>
    %71 = vector.multi_reduction <add>, %70, %cst_32 [1] : vector<8x12xf32> to vector<8xf32>
    %72 = vector.shape_cast %71 : vector<8xf32> to vector<8x1xf32>
    %73 = arith.truncf %70 : vector<8x12xf32> to vector<8x12xbf16>
    %cst_33 = arith.constant dense<0.000000e+00> : vector<8x8xf32>
    %74 = tpu.matmul %73, %62, %cst_33 {dimension_numbers = #tpu.dot_dimension_numbers<[1], [0], [0], [1], [0, 0, 1, 1], [], []>} : vector<8x12xbf16>, vector<12x8xbf16>, vector<8x8xf32> -> vector<8x8xf32>
    %75 = vector.broadcast %72 : vector<8x1xf32> to vector<8x8xf32>
    %76 = arith.divf %74, %75 : vector<8x8xf32>
    %77 = vector.extract_strided_slice %19 {offsets = [0, 24], sizes = [8, 8], strides = [1, 1]} : vector<8x64xbf16> to vector<8x8xbf16>
    %78 = vector.extract_strided_slice %25 {offsets = [0, 24], sizes = [12, 8], strides = [1, 1]} : vector<12x128xbf16> to vector<12x8xbf16>
    %79 = vector.extract_strided_slice %25 {offsets = [0, 88], sizes = [12, 8], strides = [1, 1]} : vector<12x128xbf16> to vector<12x8xbf16>
    %cst_34 = arith.constant dense<0.000000e+00> : vector<8x12xf32>
    %80 = tpu.matmul %77, %78, %cst_34 {dimension_numbers = #tpu.dot_dimension_numbers<[1], [1], [0], [0], [0, 0, 1, 0], [], []>} : vector<8x8xbf16>, vector<12x8xbf16>, vector<8x12xf32> -> vector<8x12xf32>
    %81 = vector.broadcast %11 : vector<1x12xf32> to vector<8x12xf32>
    %82 = arith.addf %80, %81 : vector<8x12xf32>
    %cst_35 = arith.constant dense<0xFF800000> : vector<8xf32>
    %83 = vector.multi_reduction <maximumf>, %82, %cst_35 [1] : vector<8x12xf32> to vector<8xf32>
    %84 = vector.shape_cast %83 : vector<8xf32> to vector<8x1xf32>
    %85 = vector.broadcast %84 : vector<8x1xf32> to vector<8x12xf32>
    %86 = arith.subf %82, %85 : vector<8x12xf32>
    %87 = math.exp %86 : vector<8x12xf32>
    %cst_36 = arith.constant dense<0.000000e+00> : vector<8xf32>
    %88 = vector.multi_reduction <add>, %87, %cst_36 [1] : vector<8x12xf32> to vector<8xf32>
    %89 = vector.shape_cast %88 : vector<8xf32> to vector<8x1xf32>
    %90 = arith.truncf %87 : vector<8x12xf32> to vector<8x12xbf16>
    %cst_37 = arith.constant dense<0.000000e+00> : vector<8x8xf32>
    %91 = tpu.matmul %90, %79, %cst_37 {dimension_numbers = #tpu.dot_dimension_numbers<[1], [0], [0], [1], [0, 0, 1, 1], [], []>} : vector<8x12xbf16>, vector<12x8xbf16>, vector<8x8xf32> -> vector<8x8xf32>
    %92 = vector.broadcast %89 : vector<8x1xf32> to vector<8x8xf32>
    %93 = arith.divf %91, %92 : vector<8x8xf32>
    %94 = vector.extract_strided_slice %19 {offsets = [0, 32], sizes = [8, 8], strides = [1, 1]} : vector<8x64xbf16> to vector<8x8xbf16>
    %95 = vector.extract_strided_slice %25 {offsets = [0, 32], sizes = [12, 8], strides = [1, 1]} : vector<12x128xbf16> to vector<12x8xbf16>
    %96 = vector.extract_strided_slice %25 {offsets = [0, 96], sizes = [12, 8], strides = [1, 1]} : vector<12x128xbf16> to vector<12x8xbf16>
    %cst_38 = arith.constant dense<0.000000e+00> : vector<8x12xf32>
    %97 = tpu.matmul %94, %95, %cst_38 {dimension_numbers = #tpu.dot_dimension_numbers<[1], [1], [0], [0], [0, 0, 1, 0], [], []>} : vector<8x8xbf16>, vector<12x8xbf16>, vector<8x12xf32> -> vector<8x12xf32>
    %98 = vector.broadcast %11 : vector<1x12xf32> to vector<8x12xf32>
    %99 = arith.addf %97, %98 : vector<8x12xf32>
    %cst_39 = arith.constant dense<0xFF800000> : vector<8xf32>
    %100 = vector.multi_reduction <maximumf>, %99, %cst_39 [1] : vector<8x12xf32> to vector<8xf32>
    %101 = vector.shape_cast %100 : vector<8xf32> to vector<8x1xf32>
    %102 = vector.broadcast %101 : vector<8x1xf32> to vector<8x12xf32>
    %103 = arith.subf %99, %102 : vector<8x12xf32>
    %104 = math.exp %103 : vector<8x12xf32>
    %cst_40 = arith.constant dense<0.000000e+00> : vector<8xf32>
    %105 = vector.multi_reduction <add>, %104, %cst_40 [1] : vector<8x12xf32> to vector<8xf32>
    %106 = vector.shape_cast %105 : vector<8xf32> to vector<8x1xf32>
    %107 = arith.truncf %104 : vector<8x12xf32> to vector<8x12xbf16>
    %cst_41 = arith.constant dense<0.000000e+00> : vector<8x8xf32>
    %108 = tpu.matmul %107, %96, %cst_41 {dimension_numbers = #tpu.dot_dimension_numbers<[1], [0], [0], [1], [0, 0, 1, 1], [], []>} : vector<8x12xbf16>, vector<12x8xbf16>, vector<8x8xf32> -> vector<8x8xf32>
    %109 = vector.broadcast %106 : vector<8x1xf32> to vector<8x8xf32>
    %110 = arith.divf %108, %109 : vector<8x8xf32>
    %111 = vector.extract_strided_slice %19 {offsets = [0, 40], sizes = [8, 8], strides = [1, 1]} : vector<8x64xbf16> to vector<8x8xbf16>
    %112 = vector.extract_strided_slice %25 {offsets = [0, 40], sizes = [12, 8], strides = [1, 1]} : vector<12x128xbf16> to vector<12x8xbf16>
    %113 = vector.extract_strided_slice %25 {offsets = [0, 104], sizes = [12, 8], strides = [1, 1]} : vector<12x128xbf16> to vector<12x8xbf16>
    %cst_42 = arith.constant dense<0.000000e+00> : vector<8x12xf32>
    %114 = tpu.matmul %111, %112, %cst_42 {dimension_numbers = #tpu.dot_dimension_numbers<[1], [1], [0], [0], [0, 0, 1, 0], [], []>} : vector<8x8xbf16>, vector<12x8xbf16>, vector<8x12xf32> -> vector<8x12xf32>
    %115 = vector.broadcast %11 : vector<1x12xf32> to vector<8x12xf32>
    %116 = arith.addf %114, %115 : vector<8x12xf32>
    %cst_43 = arith.constant dense<0xFF800000> : vector<8xf32>
    %117 = vector.multi_reduction <maximumf>, %116, %cst_43 [1] : vector<8x12xf32> to vector<8xf32>
    %118 = vector.shape_cast %117 : vector<8xf32> to vector<8x1xf32>
    %119 = vector.broadcast %118 : vector<8x1xf32> to vector<8x12xf32>
    %120 = arith.subf %116, %119 : vector<8x12xf32>
    %121 = math.exp %120 : vector<8x12xf32>
    %cst_44 = arith.constant dense<0.000000e+00> : vector<8xf32>
    %122 = vector.multi_reduction <add>, %121, %cst_44 [1] : vector<8x12xf32> to vector<8xf32>
    %123 = vector.shape_cast %122 : vector<8xf32> to vector<8x1xf32>
    %124 = arith.truncf %121 : vector<8x12xf32> to vector<8x12xbf16>
    %cst_45 = arith.constant dense<0.000000e+00> : vector<8x8xf32>
    %125 = tpu.matmul %124, %113, %cst_45 {dimension_numbers = #tpu.dot_dimension_numbers<[1], [0], [0], [1], [0, 0, 1, 1], [], []>} : vector<8x12xbf16>, vector<12x8xbf16>, vector<8x8xf32> -> vector<8x8xf32>
    %126 = vector.broadcast %123 : vector<8x1xf32> to vector<8x8xf32>
    %127 = arith.divf %125, %126 : vector<8x8xf32>
    %128 = vector.extract_strided_slice %19 {offsets = [0, 48], sizes = [8, 8], strides = [1, 1]} : vector<8x64xbf16> to vector<8x8xbf16>
    %129 = vector.extract_strided_slice %25 {offsets = [0, 48], sizes = [12, 8], strides = [1, 1]} : vector<12x128xbf16> to vector<12x8xbf16>
    %130 = vector.extract_strided_slice %25 {offsets = [0, 112], sizes = [12, 8], strides = [1, 1]} : vector<12x128xbf16> to vector<12x8xbf16>
    %cst_46 = arith.constant dense<0.000000e+00> : vector<8x12xf32>
    %131 = tpu.matmul %128, %129, %cst_46 {dimension_numbers = #tpu.dot_dimension_numbers<[1], [1], [0], [0], [0, 0, 1, 0], [], []>} : vector<8x8xbf16>, vector<12x8xbf16>, vector<8x12xf32> -> vector<8x12xf32>
    %132 = vector.broadcast %11 : vector<1x12xf32> to vector<8x12xf32>
    %133 = arith.addf %131, %132 : vector<8x12xf32>
    %cst_47 = arith.constant dense<0xFF800000> : vector<8xf32>
    %134 = vector.multi_reduction <maximumf>, %133, %cst_47 [1] : vector<8x12xf32> to vector<8xf32>
    %135 = vector.shape_cast %134 : vector<8xf32> to vector<8x1xf32>
    %136 = vector.broadcast %135 : vector<8x1xf32> to vector<8x12xf32>
    %137 = arith.subf %133, %136 : vector<8x12xf32>
    %138 = math.exp %137 : vector<8x12xf32>
    %cst_48 = arith.constant dense<0.000000e+00> : vector<8xf32>
    %139 = vector.multi_reduction <add>, %138, %cst_48 [1] : vector<8x12xf32> to vector<8xf32>
    %140 = vector.shape_cast %139 : vector<8xf32> to vector<8x1xf32>
    %141 = arith.truncf %138 : vector<8x12xf32> to vector<8x12xbf16>
    %cst_49 = arith.constant dense<0.000000e+00> : vector<8x8xf32>
    %142 = tpu.matmul %141, %130, %cst_49 {dimension_numbers = #tpu.dot_dimension_numbers<[1], [0], [0], [1], [0, 0, 1, 1], [], []>} : vector<8x12xbf16>, vector<12x8xbf16>, vector<8x8xf32> -> vector<8x8xf32>
    %143 = vector.broadcast %140 : vector<8x1xf32> to vector<8x8xf32>
    %144 = arith.divf %142, %143 : vector<8x8xf32>
    %145 = vector.extract_strided_slice %19 {offsets = [0, 56], sizes = [8, 8], strides = [1, 1]} : vector<8x64xbf16> to vector<8x8xbf16>
    %146 = vector.extract_strided_slice %25 {offsets = [0, 56], sizes = [12, 8], strides = [1, 1]} : vector<12x128xbf16> to vector<12x8xbf16>
    %147 = vector.extract_strided_slice %25 {offsets = [0, 120], sizes = [12, 8], strides = [1, 1]} : vector<12x128xbf16> to vector<12x8xbf16>
    %cst_50 = arith.constant dense<0.000000e+00> : vector<8x12xf32>
    %148 = tpu.matmul %145, %146, %cst_50 {dimension_numbers = #tpu.dot_dimension_numbers<[1], [1], [0], [0], [0, 0, 1, 0], [], []>} : vector<8x8xbf16>, vector<12x8xbf16>, vector<8x12xf32> -> vector<8x12xf32>
    %149 = vector.broadcast %11 : vector<1x12xf32> to vector<8x12xf32>
    %150 = arith.addf %148, %149 : vector<8x12xf32>
    %cst_51 = arith.constant dense<0xFF800000> : vector<8xf32>
    %151 = vector.multi_reduction <maximumf>, %150, %cst_51 [1] : vector<8x12xf32> to vector<8xf32>
    %152 = vector.shape_cast %151 : vector<8xf32> to vector<8x1xf32>
    %153 = vector.broadcast %152 : vector<8x1xf32> to vector<8x12xf32>
    %154 = arith.subf %150, %153 : vector<8x12xf32>
    %155 = math.exp %154 : vector<8x12xf32>
    %cst_52 = arith.constant dense<0.000000e+00> : vector<8xf32>
    %156 = vector.multi_reduction <add>, %155, %cst_52 [1] : vector<8x12xf32> to vector<8xf32>
    %157 = vector.shape_cast %156 : vector<8xf32> to vector<8x1xf32>
    %158 = arith.truncf %155 : vector<8x12xf32> to vector<8x12xbf16>
    %cst_53 = arith.constant dense<0.000000e+00> : vector<8x8xf32>
    %159 = tpu.matmul %158, %147, %cst_53 {dimension_numbers = #tpu.dot_dimension_numbers<[1], [0], [0], [1], [0, 0, 1, 1], [], []>} : vector<8x12xbf16>, vector<12x8xbf16>, vector<8x8xf32> -> vector<8x8xf32>
    %160 = vector.broadcast %157 : vector<8x1xf32> to vector<8x8xf32>
    %161 = arith.divf %159, %160 : vector<8x8xf32>
    %162 = tpu.concatenate %42, %59, %76, %93, %110, %127, %144, %161 in 1 : vector<8x8xf32>, vector<8x8xf32>, vector<8x8xf32>, vector<8x8xf32>, vector<8x8xf32>, vector<8x8xf32>, vector<8x8xf32>, vector<8x8xf32> -> vector<8x64xf32>
    %163 = arith.truncf %162 : vector<8x64xf32> to vector<8x64xbf16>
    %c0_54 = arith.constant 0 : index
    %c0_55 = arith.constant 0 : index
    %164 = vector.load %arg8[%c0_54, %c0_55] : memref<64x64xbf16, #tpu.memory_space<vmem>>, vector<64x64xbf16>
    %cst_56 = arith.constant dense<0.000000e+00> : vector<8x64xf32>
    %165 = tpu.matmul %163, %164, %cst_56 {dimension_numbers = #tpu.dot_dimension_numbers<[1], [0], [0], [1], [0, 0, 1, 1], [], []>} : vector<8x64xbf16>, vector<64x64xbf16>, vector<8x64xf32> -> vector<8x64xf32>
    %c0_57 = arith.constant 0 : index
    %c0_58 = arith.constant 0 : index
    %166 = vector.load %arg9[%c0_57, %c0_58] : memref<1x64xf32, #tpu.memory_space<vmem>>, vector<1x64xf32>
    %167 = vector.broadcast %166 : vector<1x64xf32> to vector<8x64xf32>
    %168 = arith.addf %165, %167 : vector<8x64xf32>
    %169 = arith.addf %1, %168 : vector<8x64xf32>
    %cst_59 = arith.constant dense<0.000000e+00> : vector<8xf32>
    %170 = vector.multi_reduction <add>, %169, %cst_59 [1] : vector<8x64xf32> to vector<8xf32>
    %171 = vector.shape_cast %170 : vector<8xf32> to vector<8x1xf32>
    %cst_60 = arith.constant 6.400000e+01 : f32
    %172 = vector.broadcast %cst_60 : f32 to vector<8x1xf32>
    %173 = arith.divf %171, %172 : vector<8x1xf32>
    %174 = vector.broadcast %173 : vector<8x1xf32> to vector<8x64xf32>
    %175 = arith.subf %169, %174 : vector<8x64xf32>
    %176 = arith.mulf %175, %175 : vector<8x64xf32>
    %cst_61 = arith.constant dense<0.000000e+00> : vector<8xf32>
    %177 = vector.multi_reduction <add>, %176, %cst_61 [1] : vector<8x64xf32> to vector<8xf32>
    %178 = vector.shape_cast %177 : vector<8xf32> to vector<8x1xf32>
    %cst_62 = arith.constant 6.400000e+01 : f32
    %179 = vector.broadcast %cst_62 : f32 to vector<8x1xf32>
    %180 = arith.divf %178, %179 : vector<8x1xf32>
    %cst_63 = arith.constant 9.99999974E-6 : f32
    %181 = vector.broadcast %cst_63 : f32 to vector<8x1xf32>
    %182 = arith.addf %180, %181 : vector<8x1xf32>
    %183 = math.rsqrt %182 : vector<8x1xf32>
    %184 = vector.broadcast %183 : vector<8x1xf32> to vector<8x64xf32>
    %185 = arith.mulf %175, %184 : vector<8x64xf32>
    %c0_64 = arith.constant 0 : index
    %c0_65 = arith.constant 0 : index
    %186 = vector.load %arg10[%c0_64, %c0_65] : memref<1x64xf32, #tpu.memory_space<vmem>>, vector<1x64xf32>
    %187 = vector.broadcast %186 : vector<1x64xf32> to vector<8x64xf32>
    %188 = arith.mulf %185, %187 : vector<8x64xf32>
    %c0_66 = arith.constant 0 : index
    %c0_67 = arith.constant 0 : index
    %189 = vector.load %arg11[%c0_66, %c0_67] : memref<1x64xf32, #tpu.memory_space<vmem>>, vector<1x64xf32>
    %190 = vector.broadcast %189 : vector<1x64xf32> to vector<8x64xf32>
    %191 = arith.addf %188, %190 : vector<8x64xf32>
    %192 = arith.truncf %191 : vector<8x64xf32> to vector<8x64xbf16>
    %c0_68 = arith.constant 0 : index
    %c0_69 = arith.constant 0 : index
    %193 = vector.load %arg12[%c0_68, %c0_69] : memref<64x192xbf16, #tpu.memory_space<vmem>>, vector<64x192xbf16>
    %cst_70 = arith.constant dense<0.000000e+00> : vector<8x192xf32>
    %194 = tpu.matmul %192, %193, %cst_70 {dimension_numbers = #tpu.dot_dimension_numbers<[1], [0], [0], [1], [0, 0, 1, 1], [], []>} : vector<8x64xbf16>, vector<64x192xbf16>, vector<8x192xf32> -> vector<8x192xf32>
    %c0_71 = arith.constant 0 : index
    %c0_72 = arith.constant 0 : index
    %195 = vector.load %arg13[%c0_71, %c0_72] : memref<1x192xf32, #tpu.memory_space<vmem>>, vector<1x192xf32>
    %196 = vector.broadcast %195 : vector<1x192xf32> to vector<8x192xf32>
    %197 = arith.addf %194, %196 : vector<8x192xf32>
    %cst_73 = arith.constant 0.000000e+00 : f32
    %198 = vector.broadcast %cst_73 : f32 to vector<8x192xf32>
    %199 = arith.maximumf %197, %198 : vector<8x192xf32>
    %200 = arith.truncf %199 : vector<8x192xf32> to vector<8x192xbf16>
    %c0_74 = arith.constant 0 : index
    %c0_75 = arith.constant 0 : index
    %201 = vector.load %arg14[%c0_74, %c0_75] : memref<192x64xbf16, #tpu.memory_space<vmem>>, vector<192x64xbf16>
    %cst_76 = arith.constant dense<0.000000e+00> : vector<8x64xf32>
    %202 = tpu.matmul %200, %201, %cst_76 {dimension_numbers = #tpu.dot_dimension_numbers<[1], [0], [0], [1], [0, 0, 1, 1], [], []>} : vector<8x192xbf16>, vector<192x64xbf16>, vector<8x64xf32> -> vector<8x64xf32>
    %c0_77 = arith.constant 0 : index
    %c0_78 = arith.constant 0 : index
    %203 = vector.load %arg15[%c0_77, %c0_78] : memref<1x64xf32, #tpu.memory_space<vmem>>, vector<1x64xf32>
    %204 = vector.broadcast %203 : vector<1x64xf32> to vector<8x64xf32>
    %205 = arith.addf %202, %204 : vector<8x64xf32>
    %206 = arith.addf %191, %205 : vector<8x64xf32>
    %cst_79 = arith.constant dense<0.000000e+00> : vector<8xf32>
    %207 = vector.multi_reduction <add>, %206, %cst_79 [1] : vector<8x64xf32> to vector<8xf32>
    %208 = vector.shape_cast %207 : vector<8xf32> to vector<8x1xf32>
    %cst_80 = arith.constant 6.400000e+01 : f32
    %209 = vector.broadcast %cst_80 : f32 to vector<8x1xf32>
    %210 = arith.divf %208, %209 : vector<8x1xf32>
    %211 = vector.broadcast %210 : vector<8x1xf32> to vector<8x64xf32>
    %212 = arith.subf %206, %211 : vector<8x64xf32>
    %213 = arith.mulf %212, %212 : vector<8x64xf32>
    %cst_81 = arith.constant dense<0.000000e+00> : vector<8xf32>
    %214 = vector.multi_reduction <add>, %213, %cst_81 [1] : vector<8x64xf32> to vector<8xf32>
    %215 = vector.shape_cast %214 : vector<8xf32> to vector<8x1xf32>
    %cst_82 = arith.constant 6.400000e+01 : f32
    %216 = vector.broadcast %cst_82 : f32 to vector<8x1xf32>
    %217 = arith.divf %215, %216 : vector<8x1xf32>
    %cst_83 = arith.constant 9.99999974E-6 : f32
    %218 = vector.broadcast %cst_83 : f32 to vector<8x1xf32>
    %219 = arith.addf %217, %218 : vector<8x1xf32>
    %220 = math.rsqrt %219 : vector<8x1xf32>
    %221 = vector.broadcast %220 : vector<8x1xf32> to vector<8x64xf32>
    %222 = arith.mulf %212, %221 : vector<8x64xf32>
    %c0_84 = arith.constant 0 : index
    %c0_85 = arith.constant 0 : index
    %223 = vector.load %arg16[%c0_84, %c0_85] : memref<1x64xf32, #tpu.memory_space<vmem>>, vector<1x64xf32>
    %224 = vector.broadcast %223 : vector<1x64xf32> to vector<8x64xf32>
    %225 = arith.mulf %222, %224 : vector<8x64xf32>
    %c0_86 = arith.constant 0 : index
    %c0_87 = arith.constant 0 : index
    %226 = vector.load %arg17[%c0_86, %c0_87] : memref<1x64xf32, #tpu.memory_space<vmem>>, vector<1x64xf32>
    %227 = vector.broadcast %226 : vector<1x64xf32> to vector<8x64xf32>
    %228 = arith.addf %225, %227 : vector<8x64xf32>
    %229 = arith.addf %228, %1 : vector<8x64xf32>
    %c0_88 = arith.constant 0 : index
    %c0_89 = arith.constant 0 : index
    %c0_90 = arith.constant 0 : index
    %230 = vector.load %arg18[%c0_88, %c0_89, %c0_90] : memref<1x8x64xf32, #tpu.memory_space<vmem>>, vector<1x8x64xf32>
    %231 = vector.shape_cast %230 : vector<1x8x64xf32> to vector<8x64xf32>
    %232 = vector.shape_cast %229 : vector<8x64xf32> to vector<1x8x64xf32>
    tpu.vector_store %arg18[%c0_88, %c0_89, %c0_90], %232 {strides = array<i32>} : memref<1x8x64xf32, #tpu.memory_space<vmem>>, vector<1x8x64xf32>,
    return
  }
  func.func @transform_0(%arg0: i32) -> (i32, i32, i32) {
    %c0_i32 = arith.constant 0 : i32
    %c0_i32_0 = arith.constant 0 : i32
    %c0_i32_1 = arith.constant 0 : i32
    return %arg0, %c0_i32, %c0_i32_0 : i32, i32, i32
  }
  func.func @transform_1(%arg0: i32) -> (i32, i32, i32) {
    %c0_i32 = arith.constant 0 : i32
    %c0_i32_0 = arith.constant 0 : i32
    %c0_i32_1 = arith.constant 0 : i32
    return %arg0, %c0_i32, %c0_i32_0 : i32, i32, i32
  }
  func.func @transform_2(%arg0: i32) -> (i32, i32, i32) {
    %c0_i32 = arith.constant 0 : i32
    %c0_i32_0 = arith.constant 0 : i32
    %c0_i32_1 = arith.constant 0 : i32
    return %arg0, %c0_i32, %c0_i32_0 : i32, i32, i32
  }
  func.func @transform_3(%arg0: i32) -> (i32, i32) {
    %c0_i32 = arith.constant 0 : i32
    %c0_i32_0 = arith.constant 0 : i32
    %c0_i32_1 = arith.constant 0 : i32
    return %c0_i32, %c0_i32_0 : i32, i32
  }
  func.func @transform_4(%arg0: i32) -> (i32, i32) {
    %c0_i32 = arith.constant 0 : i32
    %c0_i32_0 = arith.constant 0 : i32
    %c0_i32_1 = arith.constant 0 : i32
    return %c0_i32, %c0_i32_0 : i32, i32
  }
  func.func @transform_5(%arg0: i32) -> (i32, i32) {
    %c0_i32 = arith.constant 0 : i32
    %c0_i32_0 = arith.constant 0 : i32
    %c0_i32_1 = arith.constant 0 : i32
    return %c0_i32, %c0_i32_0 : i32, i32
  }
  func.func @transform_6(%arg0: i32) -> (i32, i32) {
    %c0_i32 = arith.constant 0 : i32
    %c0_i32_0 = arith.constant 0 : i32
    %c0_i32_1 = arith.constant 0 : i32
    return %c0_i32, %c0_i32_0 : i32, i32
  }
  func.func @transform_7(%arg0: i32) -> (i32, i32) {
    %c0_i32 = arith.constant 0 : i32
    %c0_i32_0 = arith.constant 0 : i32
    %c0_i32_1 = arith.constant 0 : i32
    return %c0_i32, %c0_i32_0 : i32, i32
  }
  func.func @transform_8(%arg0: i32) -> (i32, i32) {
    %c0_i32 = arith.constant 0 : i32
    %c0_i32_0 = arith.constant 0 : i32
    %c0_i32_1 = arith.constant 0 : i32
    return %c0_i32, %c0_i32_0 : i32, i32
  }
  func.func @transform_9(%arg0: i32) -> (i32, i32) {
    %c0_i32 = arith.constant 0 : i32
    %c0_i32_0 = arith.constant 0 : i32
    %c0_i32_1 = arith.constant 0 : i32
    return %c0_i32, %c0_i32_0 : i32, i32
  }
  func.func @transform_10(%arg0: i32) -> (i32, i32) {
    %c0_i32 = arith.constant 0 : i32
    %c0_i32_0 = arith.constant 0 : i32
    %c0_i32_1 = arith.constant 0 : i32
    return %c0_i32, %c0_i32_0 : i32, i32
  }
  func.func @transform_11(%arg0: i32) -> (i32, i32) {
    %c0_i32 = arith.constant 0 : i32
    %c0_i32_0 = arith.constant 0 : i32
    %c0_i32_1 = arith.constant 0 : i32
    return %c0_i32, %c0_i32_0 : i32, i32
  }
  func.func @transform_12(%arg0: i32) -> (i32, i32) {
    %c0_i32 = arith.constant 0 : i32
    %c0_i32_0 = arith.constant 0 : i32
    %c0_i32_1 = arith.constant 0 : i32
    return %c0_i32, %c0_i32_0 : i32, i32
  }
  func.func @transform_13(%arg0: i32) -> (i32, i32) {
    %c0_i32 = arith.constant 0 : i32
    %c0_i32_0 = arith.constant 0 : i32
    %c0_i32_1 = arith.constant 0 : i32
    return %c0_i32, %c0_i32_0 : i32, i32
  }
  func.func @transform_14(%arg0: i32) -> (i32, i32) {
    %c0_i32 = arith.constant 0 : i32
    %c0_i32_0 = arith.constant 0 : i32
    %c0_i32_1 = arith.constant 0 : i32
    return %c0_i32, %c0_i32_0 : i32, i32
  }
  func.func @transform_15(%arg0: i32) -> (i32, i32) {
    %c0_i32 = arith.constant 0 : i32
    %c0_i32_0 = arith.constant 0 : i32
    %c0_i32_1 = arith.constant 0 : i32
    return %c0_i32, %c0_i32_0 : i32, i32
  }
  func.func @transform_16(%arg0: i32) -> (i32, i32) {
    %c0_i32 = arith.constant 0 : i32
    %c0_i32_0 = arith.constant 0 : i32
    %c0_i32_1 = arith.constant 0 : i32
    return %c0_i32, %c0_i32_0 : i32, i32
  }
  func.func @transform_17(%arg0: i32) -> (i32, i32, i32) {
    %c0_i32 = arith.constant 0 : i32
    %c0_i32_0 = arith.constant 0 : i32
    %c0_i32_1 = arith.constant 0 : i32
    return %arg0, %c0_i32, %c0_i32_0 : i32, i32, i32
  }
}

module attributes {stable_mosaic.version = 11 : i64} {
  func.func @_pool_head_kernel(%arg0: i32, %arg1: memref<1x8x64xf32, #tpu.memory_space<vmem>>, %arg2: memref<1x12x64xf32, #tpu.memory_space<vmem>>, %arg3: memref<1x1x8xf32, #tpu.memory_space<vmem>>, %arg4: memref<1x1x12xf32, #tpu.memory_space<vmem>>, %arg5: memref<64x32xbf16, #tpu.memory_space<vmem>>, %arg6: memref<64x32xbf16, #tpu.memory_space<vmem>>, %arg7: memref<1x32xf32, #tpu.memory_space<vmem>>, %arg8: memref<32x1xbf16, #tpu.memory_space<vmem>>, %arg9: memref<1x1xf32, #tpu.memory_space<vmem>>, %arg10: memref<1x1x1xf32, #tpu.memory_space<vmem>>) attributes {dimension_semantics = [#tpu.dimension_semantics<parallel>], iteration_bounds = array<i64: 2>, scalar_prefetch = 0 : i64, scratch_operands = 0 : i64, tpu.core_type = #tpu.core_type<tc>, window_params = [{transform_indices = @transform_0, window_bounds = array<i64: 1, 8, 64>}, {transform_indices = @transform_1, window_bounds = array<i64: 1, 12, 64>}, {transform_indices = @transform_2, window_bounds = array<i64: 1, 1, 8>}, {transform_indices = @transform_3, window_bounds = array<i64: 1, 1, 12>}, {pipeline_mode = #tpu.pipeline_mode<synchronous>, transform_indices = @transform_4, window_bounds = array<i64: 64, 32>}, {pipeline_mode = #tpu.pipeline_mode<synchronous>, transform_indices = @transform_5, window_bounds = array<i64: 64, 32>}, {pipeline_mode = #tpu.pipeline_mode<synchronous>, transform_indices = @transform_6, window_bounds = array<i64: 1, 32>}, {pipeline_mode = #tpu.pipeline_mode<synchronous>, transform_indices = @transform_7, window_bounds = array<i64: 32, 1>}, {pipeline_mode = #tpu.pipeline_mode<synchronous>, transform_indices = @transform_8, window_bounds = array<i64: 1, 1>}, {transform_indices = @transform_9, window_bounds = array<i64: 1, 1, 1>}]} {
    %c0 = arith.constant 0 : index
    %c0_0 = arith.constant 0 : index
    %c0_1 = arith.constant 0 : index
    %0 = vector.load %arg3[%c0, %c0_0, %c0_1] : memref<1x1x8xf32, #tpu.memory_space<vmem>>, vector<1x1x8xf32>
    %1 = vector.shape_cast %0 : vector<1x1x8xf32> to vector<1x8xf32>
    %cst = arith.constant 1.000000e+00 : f32
    %2 = vector.broadcast %cst : f32 to vector<1x8xf32>
    %3 = arith.subf %2, %1 : vector<1x8xf32>
    %4 = arith.truncf %3 : vector<1x8xf32> to vector<1x8xbf16>
    %c0_2 = arith.constant 0 : index
    %c0_3 = arith.constant 0 : index
    %c0_4 = arith.constant 0 : index
    %5 = vector.load %arg4[%c0_2, %c0_3, %c0_4] : memref<1x1x12xf32, #tpu.memory_space<vmem>>, vector<1x1x12xf32>
    %6 = vector.shape_cast %5 : vector<1x1x12xf32> to vector<1x12xf32>
    %cst_5 = arith.constant 1.000000e+00 : f32
    %7 = vector.broadcast %cst_5 : f32 to vector<1x12xf32>
    %8 = arith.subf %7, %6 : vector<1x12xf32>
    %9 = arith.truncf %8 : vector<1x12xf32> to vector<1x12xbf16>
    %c0_6 = arith.constant 0 : index
    %c0_7 = arith.constant 0 : index
    %c0_8 = arith.constant 0 : index
    %10 = vector.load %arg1[%c0_6, %c0_7, %c0_8] : memref<1x8x64xf32, #tpu.memory_space<vmem>>, vector<1x8x64xf32>
    %11 = vector.shape_cast %10 : vector<1x8x64xf32> to vector<8x64xf32>
    %12 = arith.truncf %11 : vector<8x64xf32> to vector<8x64xbf16>
    %cst_9 = arith.constant dense<0.000000e+00> : vector<1x64xf32>
    %13 = tpu.matmul %4, %12, %cst_9 {dimension_numbers = #tpu.dot_dimension_numbers<[1], [0], [0], [1], [0, 0, 1, 1], [], []>} : vector<1x8xbf16>, vector<8x64xbf16>, vector<1x64xf32> -> vector<1x64xf32>
    %cst_10 = arith.constant 1.250000e-01 : f32
    %14 = vector.broadcast %cst_10 : f32 to vector<1x64xf32>
    %15 = arith.mulf %13, %14 : vector<1x64xf32>
    %c0_11 = arith.constant 0 : index
    %c0_12 = arith.constant 0 : index
    %c0_13 = arith.constant 0 : index
    %16 = vector.load %arg2[%c0_11, %c0_12, %c0_13] : memref<1x12x64xf32, #tpu.memory_space<vmem>>, vector<1x12x64xf32>
    %17 = vector.shape_cast %16 : vector<1x12x64xf32> to vector<12x64xf32>
    %18 = arith.truncf %17 : vector<12x64xf32> to vector<12x64xbf16>
    %cst_14 = arith.constant dense<0.000000e+00> : vector<1x64xf32>
    %19 = tpu.matmul %9, %18, %cst_14 {dimension_numbers = #tpu.dot_dimension_numbers<[1], [0], [0], [1], [0, 0, 1, 1], [], []>} : vector<1x12xbf16>, vector<12x64xbf16>, vector<1x64xf32> -> vector<1x64xf32>
    %cst_15 = arith.constant 0.0833333358 : f32
    %20 = vector.broadcast %cst_15 : f32 to vector<1x64xf32>
    %21 = arith.mulf %19, %20 : vector<1x64xf32>
    %22 = arith.truncf %15 : vector<1x64xf32> to vector<1x64xbf16>
    %c0_16 = arith.constant 0 : index
    %c0_17 = arith.constant 0 : index
    %23 = vector.load %arg5[%c0_16, %c0_17] : memref<64x32xbf16, #tpu.memory_space<vmem>>, vector<64x32xbf16>
    %cst_18 = arith.constant dense<0.000000e+00> : vector<1x32xf32>
    %24 = tpu.matmul %22, %23, %cst_18 {dimension_numbers = #tpu.dot_dimension_numbers<[1], [0], [0], [1], [0, 0, 1, 1], [], []>} : vector<1x64xbf16>, vector<64x32xbf16>, vector<1x32xf32> -> vector<1x32xf32>
    %25 = arith.truncf %21 : vector<1x64xf32> to vector<1x64xbf16>
    %c0_19 = arith.constant 0 : index
    %c0_20 = arith.constant 0 : index
    %26 = vector.load %arg6[%c0_19, %c0_20] : memref<64x32xbf16, #tpu.memory_space<vmem>>, vector<64x32xbf16>
    %cst_21 = arith.constant dense<0.000000e+00> : vector<1x32xf32>
    %27 = tpu.matmul %25, %26, %cst_21 {dimension_numbers = #tpu.dot_dimension_numbers<[1], [0], [0], [1], [0, 0, 1, 1], [], []>} : vector<1x64xbf16>, vector<64x32xbf16>, vector<1x32xf32> -> vector<1x32xf32>
    %28 = arith.addf %24, %27 : vector<1x32xf32>
    %c0_22 = arith.constant 0 : index
    %c0_23 = arith.constant 0 : index
    %29 = vector.load %arg7[%c0_22, %c0_23] : memref<1x32xf32, #tpu.memory_space<vmem>>, vector<1x32xf32>
    %30 = arith.addf %28, %29 : vector<1x32xf32>
    %cst_24 = arith.constant 0.000000e+00 : f32
    %31 = vector.broadcast %cst_24 : f32 to vector<1x32xf32>
    %32 = arith.maximumf %30, %31 : vector<1x32xf32>
    %33 = arith.truncf %32 : vector<1x32xf32> to vector<1x32xbf16>
    %c0_25 = arith.constant 0 : index
    %c0_26 = arith.constant 0 : index
    %34 = vector.load %arg8[%c0_25, %c0_26] : memref<32x1xbf16, #tpu.memory_space<vmem>>, vector<32x1xbf16>
    %cst_27 = arith.constant dense<0.000000e+00> : vector<1x1xf32>
    %35 = tpu.matmul %33, %34, %cst_27 {dimension_numbers = #tpu.dot_dimension_numbers<[1], [0], [0], [1], [0, 0, 1, 1], [], []>} : vector<1x32xbf16>, vector<32x1xbf16>, vector<1x1xf32> -> vector<1x1xf32>
    %c0_28 = arith.constant 0 : index
    %c0_29 = arith.constant 0 : index
    %36 = vector.load %arg9[%c0_28, %c0_29] : memref<1x1xf32, #tpu.memory_space<vmem>>, vector<1x1xf32>
    %37 = arith.addf %35, %36 : vector<1x1xf32>
    %c0_30 = arith.constant 0 : index
    %c0_31 = arith.constant 0 : index
    %c0_32 = arith.constant 0 : index
    %38 = vector.load %arg10[%c0_30, %c0_31, %c0_32] : memref<1x1x1xf32, #tpu.memory_space<vmem>>, vector<1x1x1xf32>
    %39 = vector.shape_cast %38 : vector<1x1x1xf32> to vector<1x1xf32>
    %40 = vector.shape_cast %37 : vector<1x1xf32> to vector<1x1x1xf32>
    tpu.vector_store %arg10[%c0_30, %c0_31, %c0_32], %40 {strides = array<i32>} : memref<1x1x1xf32, #tpu.memory_space<vmem>>, vector<1x1x1xf32>,
    return
  }
  func.func @transform_0(%arg0: i32) -> (i32, i32, i32) {
    %c0_i32 = arith.constant 0 : i32
    %c0_i32_0 = arith.constant 0 : i32
    %c0_i32_1 = arith.constant 0 : i32
    return %arg0, %c0_i32, %c0_i32_0 : i32, i32, i32
  }
  func.func @transform_1(%arg0: i32) -> (i32, i32, i32) {
    %c0_i32 = arith.constant 0 : i32
    %c0_i32_0 = arith.constant 0 : i32
    %c0_i32_1 = arith.constant 0 : i32
    return %arg0, %c0_i32, %c0_i32_0 : i32, i32, i32
  }
  func.func @transform_2(%arg0: i32) -> (i32, i32, i32) {
    %c0_i32 = arith.constant 0 : i32
    %c0_i32_0 = arith.constant 0 : i32
    %c0_i32_1 = arith.constant 0 : i32
    return %arg0, %c0_i32, %c0_i32_0 : i32, i32, i32
  }
  func.func @transform_3(%arg0: i32) -> (i32, i32, i32) {
    %c0_i32 = arith.constant 0 : i32
    %c0_i32_0 = arith.constant 0 : i32
    %c0_i32_1 = arith.constant 0 : i32
    return %arg0, %c0_i32, %c0_i32_0 : i32, i32, i32
  }
  func.func @transform_4(%arg0: i32) -> (i32, i32) {
    %c0_i32 = arith.constant 0 : i32
    %c0_i32_0 = arith.constant 0 : i32
    %c0_i32_1 = arith.constant 0 : i32
    return %c0_i32, %c0_i32_0 : i32, i32
  }
  func.func @transform_5(%arg0: i32) -> (i32, i32) {
    %c0_i32 = arith.constant 0 : i32
    %c0_i32_0 = arith.constant 0 : i32
    %c0_i32_1 = arith.constant 0 : i32
    return %c0_i32, %c0_i32_0 : i32, i32
  }
  func.func @transform_6(%arg0: i32) -> (i32, i32) {
    %c0_i32 = arith.constant 0 : i32
    %c0_i32_0 = arith.constant 0 : i32
    %c0_i32_1 = arith.constant 0 : i32
    return %c0_i32, %c0_i32_0 : i32, i32
  }
  func.func @transform_7(%arg0: i32) -> (i32, i32) {
    %c0_i32 = arith.constant 0 : i32
    %c0_i32_0 = arith.constant 0 : i32
    %c0_i32_1 = arith.constant 0 : i32
    return %c0_i32, %c0_i32_0 : i32, i32
  }
  func.func @transform_8(%arg0: i32) -> (i32, i32) {
    %c0_i32 = arith.constant 0 : i32
    %c0_i32_0 = arith.constant 0 : i32
    %c0_i32_1 = arith.constant 0 : i32
    return %c0_i32, %c0_i32_0 : i32, i32
  }
  func.func @transform_9(%arg0: i32) -> (i32, i32, i32) {
    %c0_i32 = arith.constant 0 : i32
    %c0_i32_0 = arith.constant 0 : i32
    %c0_i32_1 = arith.constant 0 : i32
    return %arg0, %c0_i32, %c0_i32_0 : i32, i32, i32
  }
}

module attributes {stable_mosaic.version = 11 : i64} {
  func.func @_xattn_ffn_kernel(%arg0: i32, %arg1: memref<1x12x64xf32, #tpu.memory_space<vmem>>, %arg2: memref<1x8x64xf32, #tpu.memory_space<vmem>>, %arg3: memref<1x1x8xf32, #tpu.memory_space<vmem>>, %arg4: memref<64x64xbf16, #tpu.memory_space<vmem>>, %arg5: memref<1x64xf32, #tpu.memory_space<vmem>>, %arg6: memref<64x128xbf16, #tpu.memory_space<vmem>>, %arg7: memref<1x128xf32, #tpu.memory_space<vmem>>, %arg8: memref<64x64xbf16, #tpu.memory_space<vmem>>, %arg9: memref<1x64xf32, #tpu.memory_space<vmem>>, %arg10: memref<1x64xf32, #tpu.memory_space<vmem>>, %arg11: memref<1x64xf32, #tpu.memory_space<vmem>>, %arg12: memref<64x192xbf16, #tpu.memory_space<vmem>>, %arg13: memref<1x192xf32, #tpu.memory_space<vmem>>, %arg14: memref<192x64xbf16, #tpu.memory_space<vmem>>, %arg15: memref<1x64xf32, #tpu.memory_space<vmem>>, %arg16: memref<1x64xf32, #tpu.memory_space<vmem>>, %arg17: memref<1x64xf32, #tpu.memory_space<vmem>>, %arg18: memref<1x12x64xf32, #tpu.memory_space<vmem>>) attributes {dimension_semantics = [#tpu.dimension_semantics<parallel>], iteration_bounds = array<i64: 2>, scalar_prefetch = 0 : i64, scratch_operands = 0 : i64, tpu.core_type = #tpu.core_type<tc>, window_params = [{transform_indices = @transform_0, window_bounds = array<i64: 1, 12, 64>}, {transform_indices = @transform_1, window_bounds = array<i64: 1, 8, 64>}, {transform_indices = @transform_2, window_bounds = array<i64: 1, 1, 8>}, {pipeline_mode = #tpu.pipeline_mode<synchronous>, transform_indices = @transform_3, window_bounds = array<i64: 64, 64>}, {pipeline_mode = #tpu.pipeline_mode<synchronous>, transform_indices = @transform_4, window_bounds = array<i64: 1, 64>}, {pipeline_mode = #tpu.pipeline_mode<synchronous>, transform_indices = @transform_5, window_bounds = array<i64: 64, 128>}, {pipeline_mode = #tpu.pipeline_mode<synchronous>, transform_indices = @transform_6, window_bounds = array<i64: 1, 128>}, {pipeline_mode = #tpu.pipeline_mode<synchronous>, transform_indices = @transform_7, window_bounds = array<i64: 64, 64>}, {pipeline_mode = #tpu.pipeline_mode<synchronous>, transform_indices = @transform_8, window_bounds = array<i64: 1, 64>}, {pipeline_mode = #tpu.pipeline_mode<synchronous>, transform_indices = @transform_9, window_bounds = array<i64: 1, 64>}, {pipeline_mode = #tpu.pipeline_mode<synchronous>, transform_indices = @transform_10, window_bounds = array<i64: 1, 64>}, {pipeline_mode = #tpu.pipeline_mode<synchronous>, transform_indices = @transform_11, window_bounds = array<i64: 64, 192>}, {pipeline_mode = #tpu.pipeline_mode<synchronous>, transform_indices = @transform_12, window_bounds = array<i64: 1, 192>}, {pipeline_mode = #tpu.pipeline_mode<synchronous>, transform_indices = @transform_13, window_bounds = array<i64: 192, 64>}, {pipeline_mode = #tpu.pipeline_mode<synchronous>, transform_indices = @transform_14, window_bounds = array<i64: 1, 64>}, {pipeline_mode = #tpu.pipeline_mode<synchronous>, transform_indices = @transform_15, window_bounds = array<i64: 1, 64>}, {pipeline_mode = #tpu.pipeline_mode<synchronous>, transform_indices = @transform_16, window_bounds = array<i64: 1, 64>}, {transform_indices = @transform_17, window_bounds = array<i64: 1, 12, 64>}]} {
    %c0 = arith.constant 0 : index
    %c0_0 = arith.constant 0 : index
    %c0_1 = arith.constant 0 : index
    %0 = vector.load %arg1[%c0, %c0_0, %c0_1] : memref<1x12x64xf32, #tpu.memory_space<vmem>>, vector<1x12x64xf32>
    %1 = vector.shape_cast %0 : vector<1x12x64xf32> to vector<12x64xf32>
    %c0_2 = arith.constant 0 : index
    %c0_3 = arith.constant 0 : index
    %c0_4 = arith.constant 0 : index
    %2 = vector.load %arg1[%c0_2, %c0_3, %c0_4] : memref<1x12x64xf32, #tpu.memory_space<vmem>>, vector<1x12x64xf32>
    %3 = vector.shape_cast %2 : vector<1x12x64xf32> to vector<12x64xf32>
    %4 = arith.truncf %3 : vector<12x64xf32> to vector<12x64xbf16>
    %c0_5 = arith.constant 0 : index
    %c0_6 = arith.constant 0 : index
    %c0_7 = arith.constant 0 : index
    %5 = vector.load %arg2[%c0_5, %c0_6, %c0_7] : memref<1x8x64xf32, #tpu.memory_space<vmem>>, vector<1x8x64xf32>
    %6 = vector.shape_cast %5 : vector<1x8x64xf32> to vector<8x64xf32>
    %7 = arith.truncf %6 : vector<8x64xf32> to vector<8x64xbf16>
    %c0_8 = arith.constant 0 : index
    %c0_9 = arith.constant 0 : index
    %c0_10 = arith.constant 0 : index
    %8 = vector.load %arg3[%c0_8, %c0_9, %c0_10] : memref<1x1x8xf32, #tpu.memory_space<vmem>>, vector<1x1x8xf32>
    %9 = vector.shape_cast %8 : vector<1x1x8xf32> to vector<1x8xf32>
    %cst = arith.constant -1.000000e+09 : f32
    %10 = vector.broadcast %cst : f32 to vector<1x8xf32>
    %11 = arith.mulf %9, %10 : vector<1x8xf32>
    %c0_11 = arith.constant 0 : index
    %c0_12 = arith.constant 0 : index
    %12 = vector.load %arg4[%c0_11, %c0_12] : memref<64x64xbf16, #tpu.memory_space<vmem>>, vector<64x64xbf16>
    %cst_13 = arith.constant dense<0.000000e+00> : vector<12x64xf32>
    %13 = tpu.matmul %4, %12, %cst_13 {dimension_numbers = #tpu.dot_dimension_numbers<[1], [0], [0], [1], [0, 0, 1, 1], [], []>} : vector<12x64xbf16>, vector<64x64xbf16>, vector<12x64xf32> -> vector<12x64xf32>
    %c0_14 = arith.constant 0 : index
    %c0_15 = arith.constant 0 : index
    %14 = vector.load %arg5[%c0_14, %c0_15] : memref<1x64xf32, #tpu.memory_space<vmem>>, vector<1x64xf32>
    %15 = vector.broadcast %14 : vector<1x64xf32> to vector<12x64xf32>
    %16 = arith.addf %13, %15 : vector<12x64xf32>
    %cst_16 = arith.constant 0.353553385 : f32
    %17 = vector.broadcast %cst_16 : f32 to vector<12x64xf32>
    %18 = arith.mulf %16, %17 : vector<12x64xf32>
    %19 = arith.truncf %18 : vector<12x64xf32> to vector<12x64xbf16>
    %c0_17 = arith.constant 0 : index
    %c0_18 = arith.constant 0 : index
    %20 = vector.load %arg6[%c0_17, %c0_18] : memref<64x128xbf16, #tpu.memory_space<vmem>>, vector<64x128xbf16>
    %cst_19 = arith.constant dense<0.000000e+00> : vector<8x128xf32>
    %21 = tpu.matmul %7, %20, %cst_19 {dimension_numbers = #tpu.dot_dimension_numbers<[1], [0], [0], [1], [0, 0, 1, 1], [], []>} : vector<8x64xbf16>, vector<64x128xbf16>, vector<8x128xf32> -> vector<8x128xf32>
    %c0_20 = arith.constant 0 : index
    %c0_21 = arith.constant 0 : index
    %22 = vector.load %arg7[%c0_20, %c0_21] : memref<1x128xf32, #tpu.memory_space<vmem>>, vector<1x128xf32>
    %23 = vector.broadcast %22 : vector<1x128xf32> to vector<8x128xf32>
    %24 = arith.addf %21, %23 : vector<8x128xf32>
    %25 = arith.truncf %24 : vector<8x128xf32> to vector<8x128xbf16>
    %26 = vector.extract_strided_slice %19 {offsets = [0, 0], sizes = [12, 8], strides = [1, 1]} : vector<12x64xbf16> to vector<12x8xbf16>
    %27 = vector.extract_strided_slice %25 {offsets = [0, 0], sizes = [8, 8], strides = [1, 1]} : vector<8x128xbf16> to vector<8x8xbf16>
    %28 = vector.extract_strided_slice %25 {offsets = [0, 64], sizes = [8, 8], strides = [1, 1]} : vector<8x128xbf16> to vector<8x8xbf16>
    %cst_22 = arith.constant dense<0.000000e+00> : vector<12x8xf32>
    %29 = tpu.matmul %26, %27, %cst_22 {dimension_numbers = #tpu.dot_dimension_numbers<[1], [1], [0], [0], [0, 0, 1, 0], [], []>} : vector<12x8xbf16>, vector<8x8xbf16>, vector<12x8xf32> -> vector<12x8xf32>
    %30 = vector.broadcast %11 : vector<1x8xf32> to vector<12x8xf32>
    %31 = arith.addf %29, %30 : vector<12x8xf32>
    %cst_23 = arith.constant dense<0xFF800000> : vector<12xf32>
    %32 = vector.multi_reduction <maximumf>, %31, %cst_23 [1] : vector<12x8xf32> to vector<12xf32>
    %33 = vector.shape_cast %32 : vector<12xf32> to vector<12x1xf32>
    %34 = vector.broadcast %33 : vector<12x1xf32> to vector<12x8xf32>
    %35 = arith.subf %31, %34 : vector<12x8xf32>
    %36 = math.exp %35 : vector<12x8xf32>
    %cst_24 = arith.constant dense<0.000000e+00> : vector<12xf32>
    %37 = vector.multi_reduction <add>, %36, %cst_24 [1] : vector<12x8xf32> to vector<12xf32>
    %38 = vector.shape_cast %37 : vector<12xf32> to vector<12x1xf32>
    %39 = arith.truncf %36 : vector<12x8xf32> to vector<12x8xbf16>
    %cst_25 = arith.constant dense<0.000000e+00> : vector<12x8xf32>
    %40 = tpu.matmul %39, %28, %cst_25 {dimension_numbers = #tpu.dot_dimension_numbers<[1], [0], [0], [1], [0, 0, 1, 1], [], []>} : vector<12x8xbf16>, vector<8x8xbf16>, vector<12x8xf32> -> vector<12x8xf32>
    %41 = vector.broadcast %38 : vector<12x1xf32> to vector<12x8xf32>
    %42 = arith.divf %40, %41 : vector<12x8xf32>
    %43 = vector.extract_strided_slice %19 {offsets = [0, 8], sizes = [12, 8], strides = [1, 1]} : vector<12x64xbf16> to vector<12x8xbf16>
    %44 = vector.extract_strided_slice %25 {offsets = [0, 8], sizes = [8, 8], strides = [1, 1]} : vector<8x128xbf16> to vector<8x8xbf16>
    %45 = vector.extract_strided_slice %25 {offsets = [0, 72], sizes = [8, 8], strides = [1, 1]} : vector<8x128xbf16> to vector<8x8xbf16>
    %cst_26 = arith.constant dense<0.000000e+00> : vector<12x8xf32>
    %46 = tpu.matmul %43, %44, %cst_26 {dimension_numbers = #tpu.dot_dimension_numbers<[1], [1], [0], [0], [0, 0, 1, 0], [], []>} : vector<12x8xbf16>, vector<8x8xbf16>, vector<12x8xf32> -> vector<12x8xf32>
    %47 = vector.broadcast %11 : vector<1x8xf32> to vector<12x8xf32>
    %48 = arith.addf %46, %47 : vector<12x8xf32>
    %cst_27 = arith.constant dense<0xFF800000> : vector<12xf32>
    %49 = vector.multi_reduction <maximumf>, %48, %cst_27 [1] : vector<12x8xf32> to vector<12xf32>
    %50 = vector.shape_cast %49 : vector<12xf32> to vector<12x1xf32>
    %51 = vector.broadcast %50 : vector<12x1xf32> to vector<12x8xf32>
    %52 = arith.subf %48, %51 : vector<12x8xf32>
    %53 = math.exp %52 : vector<12x8xf32>
    %cst_28 = arith.constant dense<0.000000e+00> : vector<12xf32>
    %54 = vector.multi_reduction <add>, %53, %cst_28 [1] : vector<12x8xf32> to vector<12xf32>
    %55 = vector.shape_cast %54 : vector<12xf32> to vector<12x1xf32>
    %56 = arith.truncf %53 : vector<12x8xf32> to vector<12x8xbf16>
    %cst_29 = arith.constant dense<0.000000e+00> : vector<12x8xf32>
    %57 = tpu.matmul %56, %45, %cst_29 {dimension_numbers = #tpu.dot_dimension_numbers<[1], [0], [0], [1], [0, 0, 1, 1], [], []>} : vector<12x8xbf16>, vector<8x8xbf16>, vector<12x8xf32> -> vector<12x8xf32>
    %58 = vector.broadcast %55 : vector<12x1xf32> to vector<12x8xf32>
    %59 = arith.divf %57, %58 : vector<12x8xf32>
    %60 = vector.extract_strided_slice %19 {offsets = [0, 16], sizes = [12, 8], strides = [1, 1]} : vector<12x64xbf16> to vector<12x8xbf16>
    %61 = vector.extract_strided_slice %25 {offsets = [0, 16], sizes = [8, 8], strides = [1, 1]} : vector<8x128xbf16> to vector<8x8xbf16>
    %62 = vector.extract_strided_slice %25 {offsets = [0, 80], sizes = [8, 8], strides = [1, 1]} : vector<8x128xbf16> to vector<8x8xbf16>
    %cst_30 = arith.constant dense<0.000000e+00> : vector<12x8xf32>
    %63 = tpu.matmul %60, %61, %cst_30 {dimension_numbers = #tpu.dot_dimension_numbers<[1], [1], [0], [0], [0, 0, 1, 0], [], []>} : vector<12x8xbf16>, vector<8x8xbf16>, vector<12x8xf32> -> vector<12x8xf32>
    %64 = vector.broadcast %11 : vector<1x8xf32> to vector<12x8xf32>
    %65 = arith.addf %63, %64 : vector<12x8xf32>
    %cst_31 = arith.constant dense<0xFF800000> : vector<12xf32>
    %66 = vector.multi_reduction <maximumf>, %65, %cst_31 [1] : vector<12x8xf32> to vector<12xf32>
    %67 = vector.shape_cast %66 : vector<12xf32> to vector<12x1xf32>
    %68 = vector.broadcast %67 : vector<12x1xf32> to vector<12x8xf32>
    %69 = arith.subf %65, %68 : vector<12x8xf32>
    %70 = math.exp %69 : vector<12x8xf32>
    %cst_32 = arith.constant dense<0.000000e+00> : vector<12xf32>
    %71 = vector.multi_reduction <add>, %70, %cst_32 [1] : vector<12x8xf32> to vector<12xf32>
    %72 = vector.shape_cast %71 : vector<12xf32> to vector<12x1xf32>
    %73 = arith.truncf %70 : vector<12x8xf32> to vector<12x8xbf16>
    %cst_33 = arith.constant dense<0.000000e+00> : vector<12x8xf32>
    %74 = tpu.matmul %73, %62, %cst_33 {dimension_numbers = #tpu.dot_dimension_numbers<[1], [0], [0], [1], [0, 0, 1, 1], [], []>} : vector<12x8xbf16>, vector<8x8xbf16>, vector<12x8xf32> -> vector<12x8xf32>
    %75 = vector.broadcast %72 : vector<12x1xf32> to vector<12x8xf32>
    %76 = arith.divf %74, %75 : vector<12x8xf32>
    %77 = vector.extract_strided_slice %19 {offsets = [0, 24], sizes = [12, 8], strides = [1, 1]} : vector<12x64xbf16> to vector<12x8xbf16>
    %78 = vector.extract_strided_slice %25 {offsets = [0, 24], sizes = [8, 8], strides = [1, 1]} : vector<8x128xbf16> to vector<8x8xbf16>
    %79 = vector.extract_strided_slice %25 {offsets = [0, 88], sizes = [8, 8], strides = [1, 1]} : vector<8x128xbf16> to vector<8x8xbf16>
    %cst_34 = arith.constant dense<0.000000e+00> : vector<12x8xf32>
    %80 = tpu.matmul %77, %78, %cst_34 {dimension_numbers = #tpu.dot_dimension_numbers<[1], [1], [0], [0], [0, 0, 1, 0], [], []>} : vector<12x8xbf16>, vector<8x8xbf16>, vector<12x8xf32> -> vector<12x8xf32>
    %81 = vector.broadcast %11 : vector<1x8xf32> to vector<12x8xf32>
    %82 = arith.addf %80, %81 : vector<12x8xf32>
    %cst_35 = arith.constant dense<0xFF800000> : vector<12xf32>
    %83 = vector.multi_reduction <maximumf>, %82, %cst_35 [1] : vector<12x8xf32> to vector<12xf32>
    %84 = vector.shape_cast %83 : vector<12xf32> to vector<12x1xf32>
    %85 = vector.broadcast %84 : vector<12x1xf32> to vector<12x8xf32>
    %86 = arith.subf %82, %85 : vector<12x8xf32>
    %87 = math.exp %86 : vector<12x8xf32>
    %cst_36 = arith.constant dense<0.000000e+00> : vector<12xf32>
    %88 = vector.multi_reduction <add>, %87, %cst_36 [1] : vector<12x8xf32> to vector<12xf32>
    %89 = vector.shape_cast %88 : vector<12xf32> to vector<12x1xf32>
    %90 = arith.truncf %87 : vector<12x8xf32> to vector<12x8xbf16>
    %cst_37 = arith.constant dense<0.000000e+00> : vector<12x8xf32>
    %91 = tpu.matmul %90, %79, %cst_37 {dimension_numbers = #tpu.dot_dimension_numbers<[1], [0], [0], [1], [0, 0, 1, 1], [], []>} : vector<12x8xbf16>, vector<8x8xbf16>, vector<12x8xf32> -> vector<12x8xf32>
    %92 = vector.broadcast %89 : vector<12x1xf32> to vector<12x8xf32>
    %93 = arith.divf %91, %92 : vector<12x8xf32>
    %94 = vector.extract_strided_slice %19 {offsets = [0, 32], sizes = [12, 8], strides = [1, 1]} : vector<12x64xbf16> to vector<12x8xbf16>
    %95 = vector.extract_strided_slice %25 {offsets = [0, 32], sizes = [8, 8], strides = [1, 1]} : vector<8x128xbf16> to vector<8x8xbf16>
    %96 = vector.extract_strided_slice %25 {offsets = [0, 96], sizes = [8, 8], strides = [1, 1]} : vector<8x128xbf16> to vector<8x8xbf16>
    %cst_38 = arith.constant dense<0.000000e+00> : vector<12x8xf32>
    %97 = tpu.matmul %94, %95, %cst_38 {dimension_numbers = #tpu.dot_dimension_numbers<[1], [1], [0], [0], [0, 0, 1, 0], [], []>} : vector<12x8xbf16>, vector<8x8xbf16>, vector<12x8xf32> -> vector<12x8xf32>
    %98 = vector.broadcast %11 : vector<1x8xf32> to vector<12x8xf32>
    %99 = arith.addf %97, %98 : vector<12x8xf32>
    %cst_39 = arith.constant dense<0xFF800000> : vector<12xf32>
    %100 = vector.multi_reduction <maximumf>, %99, %cst_39 [1] : vector<12x8xf32> to vector<12xf32>
    %101 = vector.shape_cast %100 : vector<12xf32> to vector<12x1xf32>
    %102 = vector.broadcast %101 : vector<12x1xf32> to vector<12x8xf32>
    %103 = arith.subf %99, %102 : vector<12x8xf32>
    %104 = math.exp %103 : vector<12x8xf32>
    %cst_40 = arith.constant dense<0.000000e+00> : vector<12xf32>
    %105 = vector.multi_reduction <add>, %104, %cst_40 [1] : vector<12x8xf32> to vector<12xf32>
    %106 = vector.shape_cast %105 : vector<12xf32> to vector<12x1xf32>
    %107 = arith.truncf %104 : vector<12x8xf32> to vector<12x8xbf16>
    %cst_41 = arith.constant dense<0.000000e+00> : vector<12x8xf32>
    %108 = tpu.matmul %107, %96, %cst_41 {dimension_numbers = #tpu.dot_dimension_numbers<[1], [0], [0], [1], [0, 0, 1, 1], [], []>} : vector<12x8xbf16>, vector<8x8xbf16>, vector<12x8xf32> -> vector<12x8xf32>
    %109 = vector.broadcast %106 : vector<12x1xf32> to vector<12x8xf32>
    %110 = arith.divf %108, %109 : vector<12x8xf32>
    %111 = vector.extract_strided_slice %19 {offsets = [0, 40], sizes = [12, 8], strides = [1, 1]} : vector<12x64xbf16> to vector<12x8xbf16>
    %112 = vector.extract_strided_slice %25 {offsets = [0, 40], sizes = [8, 8], strides = [1, 1]} : vector<8x128xbf16> to vector<8x8xbf16>
    %113 = vector.extract_strided_slice %25 {offsets = [0, 104], sizes = [8, 8], strides = [1, 1]} : vector<8x128xbf16> to vector<8x8xbf16>
    %cst_42 = arith.constant dense<0.000000e+00> : vector<12x8xf32>
    %114 = tpu.matmul %111, %112, %cst_42 {dimension_numbers = #tpu.dot_dimension_numbers<[1], [1], [0], [0], [0, 0, 1, 0], [], []>} : vector<12x8xbf16>, vector<8x8xbf16>, vector<12x8xf32> -> vector<12x8xf32>
    %115 = vector.broadcast %11 : vector<1x8xf32> to vector<12x8xf32>
    %116 = arith.addf %114, %115 : vector<12x8xf32>
    %cst_43 = arith.constant dense<0xFF800000> : vector<12xf32>
    %117 = vector.multi_reduction <maximumf>, %116, %cst_43 [1] : vector<12x8xf32> to vector<12xf32>
    %118 = vector.shape_cast %117 : vector<12xf32> to vector<12x1xf32>
    %119 = vector.broadcast %118 : vector<12x1xf32> to vector<12x8xf32>
    %120 = arith.subf %116, %119 : vector<12x8xf32>
    %121 = math.exp %120 : vector<12x8xf32>
    %cst_44 = arith.constant dense<0.000000e+00> : vector<12xf32>
    %122 = vector.multi_reduction <add>, %121, %cst_44 [1] : vector<12x8xf32> to vector<12xf32>
    %123 = vector.shape_cast %122 : vector<12xf32> to vector<12x1xf32>
    %124 = arith.truncf %121 : vector<12x8xf32> to vector<12x8xbf16>
    %cst_45 = arith.constant dense<0.000000e+00> : vector<12x8xf32>
    %125 = tpu.matmul %124, %113, %cst_45 {dimension_numbers = #tpu.dot_dimension_numbers<[1], [0], [0], [1], [0, 0, 1, 1], [], []>} : vector<12x8xbf16>, vector<8x8xbf16>, vector<12x8xf32> -> vector<12x8xf32>
    %126 = vector.broadcast %123 : vector<12x1xf32> to vector<12x8xf32>
    %127 = arith.divf %125, %126 : vector<12x8xf32>
    %128 = vector.extract_strided_slice %19 {offsets = [0, 48], sizes = [12, 8], strides = [1, 1]} : vector<12x64xbf16> to vector<12x8xbf16>
    %129 = vector.extract_strided_slice %25 {offsets = [0, 48], sizes = [8, 8], strides = [1, 1]} : vector<8x128xbf16> to vector<8x8xbf16>
    %130 = vector.extract_strided_slice %25 {offsets = [0, 112], sizes = [8, 8], strides = [1, 1]} : vector<8x128xbf16> to vector<8x8xbf16>
    %cst_46 = arith.constant dense<0.000000e+00> : vector<12x8xf32>
    %131 = tpu.matmul %128, %129, %cst_46 {dimension_numbers = #tpu.dot_dimension_numbers<[1], [1], [0], [0], [0, 0, 1, 0], [], []>} : vector<12x8xbf16>, vector<8x8xbf16>, vector<12x8xf32> -> vector<12x8xf32>
    %132 = vector.broadcast %11 : vector<1x8xf32> to vector<12x8xf32>
    %133 = arith.addf %131, %132 : vector<12x8xf32>
    %cst_47 = arith.constant dense<0xFF800000> : vector<12xf32>
    %134 = vector.multi_reduction <maximumf>, %133, %cst_47 [1] : vector<12x8xf32> to vector<12xf32>
    %135 = vector.shape_cast %134 : vector<12xf32> to vector<12x1xf32>
    %136 = vector.broadcast %135 : vector<12x1xf32> to vector<12x8xf32>
    %137 = arith.subf %133, %136 : vector<12x8xf32>
    %138 = math.exp %137 : vector<12x8xf32>
    %cst_48 = arith.constant dense<0.000000e+00> : vector<12xf32>
    %139 = vector.multi_reduction <add>, %138, %cst_48 [1] : vector<12x8xf32> to vector<12xf32>
    %140 = vector.shape_cast %139 : vector<12xf32> to vector<12x1xf32>
    %141 = arith.truncf %138 : vector<12x8xf32> to vector<12x8xbf16>
    %cst_49 = arith.constant dense<0.000000e+00> : vector<12x8xf32>
    %142 = tpu.matmul %141, %130, %cst_49 {dimension_numbers = #tpu.dot_dimension_numbers<[1], [0], [0], [1], [0, 0, 1, 1], [], []>} : vector<12x8xbf16>, vector<8x8xbf16>, vector<12x8xf32> -> vector<12x8xf32>
    %143 = vector.broadcast %140 : vector<12x1xf32> to vector<12x8xf32>
    %144 = arith.divf %142, %143 : vector<12x8xf32>
    %145 = vector.extract_strided_slice %19 {offsets = [0, 56], sizes = [12, 8], strides = [1, 1]} : vector<12x64xbf16> to vector<12x8xbf16>
    %146 = vector.extract_strided_slice %25 {offsets = [0, 56], sizes = [8, 8], strides = [1, 1]} : vector<8x128xbf16> to vector<8x8xbf16>
    %147 = vector.extract_strided_slice %25 {offsets = [0, 120], sizes = [8, 8], strides = [1, 1]} : vector<8x128xbf16> to vector<8x8xbf16>
    %cst_50 = arith.constant dense<0.000000e+00> : vector<12x8xf32>
    %148 = tpu.matmul %145, %146, %cst_50 {dimension_numbers = #tpu.dot_dimension_numbers<[1], [1], [0], [0], [0, 0, 1, 0], [], []>} : vector<12x8xbf16>, vector<8x8xbf16>, vector<12x8xf32> -> vector<12x8xf32>
    %149 = vector.broadcast %11 : vector<1x8xf32> to vector<12x8xf32>
    %150 = arith.addf %148, %149 : vector<12x8xf32>
    %cst_51 = arith.constant dense<0xFF800000> : vector<12xf32>
    %151 = vector.multi_reduction <maximumf>, %150, %cst_51 [1] : vector<12x8xf32> to vector<12xf32>
    %152 = vector.shape_cast %151 : vector<12xf32> to vector<12x1xf32>
    %153 = vector.broadcast %152 : vector<12x1xf32> to vector<12x8xf32>
    %154 = arith.subf %150, %153 : vector<12x8xf32>
    %155 = math.exp %154 : vector<12x8xf32>
    %cst_52 = arith.constant dense<0.000000e+00> : vector<12xf32>
    %156 = vector.multi_reduction <add>, %155, %cst_52 [1] : vector<12x8xf32> to vector<12xf32>
    %157 = vector.shape_cast %156 : vector<12xf32> to vector<12x1xf32>
    %158 = arith.truncf %155 : vector<12x8xf32> to vector<12x8xbf16>
    %cst_53 = arith.constant dense<0.000000e+00> : vector<12x8xf32>
    %159 = tpu.matmul %158, %147, %cst_53 {dimension_numbers = #tpu.dot_dimension_numbers<[1], [0], [0], [1], [0, 0, 1, 1], [], []>} : vector<12x8xbf16>, vector<8x8xbf16>, vector<12x8xf32> -> vector<12x8xf32>
    %160 = vector.broadcast %157 : vector<12x1xf32> to vector<12x8xf32>
    %161 = arith.divf %159, %160 : vector<12x8xf32>
    %162 = tpu.concatenate %42, %59, %76, %93, %110, %127, %144, %161 in 1 : vector<12x8xf32>, vector<12x8xf32>, vector<12x8xf32>, vector<12x8xf32>, vector<12x8xf32>, vector<12x8xf32>, vector<12x8xf32>, vector<12x8xf32> -> vector<12x64xf32>
    %163 = arith.truncf %162 : vector<12x64xf32> to vector<12x64xbf16>
    %c0_54 = arith.constant 0 : index
    %c0_55 = arith.constant 0 : index
    %164 = vector.load %arg8[%c0_54, %c0_55] : memref<64x64xbf16, #tpu.memory_space<vmem>>, vector<64x64xbf16>
    %cst_56 = arith.constant dense<0.000000e+00> : vector<12x64xf32>
    %165 = tpu.matmul %163, %164, %cst_56 {dimension_numbers = #tpu.dot_dimension_numbers<[1], [0], [0], [1], [0, 0, 1, 1], [], []>} : vector<12x64xbf16>, vector<64x64xbf16>, vector<12x64xf32> -> vector<12x64xf32>
    %c0_57 = arith.constant 0 : index
    %c0_58 = arith.constant 0 : index
    %166 = vector.load %arg9[%c0_57, %c0_58] : memref<1x64xf32, #tpu.memory_space<vmem>>, vector<1x64xf32>
    %167 = vector.broadcast %166 : vector<1x64xf32> to vector<12x64xf32>
    %168 = arith.addf %165, %167 : vector<12x64xf32>
    %169 = arith.addf %1, %168 : vector<12x64xf32>
    %cst_59 = arith.constant dense<0.000000e+00> : vector<12xf32>
    %170 = vector.multi_reduction <add>, %169, %cst_59 [1] : vector<12x64xf32> to vector<12xf32>
    %171 = vector.shape_cast %170 : vector<12xf32> to vector<12x1xf32>
    %cst_60 = arith.constant 6.400000e+01 : f32
    %172 = vector.broadcast %cst_60 : f32 to vector<12x1xf32>
    %173 = arith.divf %171, %172 : vector<12x1xf32>
    %174 = vector.broadcast %173 : vector<12x1xf32> to vector<12x64xf32>
    %175 = arith.subf %169, %174 : vector<12x64xf32>
    %176 = arith.mulf %175, %175 : vector<12x64xf32>
    %cst_61 = arith.constant dense<0.000000e+00> : vector<12xf32>
    %177 = vector.multi_reduction <add>, %176, %cst_61 [1] : vector<12x64xf32> to vector<12xf32>
    %178 = vector.shape_cast %177 : vector<12xf32> to vector<12x1xf32>
    %cst_62 = arith.constant 6.400000e+01 : f32
    %179 = vector.broadcast %cst_62 : f32 to vector<12x1xf32>
    %180 = arith.divf %178, %179 : vector<12x1xf32>
    %cst_63 = arith.constant 9.99999974E-6 : f32
    %181 = vector.broadcast %cst_63 : f32 to vector<12x1xf32>
    %182 = arith.addf %180, %181 : vector<12x1xf32>
    %183 = math.rsqrt %182 : vector<12x1xf32>
    %184 = vector.broadcast %183 : vector<12x1xf32> to vector<12x64xf32>
    %185 = arith.mulf %175, %184 : vector<12x64xf32>
    %c0_64 = arith.constant 0 : index
    %c0_65 = arith.constant 0 : index
    %186 = vector.load %arg10[%c0_64, %c0_65] : memref<1x64xf32, #tpu.memory_space<vmem>>, vector<1x64xf32>
    %187 = vector.broadcast %186 : vector<1x64xf32> to vector<12x64xf32>
    %188 = arith.mulf %185, %187 : vector<12x64xf32>
    %c0_66 = arith.constant 0 : index
    %c0_67 = arith.constant 0 : index
    %189 = vector.load %arg11[%c0_66, %c0_67] : memref<1x64xf32, #tpu.memory_space<vmem>>, vector<1x64xf32>
    %190 = vector.broadcast %189 : vector<1x64xf32> to vector<12x64xf32>
    %191 = arith.addf %188, %190 : vector<12x64xf32>
    %192 = arith.truncf %191 : vector<12x64xf32> to vector<12x64xbf16>
    %c0_68 = arith.constant 0 : index
    %c0_69 = arith.constant 0 : index
    %193 = vector.load %arg12[%c0_68, %c0_69] : memref<64x192xbf16, #tpu.memory_space<vmem>>, vector<64x192xbf16>
    %cst_70 = arith.constant dense<0.000000e+00> : vector<12x192xf32>
    %194 = tpu.matmul %192, %193, %cst_70 {dimension_numbers = #tpu.dot_dimension_numbers<[1], [0], [0], [1], [0, 0, 1, 1], [], []>} : vector<12x64xbf16>, vector<64x192xbf16>, vector<12x192xf32> -> vector<12x192xf32>
    %c0_71 = arith.constant 0 : index
    %c0_72 = arith.constant 0 : index
    %195 = vector.load %arg13[%c0_71, %c0_72] : memref<1x192xf32, #tpu.memory_space<vmem>>, vector<1x192xf32>
    %196 = vector.broadcast %195 : vector<1x192xf32> to vector<12x192xf32>
    %197 = arith.addf %194, %196 : vector<12x192xf32>
    %cst_73 = arith.constant 0.000000e+00 : f32
    %198 = vector.broadcast %cst_73 : f32 to vector<12x192xf32>
    %199 = arith.maximumf %197, %198 : vector<12x192xf32>
    %200 = arith.truncf %199 : vector<12x192xf32> to vector<12x192xbf16>
    %c0_74 = arith.constant 0 : index
    %c0_75 = arith.constant 0 : index
    %201 = vector.load %arg14[%c0_74, %c0_75] : memref<192x64xbf16, #tpu.memory_space<vmem>>, vector<192x64xbf16>
    %cst_76 = arith.constant dense<0.000000e+00> : vector<12x64xf32>
    %202 = tpu.matmul %200, %201, %cst_76 {dimension_numbers = #tpu.dot_dimension_numbers<[1], [0], [0], [1], [0, 0, 1, 1], [], []>} : vector<12x192xbf16>, vector<192x64xbf16>, vector<12x64xf32> -> vector<12x64xf32>
    %c0_77 = arith.constant 0 : index
    %c0_78 = arith.constant 0 : index
    %203 = vector.load %arg15[%c0_77, %c0_78] : memref<1x64xf32, #tpu.memory_space<vmem>>, vector<1x64xf32>
    %204 = vector.broadcast %203 : vector<1x64xf32> to vector<12x64xf32>
    %205 = arith.addf %202, %204 : vector<12x64xf32>
    %206 = arith.addf %191, %205 : vector<12x64xf32>
    %cst_79 = arith.constant dense<0.000000e+00> : vector<12xf32>
    %207 = vector.multi_reduction <add>, %206, %cst_79 [1] : vector<12x64xf32> to vector<12xf32>
    %208 = vector.shape_cast %207 : vector<12xf32> to vector<12x1xf32>
    %cst_80 = arith.constant 6.400000e+01 : f32
    %209 = vector.broadcast %cst_80 : f32 to vector<12x1xf32>
    %210 = arith.divf %208, %209 : vector<12x1xf32>
    %211 = vector.broadcast %210 : vector<12x1xf32> to vector<12x64xf32>
    %212 = arith.subf %206, %211 : vector<12x64xf32>
    %213 = arith.mulf %212, %212 : vector<12x64xf32>
    %cst_81 = arith.constant dense<0.000000e+00> : vector<12xf32>
    %214 = vector.multi_reduction <add>, %213, %cst_81 [1] : vector<12x64xf32> to vector<12xf32>
    %215 = vector.shape_cast %214 : vector<12xf32> to vector<12x1xf32>
    %cst_82 = arith.constant 6.400000e+01 : f32
    %216 = vector.broadcast %cst_82 : f32 to vector<12x1xf32>
    %217 = arith.divf %215, %216 : vector<12x1xf32>
    %cst_83 = arith.constant 9.99999974E-6 : f32
    %218 = vector.broadcast %cst_83 : f32 to vector<12x1xf32>
    %219 = arith.addf %217, %218 : vector<12x1xf32>
    %220 = math.rsqrt %219 : vector<12x1xf32>
    %221 = vector.broadcast %220 : vector<12x1xf32> to vector<12x64xf32>
    %222 = arith.mulf %212, %221 : vector<12x64xf32>
    %c0_84 = arith.constant 0 : index
    %c0_85 = arith.constant 0 : index
    %223 = vector.load %arg16[%c0_84, %c0_85] : memref<1x64xf32, #tpu.memory_space<vmem>>, vector<1x64xf32>
    %224 = vector.broadcast %223 : vector<1x64xf32> to vector<12x64xf32>
    %225 = arith.mulf %222, %224 : vector<12x64xf32>
    %c0_86 = arith.constant 0 : index
    %c0_87 = arith.constant 0 : index
    %226 = vector.load %arg17[%c0_86, %c0_87] : memref<1x64xf32, #tpu.memory_space<vmem>>, vector<1x64xf32>
    %227 = vector.broadcast %226 : vector<1x64xf32> to vector<12x64xf32>
    %228 = arith.addf %225, %227 : vector<12x64xf32>
    %229 = arith.addf %228, %1 : vector<12x64xf32>
    %c0_88 = arith.constant 0 : index
    %c0_89 = arith.constant 0 : index
    %c0_90 = arith.constant 0 : index
    %230 = vector.load %arg18[%c0_88, %c0_89, %c0_90] : memref<1x12x64xf32, #tpu.memory_space<vmem>>, vector<1x12x64xf32>
    %231 = vector.shape_cast %230 : vector<1x12x64xf32> to vector<12x64xf32>
    %232 = vector.shape_cast %229 : vector<12x64xf32> to vector<1x12x64xf32>
    tpu.vector_store %arg18[%c0_88, %c0_89, %c0_90], %232 {strides = array<i32>} : memref<1x12x64xf32, #tpu.memory_space<vmem>>, vector<1x12x64xf32>,
    return
  }
  func.func @transform_0(%arg0: i32) -> (i32, i32, i32) {
    %c0_i32 = arith.constant 0 : i32
    %c0_i32_0 = arith.constant 0 : i32
    %c0_i32_1 = arith.constant 0 : i32
    return %arg0, %c0_i32, %c0_i32_0 : i32, i32, i32
  }
  func.func @transform_1(%arg0: i32) -> (i32, i32, i32) {
    %c0_i32 = arith.constant 0 : i32
    %c0_i32_0 = arith.constant 0 : i32
    %c0_i32_1 = arith.constant 0 : i32
    return %arg0, %c0_i32, %c0_i32_0 : i32, i32, i32
  }
  func.func @transform_2(%arg0: i32) -> (i32, i32, i32) {
    %c0_i32 = arith.constant 0 : i32
    %c0_i32_0 = arith.constant 0 : i32
    %c0_i32_1 = arith.constant 0 : i32
    return %arg0, %c0_i32, %c0_i32_0 : i32, i32, i32
  }
  func.func @transform_3(%arg0: i32) -> (i32, i32) {
    %c0_i32 = arith.constant 0 : i32
    %c0_i32_0 = arith.constant 0 : i32
    %c0_i32_1 = arith.constant 0 : i32
    return %c0_i32, %c0_i32_0 : i32, i32
  }
  func.func @transform_4(%arg0: i32) -> (i32, i32) {
    %c0_i32 = arith.constant 0 : i32
    %c0_i32_0 = arith.constant 0 : i32
    %c0_i32_1 = arith.constant 0 : i32
    return %c0_i32, %c0_i32_0 : i32, i32
  }
  func.func @transform_5(%arg0: i32) -> (i32, i32) {
    %c0_i32 = arith.constant 0 : i32
    %c0_i32_0 = arith.constant 0 : i32
    %c0_i32_1 = arith.constant 0 : i32
    return %c0_i32, %c0_i32_0 : i32, i32
  }
  func.func @transform_6(%arg0: i32) -> (i32, i32) {
    %c0_i32 = arith.constant 0 : i32
    %c0_i32_0 = arith.constant 0 : i32
    %c0_i32_1 = arith.constant 0 : i32
    return %c0_i32, %c0_i32_0 : i32, i32
  }
  func.func @transform_7(%arg0: i32) -> (i32, i32) {
    %c0_i32 = arith.constant 0 : i32
    %c0_i32_0 = arith.constant 0 : i32
    %c0_i32_1 = arith.constant 0 : i32
    return %c0_i32, %c0_i32_0 : i32, i32
  }
  func.func @transform_8(%arg0: i32) -> (i32, i32) {
    %c0_i32 = arith.constant 0 : i32
    %c0_i32_0 = arith.constant 0 : i32
    %c0_i32_1 = arith.constant 0 : i32
    return %c0_i32, %c0_i32_0 : i32, i32
  }
  func.func @transform_9(%arg0: i32) -> (i32, i32) {
    %c0_i32 = arith.constant 0 : i32
    %c0_i32_0 = arith.constant 0 : i32
    %c0_i32_1 = arith.constant 0 : i32
    return %c0_i32, %c0_i32_0 : i32, i32
  }
  func.func @transform_10(%arg0: i32) -> (i32, i32) {
    %c0_i32 = arith.constant 0 : i32
    %c0_i32_0 = arith.constant 0 : i32
    %c0_i32_1 = arith.constant 0 : i32
    return %c0_i32, %c0_i32_0 : i32, i32
  }
  func.func @transform_11(%arg0: i32) -> (i32, i32) {
    %c0_i32 = arith.constant 0 : i32
    %c0_i32_0 = arith.constant 0 : i32
    %c0_i32_1 = arith.constant 0 : i32
    return %c0_i32, %c0_i32_0 : i32, i32
  }
  func.func @transform_12(%arg0: i32) -> (i32, i32) {
    %c0_i32 = arith.constant 0 : i32
    %c0_i32_0 = arith.constant 0 : i32
    %c0_i32_1 = arith.constant 0 : i32
    return %c0_i32, %c0_i32_0 : i32, i32
  }
  func.func @transform_13(%arg0: i32) -> (i32, i32) {
    %c0_i32 = arith.constant 0 : i32
    %c0_i32_0 = arith.constant 0 : i32
    %c0_i32_1 = arith.constant 0 : i32
    return %c0_i32, %c0_i32_0 : i32, i32
  }
  func.func @transform_14(%arg0: i32) -> (i32, i32) {
    %c0_i32 = arith.constant 0 : i32
    %c0_i32_0 = arith.constant 0 : i32
    %c0_i32_1 = arith.constant 0 : i32
    return %c0_i32, %c0_i32_0 : i32, i32
  }
  func.func @transform_15(%arg0: i32) -> (i32, i32) {
    %c0_i32 = arith.constant 0 : i32
    %c0_i32_0 = arith.constant 0 : i32
    %c0_i32_1 = arith.constant 0 : i32
    return %c0_i32, %c0_i32_0 : i32, i32
  }
  func.func @transform_16(%arg0: i32) -> (i32, i32) {
    %c0_i32 = arith.constant 0 : i32
    %c0_i32_0 = arith.constant 0 : i32
    %c0_i32_1 = arith.constant 0 : i32
    return %c0_i32, %c0_i32_0 : i32, i32
  }
  func.func @transform_17(%arg0: i32) -> (i32, i32, i32) {
    %c0_i32 = arith.constant 0 : i32
    %c0_i32_0 = arith.constant 0 : i32
    %c0_i32_1 = arith.constant 0 : i32
    return %arg0, %c0_i32, %c0_i32_0 : i32, i32, i32
  }
}

</mosaic_0001>

<bundles_post_ra>
// kernel: bi_cross_attention_forward.6
= control target key start
LH: loop header
LB: loop body
LE: loop exit
PB: predicated region body
PF: predicated region fallthrough
CT: control target
= control target key end

     0   :  { %s385_s12 = smov 0   ;;  %s414_s0 = inlined_call_operand.vmem [shape: f32[2,12,48], index: 0, kind: input, shape index: {}]   ;;  %s415_s1 = inlined_call_operand.vmem [shape: bf16[48,64], index: 1, kind: input, shape index: {}]   ;;  %s416_s2 = inlined_call_operand.vmem [shape: f32[1,64], index: 2, kind: input, shape index: {}]   ;;  %s417_s3 = inlined_call_operand.vmem [shape: f32[2,12,64], index: 3, kind: output, shape index: {}]  }
   0x1 LB: > { %s310_s13 = sadd.s32 4294967295, %s361_s12   ;;  %p314_p0 = scmp.ge.s32.totalorder %s361_s12, 1  ;;  %s361_s12 = sphi %s385_s12, %s13_s12  }
   0x2   : > { %p137_p1 = scmp.lt.s32.totalorder %s361_s12, 3 }
   0x4   : > { %p138_p2 = pnand %p314_p0, %p137_p1 }
   0x5   : > { %v352_v0 = vld [vmem:[%s415_s1] sm:$0xff] (!%p138_p2)   ;;  %v363_v1 = vmov (!%p138_p2), 0.0   ;;  %v353_v2 = vld [vmem:[%s415_s1 + $0x8] sm:$0xff] (!%p138_p2)   ;;  %vm364_vm0 = vmmov (!%p138_p2), 0   ;;  %p161_p3 = scmp.lt.s32.totalorder (!%p138_p2), %s310_s13, 1  ;;  %v354_v3 = vld [vmem:[%s415_s1 + $0x10] sm:$0xff] (!%p138_p2)  }
   0x6   : > { %141 = sbr.rel (%p138_p2) target bundleno = 236 (0xec), region = 32  ;;  %332 = vmatprep.subr.bf16.mxu0 (!%p138_p2), %v363_v1  ;;  %338 = vmatprep.mubr.msk.bf16.mxu0 (!%p138_p2), %vm364_vm0, %v363_v1  ;;  %vm206_vm1 = vcmask (!%p138_p2), 392192   ;;  %v319_v7 = vld [vmem:[%s416_s2] ss:$0 sm:$0xff] (!%p138_p2)  ;;  %vm251_vm2 = vcmask (!%p138_p2), 523264   ;;  %vm253_vm3 = vcmask (!%p138_p2), 519168  }
   0x7   : > { %333 = vmatpush3.bf16.msra.mxu0 (!%p138_p2), %v352_v0 }
   0x8   : > { %334 = vmatprep.subr.bf16.mxu0 (!%p138_p2), %v363_v1 }
   0xb   : > { %335 = vmatpush3.bf16.msra.mxu0 (!%p138_p2), %v353_v2 }
   0xc   : > { %336 = vmatprep.subr.bf16.mxu0 (!%p138_p2), %v363_v1 }
   0xd   : > { %s419_s13 = smov (!%p161_p3, %s310_s13), 1 }
   0xe   : > { %s326_s20 = sshll.u32 %s419_s13, 4 }
   0xf   : > { %s165_s23 = scalar_lea.vmem %s414_s0, %s326_s20  ;;  %337 = vmatpush3.bf16.msra.mxu0 %v354_v3  ;;  %s170_s28 = scalar_lea.vmem %s417_s3, %s326_s20 }
  0x10   : > { %v172_v4 = vld [vmem:[%s165_s23] sm:$0xff]  ;;  %v173_v5 = vld [vmem:[%s165_s23 + $0x8] sm:$0xf] }
  0x11   : > { %v174_v6 = vpack.c.bf16 %v173_v5, %v172_v4 }
  0x13   : > { %339 = vmatmul.mubr.msk.bf16.vlgmr.msra.gmra.mrb[0].mxu0 %vm206_vm1, %v174_v6 }
  0xe6   : > { %v244_v8 = vpop.f32.mrb[0].mxu0 }
  0xe7   : > { %v245_v9 = vadd.f32 %v319_v7, %v244_v8  ;;  %v340_v10 = vpop.f32.mrb[1].mxu0 }
  0xe8   : > { %v247_v11 = vpop.f32.mrb[2].mxu0 }
  0xe9   : > { %252 = vst.msk [vmem:[%s170_s28] sm:$0xff] %vm251_vm2, %v245_v9  ;;  %v248_v12 = vadd.f32 %v319_v7, %v247_v11  ;;  %v341_v13 = vpop.f32.mrb[3].mxu0 }
  0xeb   : > { %254 = vst.msk [vmem:[%s170_s28 + $0x8] sm:$0xf] %vm253_vm3, %v248_v12 }
  0xec PF: > { %s13_s12 = sadd.s32 1, %s361_s12  }
  0xed   : > { %p10_p4 = scmp.ge.s32.totalorder %s13_s12, 4  }
  0xef   :  { %12 = sbr.rel (!%p10_p4) target bundleno = 1 (0x1), region = 62 }

// kernel: bi_cross_attention_forward.11
= control target key start
LH: loop header
LB: loop body
LE: loop exit
PB: predicated region body
PF: predicated region fallthrough
CT: control target
= control target key end

     0   :  { %s953_s11 = smov 0   ;;  %s1041_s0 = inlined_call_operand.vmem [shape: f32[2,8,64], index: 0, kind: input, shape index: {}]   ;;  %s1042_s1 = inlined_call_operand.vmem [shape: f32[2,12,64], index: 1, kind: input, shape index: {}]   ;;  %s1043_s2 = inlined_call_operand.vmem [shape: f32[2,1,8], index: 2, kind: input, shape index: {}]   ;;  %s1044_s3 = inlined_call_operand.vmem [shape: f32[2,1,12], index: 3, kind: input, shape index: {}]   ;;  %s1045_s4 = inlined_call_operand.vmem [shape: bf16[64,32], index: 4, kind: input, shape index: {}]   ;;  %s1046_s5 = inlined_call_operand.vmem [shape: bf16[64,32], index: 5, kind: input, shape index: {}]   ;;  %s1047_s6 = inlined_call_operand.vmem [shape: f32[1,32], index: 6, kind: input, shape index: {}]   ;;  %s1048_s7 = inlined_call_operand.vmem [shape: bf16[32,1], index: 7, kind: input, shape index: {}]   ;;  %s1049_s8 = inlined_call_operand.<no memory space> [shape: f32[1,1], index: 8, kind: input, shape index: {}]   ;;  %s1050_s9 = inlined_call_operand.vmem [shape: f32[2,1,1], index: 9, kind: output, shape index: {}]  }
   0x1   :  { %v14_v0 = vstv %s1049_s8 }
   0x2   :  { %15 = vst [vmem:[#allocation2] sm:$0x1] %v14_v0 }
   0x3 LB: > { %s783_s12 = sadd.s32 4294967295, %s896_s11   ;;  %p787_p0 = scmp.ge.s32.totalorder %s896_s11, 1  ;;  %s896_s11 = sphi %s953_s11, %s21_s11  }
   0x4   : > { %p314_p1 = scmp.lt.s32.totalorder %s896_s11, 3 }
   0x6   : > { %p315_p2 = pnand %p787_p0, %p314_p1 }
   0x7   : > { %p358_p3 = scmp.lt.s32.totalorder (!%p315_p2), %s783_s12, 1  ;;  %v898_v1 = vmov (!%p315_p2), 0.0   ;;  %vm899_vm0 = vmmov (!%p315_p2), 0   ;;  %vm389_vm1 = vcmask (!%p315_p2), 1043456   ;;  %vm441_vm2 = vcmask (!%p315_p2), 1045504   ;;  %v880_v11 = vld [vmem:[%s1046_s5] sm:$0xff] (!%p315_p2)  }
   0x8   : > { %318 = sbr.rel (%p315_p2) target bundleno = 677 (0x2a5), region = 56  ;;  %826 = vmatprep.subr.bf16.mxu0 (!%p315_p2), %v898_v1  ;;  %832 = vmatprep.subr.bf16.mxu1 (!%p315_p2), %v898_v1  ;;  %vm385_vm3 = vcmask (!%p315_p2), 64512   ;;  %vm437_vm4 = vcmask (!%p315_p2), 97280   ;;  %v881_v14 = vld [vmem:[%s1045_s4] sm:$0xff] (!%p315_p2)   ;;  %v882_v17 = vld [vmem:[%s1046_s5 + $0x8] sm:$0xff] (!%p315_p2)   ;;  %v884_v19 = vld [vmem:[%s1046_s5 + $0x10] sm:$0xff] (!%p315_p2)  }
   0x9   : > { %828 = vmatprep.mubr.msk.bf16.mxu0 (!%p315_p2), %vm899_vm0, %v898_v1  ;;  %834 = vmatprep.mubr.msk.bf16.mxu1 (!%p315_p2), %vm899_vm0, %v898_v1  ;;  %v883_v18 = vld [vmem:[%s1045_s4 + $0x8] sm:$0xff] (!%p315_p2)   ;;  %v885_v20 = vld [vmem:[%s1045_s4 + $0x10] sm:$0xff] (!%p315_p2)   ;;  %v886_v21 = vld [vmem:[%s1046_s5 + $0x18] sm:$0xff] (!%p315_p2)   ;;  %vm528_vm5 = vcmask (!%p315_p2), 523264   ;;  %vm660_vm6 = vcmask (!%p315_p2), 261120   ;;  %vm704_vm7 = vcmask (!%p315_p2), 0  }
   0xa   : > { %v887_v22 = vld [vmem:[%s1045_s4 + $0x18] sm:$0xff] (!%p315_p2)   ;;  %v888_v35 = vld [vmem:[%s1048_s7] sm:$0xff] (!%p315_p2)   ;;  %v889_v36 = vld [vmem:[%s1048_s7 + $0x8] sm:$0xff] (!%p315_p2)  }
   0xb   : > { %v639_v39 = vld [vmem:[%s1047_s6] sm:$0x1] (!%p315_p2) }
   0xc   : > { %v647_v50 = vld [vmem:[#allocation2] sm:$0x1] (!%p315_p2) }
   0xf   : > { %s1052_s12 = smov (!%p358_p3, %s783_s12), 1 }
  0x10   : > { %s788_s8 = sshll.u32 %s1052_s12, 3  ;;  %s808_s13 = sshll.u32 %s1052_s12, 4 }
  0x11   : > { %s361_s16 = scalar_lea.vmem %s1041_s0, %s788_s8  ;;  %s366_s19 = scalar_lea.vmem %s1042_s1, %s808_s13 }
  0x12   : > { %v383_v2 = vld [vmem:[%s361_s16] sm:$0xff]  ;;  %v435_v4 = vld [vmem:[%s366_s19 + $0x8] sm:$0xf]  ;;  %s369_s22 = scalar_lea.vmem %s1043_s2, %s1052_s12  ;;  %s372_s25 = scalar_lea.vmem %s1044_s3, %s1052_s12 }
  0x13   : > { %v434_v3 = vld [vmem:[%s366_s19] sm:$0xff]  ;;  %v384_v5 = vpack.c.bf16 %v383_v2, %v383_v2  ;;  %s375_s30 = scalar_lea.vmem %s1050_s9, %s1052_s12 }
  0x14   : > { %v436_v6 = vpack.c.bf16 %v435_v4, %v434_v3  ;;  %v377_v7 = vld [vmem:[%s369_s22] sm:$0x1] }
  0x15   : > { %v380_v8 = vld [vmem:[%s372_s25] sm:$0x1]  ;;  %v378_v9 = vsub.f32 1.0, %v377_v7  ;;  %v391_v12 = vsel %vm389_vm1, %v384_v5, 0 }
  0x16   : > { %v381_v10 = vsub.f32 1.0, %v380_v8  ;;  %v443_v13 = vsel %vm441_vm2, %v436_v6, 0  ;;  %827 = vmatpush3.bf16.msra.mxu0 %v391_v12 }
  0x17   : > { %833 = vmatpush3.bf16.msra.mxu1 %v443_v13  ;;  %v379_v15 = vpack.c.bf16 %v378_v9, %v378_v9  ;;  %838 = vmatprep.subr.bf16.mxu0 %v898_v1 }
  0x18   : > { %v382_v16 = vpack.c.bf16 %v381_v10, %v381_v10  ;;  %850 = vmatprep.subr.bf16.mxu1 %v898_v1 }
  0x19   : > { %829 = vmatmul.mubr.msk.bf16.vlgmr.msra.gmra.mrb[0].mxu0 %vm385_vm3, %v379_v15 }
  0x1a   : > { %835 = vmatmul.mubr.msk.bf16.vlgmr.msra.gmra.mrb[0].mxu1 %vm437_vm4, %v382_v16  ;;  %839 = vmatpush3.bf16.msra.mxu0 %v880_v11 }
  0x1b   : > { %851 = vmatpush3.bf16.msra.mxu1 %v881_v14  ;;  %840 = vmatprep.subr.bf16.mxu0 %v898_v1 }
  0x1c   : > { %852 = vmatprep.subr.bf16.mxu1 %v898_v1  ;;  %846 = vmatprep.mubr.msk.bf16.mxu0 %vm899_vm0, %v898_v1 }
  0x1d   : > { %858 = vmatprep.mubr.msk.bf16.mxu1 %vm899_vm0, %v898_v1 }
  0x1e   : > { %841 = vmatpush3.bf16.msra.mxu0 %v882_v17 }
  0x1f   : > { %853 = vmatpush3.bf16.msra.mxu1 %v883_v18  ;;  %842 = vmatprep.subr.bf16.mxu0 %v898_v1 }
  0x20   : > { %854 = vmatprep.subr.bf16.mxu1 %v898_v1 }
  0x22   : > { %843 = vmatpush3.bf16.msra.mxu0 %v884_v19 }
  0x23   : > { %855 = vmatpush3.bf16.msra.mxu1 %v885_v20  ;;  %844 = vmatprep.subr.bf16.mxu0 %v898_v1 }
  0x24   : > { %856 = vmatprep.subr.bf16.mxu1 %v898_v1 }
  0x26   : > { %845 = vmatpush3.bf16.msra.mxu0 %v886_v21 }
  0x27   : > { %857 = vmatpush3.bf16.msra.mxu1 %v887_v22  ;;  %862 = vmatprep.subr.bf16.mxu0 %v898_v1 }
  0xec   : > { %v427_v23 = vpop.f32.mrb[0].mxu0 }
  0xed   : > { %v479_v24 = vpop.f32.mrb[0].mxu1  ;;  %v433_v25 = vmul.f32 0.125, %v427_v23  ;;  %v830_v27 = vpop.f32.mrb[1].mxu0 }
  0xee   : > { %v485_v26 = vmul.f32 0.083333336, %v479_v24  ;;  %v836_v28 = vpop.f32.mrb[1].mxu1  ;;  %v430_v29 = vpop.f32.mrb[2].mxu0 }
  0xef   : > { %v482_v30 = vpop.f32.mrb[2].mxu1  ;;  %v486_v31 = vpack.c.bf16 %v433_v25, %v433_v25  ;;  %v831_v33 = vpop.f32.mrb[3].mxu0 }
  0xf0   : > { %v495_v32 = vpack.c.bf16 %v485_v26, %v485_v26  ;;  %v837_v34 = vpop.f32.mrb[3].mxu1 }
  0xf1   : > { %859 = vmatmul.mubr.msk.bf16.vlgmr.msra.gmra.mrb[4].mxu1 %vm528_vm5, %v486_v31 }
  0xf2   : > { %847 = vmatmul.mubr.msk.bf16.vlgmr.msra.gmra.mrb[4].mxu0 %vm528_vm5, %v495_v32 }
  0xf3   : > { %866 = vmatprep.mubr.msk.bf16.mxu0 %vm899_vm0, %v898_v1  ;;  %863 = vmatpush3.bf16.msra.mxu0 %v888_v35 }
  0xf4   : > { %864 = vmatprep.subr.bf16.mxu0 %v898_v1 }
  0xf7   : > { %865 = vmatpush3.bf16.msra.mxu0 %v889_v36 }
 0x1c4   : > { %v633_v38 = vpop.f32.mrb[4].mxu1 }
 0x1c5   : > { %v566_v37 = vpop.f32.mrb[4].mxu0  ;;  %v860_v42 = vpop.f32.mrb[5].mxu1 }
 0x1c6   : > { %v634_v40 = vadd.f32 %v633_v38, %v566_v37  ;;  %v848_v41 = vpop.f32.mrb[5].mxu0  ;;  %v636_v44 = vpop.f32.mrb[6].mxu1 }
 0x1c7   : > { %v569_v43 = vpop.f32.mrb[6].mxu0  ;;  %v861_v47 = vpop.f32.mrb[7].mxu1 }
 0x1c8   : > { %v640_v45 = vadd.f32 %v639_v39, %v634_v40  ;;  %v849_v46 = vpop.f32.mrb[7].mxu0 }
 0x1ca   : > { %v641_v48 = vmax.f32 %v640_v45, 0.0 }
 0x1cc   : > { %v642_v49 = vpack.c.bf16 %v641_v48, %v641_v48 }
 0x1ce   : > { %867 = vmatmul.mubr.msk.bf16.vlgmr.msra.gmra.mrb[8].mxu0 %vm660_vm6, %v642_v49 }
 0x2a1   : > { %v698_v51 = vpop.f32.mrb[8].mxu0 }
 0x2a2   : > { %v699_v52 = vadd.f32 %v698_v51, %v647_v50  ;;  %v868_v53 = vpop.f32.mrb[9].mxu0 }
 0x2a3   : > { %v701_v54 = vpop.f32.mrb[10].mxu0 }
 0x2a4   : > { %705 = vst.msk [vmem:[%s375_s30] sm:$0x1] %vm704_vm7, %v699_v52  ;;  %v869_v55 = vpop.f32.mrb[11].mxu0 }
 0x2a5 PF: > { %s21_s11 = sadd.s32 1, %s896_s11  }
 0x2a6   : > { %p18_p4 = scmp.ge.s32.totalorder %s21_s11, 4  }
 0x2a8   :  { %20 = sbr.rel (!%p18_p4) target bundleno = 3 (0x3), region = 95 }

// kernel: bi_cross_attention_forward.7
= control target key start
LH: loop header
LB: loop body
LE: loop exit
PB: predicated region body
PF: predicated region fallthrough
CT: control target
= control target key end

     0   :  { %s2625_s24 = smov 0   ;;  %s3000_s0 = inlined_call_operand.vmem [shape: f32[2,8,64], index: 0, kind: input, shape index: {}]   ;;  %s3001_s1 = inlined_call_operand.vmem [shape: f32[2,12,64], index: 1, kind: input, shape index: {}]   ;;  %s3002_s2 = inlined_call_operand.vmem [shape: f32[2,1,12], index: 2, kind: input, shape index: {}]   ;;  %s3003_s3 = inlined_call_operand.vmem [shape: bf16[64,64], index: 3, kind: input, shape index: {}]   ;;  %s3004_s4 = inlined_call_operand.vmem [shape: f32[1,64], index: 4, kind: input, shape index: {}]   ;;  %s3005_s5 = inlined_call_operand.vmem [shape: bf16[64,128], index: 5, kind: input, shape index: {}]   ;;  %s3006_s6 = inlined_call_operand.vmem [shape: f32[1,128], index: 6, kind: input, shape index: {}]   ;;  %s3007_s7 = inlined_call_operand.vmem [shape: bf16[64,64], index: 7, kind: input, shape index: {}]   ;;  %s3008_s8 = inlined_call_operand.vmem [shape: f32[1,64], index: 8, kind: input, shape index: {}]   ;;  %s3009_s9 = inlined_call_operand.vmem [shape: f32[1,64], index: 9, kind: input, shape index: {}]   ;;  %s3010_s10 = inlined_call_operand.vmem [shape: f32[1,64], index: 10, kind: input, shape index: {}]   ;;  %s3011_s11 = inlined_call_operand.vmem [shape: bf16[64,192], index: 11, kind: input, shape index: {}]   ;;  %s3012_s12 = inlined_call_operand.vmem [shape: f32[1,192], index: 12, kind: input, shape index: {}]   ;;  %s3013_s13 = inlined_call_operand.vmem [shape: bf16[192,64], index: 13, kind: input, shape index: {}]   ;;  %s3014_s14 = inlined_call_operand.vmem [shape: f32[1,64], index: 14, kind: input, shape index: {}]   ;;  %s3015_s15 = inlined_call_operand.vmem [shape: f32[1,64], index: 15, kind: input, shape index: {}]   ;;  %s3016_s16 = inlined_call_operand.vmem [shape: f32[1,64], index: 16, kind: input, shape index: {}]   ;;  %s3017_s17 = inlined_call_operand.vmem [shape: f32[2,8,64], index: 17, kind: output, shape index: {}]  }
   0x1   :  { %3018 = sst [smem:[#allocation2_spill]] %s3000_s0 }
   0x2   :  { %3019 = sst [smem:[#allocation3_spill]] %s3001_s1 }
   0x3 LB: > { %s2158_s25 = sadd.s32 4294967295, %s2515_s24   ;;  %p2162_p0 = scmp.ge.s32.totalorder %s2515_s24, 1  ;;  %s2515_s24 = sphi %s2625_s24, %s27_s24  }
   0x4   : > { %p504_p1 = scmp.lt.s32.totalorder %s2515_s24, 3 }
   0x6   : > { %p505_p2 = pnand %p2162_p0, %p504_p1 }
   0x7   : > { %v2436_v0 = vld [vmem:[%s3003_s3] sm:$0xff] (!%p505_p2)   ;;  %v2517_v1 = vmov (!%p505_p2), 0.0   ;;  %v2437_v2 = vld [vmem:[%s3003_s3 + $0x8] sm:$0xff] (!%p505_p2)   ;;  %vm2518_vm0 = vmmov (!%p505_p2), 0   ;;  %p562_p3 = scmp.lt.s32.totalorder (!%p505_p2), %s2158_s25, 1  ;;  %v2438_v3 = vld [vmem:[%s3003_s3 + $0x10] sm:$0xff] (!%p505_p2)   ;;  %v756_v54 = vlaneseq (!%p505_p2) }
   0x8   : > { %508 = sbr.rel (%p505_p2) target bundleno = 2439 (0x987), region = 88  ;;  %2278 = vmatprep.subr.bf16.mxu1 (!%p505_p2), %v2517_v1  ;;  %2314 = vmatprep.subr.bf16.mxu0 (!%p505_p2), %v2517_v1  ;;  %s3020_s20 = sld [smem:[#allocation2_spill]] (!%p505_p2)  ;;  %v2439_v4 = vld [vmem:[%s3003_s3 + $0x18] sm:$0xff] (!%p505_p2)   ;;  %v2440_v6 = vld [vmem:[%s3005_s5] sm:$0xff] (!%p505_p2)   ;;  %vm625_vm1 = vcmask (!%p505_p2), 523264   ;;  %v2441_v8 = vld [vmem:[%s3005_s5 + $0x8] sm:$0xff] (!%p505_p2)  }
   0x9   : > { %2279 = vmatpush3.bf16.msra.mxu1 (!%p505_p2), %v2436_v0  ;;  %2286 = vmatprep.mubr.msk.bf16.mxu1 (!%p505_p2), %vm2518_vm0, %v2517_v1  ;;  %v2442_v9 = vld [vmem:[%s3005_s5 + $0x10] sm:$0xff] (!%p505_p2)   ;;  %s3021_s22 = sld [smem:[#allocation3_spill]] (!%p505_p2)  ;;  %v2443_v10 = vld [vmem:[%s3005_s5 + $0x18] sm:$0xff] (!%p505_p2)   ;;  %v2167_v18 = vld [vmem:[%s3004_s4] ss:$0 sm:$0xff] (!%p505_p2)  ;;  %vm761_vm2 = vcmask (!%p505_p2), 64512  }
   0xa   : > { %2280 = vmatprep.subr.bf16.mxu1 (!%p505_p2), %v2517_v1  ;;  %2316 = vmatprep.mubr.msk.bf16.mxu0 (!%p505_p2), %vm2518_vm0, %v2517_v1  ;;  %v2173_v19 = vld [vmem:[%s3006_s6] ss:$0 sm:$0xff] (!%p505_p2)  ;;  %s2519_s19 = smov (!%p505_p2), 112   ;;  %s2520_s1 = smov (!%p505_p2), 120   ;;  %vm825_vm3 = vcmask (!%p505_p2), 1045504   ;;  %v2761_v55 = vshrl.u32 (!%p505_p2), %v756_v54, 7 }
   0xb   : > { %s2524_s26 = smov (!%p505_p2), 80   ;;  %s2525_s27 = smov (!%p505_p2), 72   ;;  %vm808_vm4 = vcmask (!%p505_p2), 97280   ;;  %vm1671_vm5 = vcmask (!%p505_p2), 130048   ;;  %vm1673_vm6 = vcmask (!%p505_p2), 195584   ;;  %vm1675_vm7 = vcmask (!%p505_p2), 261120  }
   0xc   : > { %s2527_s29 = smov (!%p505_p2), 56   ;;  %v758_v58 = vsub.s32 (!%p505_p2), 0, %v2761_v55  ;;  %vm1677_vm8 = vcmask (!%p505_p2), 326656   ;;  %vm1679_vm9 = vcmask (!%p505_p2), 392192   ;;  %vm1681_vm10 = vcmask (!%p505_p2), 457728  }
   0xd   : > { %2281 = vmatpush3.bf16.msra.mxu1 (!%p505_p2), %v2437_v2 }
   0xe   : > { %2282 = vmatprep.subr.bf16.mxu1 (!%p505_p2), %v2517_v1 }
   0xf   : > { %s3023_s25 = smov (!%p562_p3, %s2158_s25), 1 }
  0x10   : > { %s2163_s18 = sshll.u32 %s3023_s25, 3  ;;  %s2230_s28 = sshll.u32 %s3023_s25, 4 }
  0x11   : > { %s2658_s21 = scalar_lea.vmem %s3020_s20, %s2163_s18  ;;  %2283 = vmatpush3.bf16.msra.mxu1 %v2438_v3  ;;  %s570_s23 = scalar_lea.vmem %s3021_s22, %s2230_s28 }
  0x12   : > { %v2664_v5 = vld [vmem:[%s2658_s21] sm:$0xff]  ;;  %2284 = vmatprep.subr.bf16.mxu1 %v2517_v1  ;;  %v582_v12 = vld [vmem:[%s570_s23 + $0x8] sm:$0xf]  ;;  %s2521_s20 = smov 104   ;;  %s2522_s22 = smov 96  }
  0x13   : > { %v580_v7 = vpack.c.bf16 %v2664_v5, %v2664_v5  ;;  %v581_v11 = vld [vmem:[%s570_s23] sm:$0xff]  ;;  %s2523_s23 = smov 88   ;;  %s2526_s28 = smov 64  }
  0x14   : > { %v583_v13 = vpack.c.bf16 %v582_v12, %v581_v11 }
  0x15   : > { %2285 = vmatpush3.bf16.msra.mxu1 %v2439_v4 }
  0x16   : > { %2290 = vmatprep.subr.bf16.mxu1 %v2517_v1 }
  0x18   : > { %2287 = vmatmul.mubr.msk.bf16.vlgmr.msra.gmra.mrb[0].mxu1 %vm625_vm1, %v580_v7 }
  0x19   : > { %2291 = vmatpush3.bf16.msra.mxu1 %v2440_v6  ;;  %2298 = vmatprep.mubr.msk.bf16.mxu1 %vm2518_vm0, %v2517_v1 }
  0x1a   : > { %2292 = vmatprep.subr.bf16.mxu1 %v2517_v1 }
  0x1d   : > { %2293 = vmatpush3.bf16.msra.mxu1 %v2441_v8 }
  0x1e   : > { %2294 = vmatprep.subr.bf16.mxu1 %v2517_v1 }
  0x21   : > { %2295 = vmatpush3.bf16.msra.mxu1 %v2442_v9 }
  0x22   : > { %2296 = vmatprep.subr.bf16.mxu1 %v2517_v1 }
  0x25   : > { %2297 = vmatpush3.bf16.msra.mxu1 %v2443_v10 }
  0x26   : > { %2302 = vmatprep.subr.bf16.mxu1 %v2517_v1 }
  0x28   : > { %2299 = vmatmul.mubr.msk.bf16.vlgmr.msra.gmra.mrb[4].mxu1 %vm625_vm1, %v583_v13 }
  0x29   : > { %2304 = vmatprep.mubr.msk.bf16.mxu1 %vm2518_vm0, %v2517_v1 }
  0xeb   : > { %v663_v14 = vpop.f32.mrb[0].mxu1 }
  0xec   : > { %v2288_v15 = vpop.f32.mrb[1].mxu1  ;;  %v664_v21 = vadd.f32 %v2167_v18, %v663_v14 }
  0xed   : > { %v666_v16 = vpop.f32.mrb[2].mxu1 }
  0xee   : > { %v2289_v17 = vpop.f32.mrb[3].mxu1  ;;  %v669_v27 = vmul.f32 0.35355338, %v664_v21 }
  0xf0   : > { %v670_v30 = vpack.c.bf16 %v669_v27, %v669_v27 }
  0xfb   : > { %v747_v20 = vpop.f32.mrb[4].mxu1 }
  0xfc   : > { %v2300_v22 = vpop.f32.mrb[5].mxu1  ;;  %v748_v24 = vadd.f32 %v2173_v19, %v747_v20 }
  0xfd   : > { %v750_v23 = vpop.f32.mrb[6].mxu1 }
  0xfe   : > { %v751_v25 = vadd.f32 %v2173_v19, %v750_v23  ;;  %v2301_v26 = vpop.f32.mrb[7].mxu1 }
 0x100   : > { %v2702_v28 = vpack.c.bf16 %v751_v25, %v748_v24 }
 0x102   : > { %984 = vrot.lane.b32.xlu1 %v2702_v28, %s2519_s19  ;;  %874 = vrot.lane.b32.xlu0 %v2702_v28, %s2520_s1  ;;  %v766_v29 = vsel %vm761_vm2, %v2702_v28, 0 }
 0x103   : > { %2303 = vmatpush3.bf16.xpose.msra.mxu1 %v766_v29 }
 0x104   : > { %2308 = vmatprep.subr.bf16.mxu1 %v2517_v1 }
 0x106   : > { %982 = vrot.lane.b32.xlu1 %v670_v30, %s2519_s19  ;;  %872 = vrot.lane.b32.xlu0 %v670_v30, %s2520_s1  ;;  %s573_s19 = scalar_lea.vmem %s3002_s2, %s3023_s25  ;;  %s2528_s1 = smov 48  }
 0x107   : > { %v584_v56 = vld [vmem:[%s573_s19] sm:$0x1] }
 0x108   : > { %v585_v57 = vmul.f32 -1e+09, %v584_v56 }
 0x10a   : > { %1092 = vrot.lane.b32.xlu1 %v670_v30, %s2521_s20  ;;  %1094 = vrot.lane.b32.xlu0 %v2702_v28, %s2521_s20  ;;  %v2766_v59 = vrot.slane %v585_v57, %v758_v58  ;;  %s2529_s20 = smov 40  }
 0x10b   : > { %2305 = vmatmul.mubr.msk.bf16.vlgmr.msra.gmra.mrb[8].mxu1 %vm761_vm2, %v670_v30 }
 0x10c   : > { %2310 = vmatprep.mubr.msk.bf16.mxu1 %vm2518_vm0, %v2517_v1 }
 0x10e   : > { %1202 = vrot.lane.b32.xlu1 %v670_v30, %s2522_s22  ;;  %1204 = vrot.lane.b32.xlu0 %v2702_v28, %s2522_s22  ;;  %s2530_s22 = smov 24  }
 0x112   : > { %1312 = vrot.lane.b32.xlu1 %v670_v30, %s2523_s23  ;;  %1314 = vrot.lane.b32.xlu0 %v2702_v28, %s2523_s23  ;;  %s2531_s23 = smov 32  }
 0x116   : > { %1422 = vrot.lane.b32.xlu1 %v670_v30, %s2524_s26  ;;  %1424 = vrot.lane.b32.xlu0 %v2702_v28, %s2524_s26  ;;  %s2532_s26 = smov 16  }
 0x11a   : > { %1532 = vrot.lane.b32.xlu1 %v670_v30, %s2525_s27  ;;  %1534 = vrot.lane.b32.xlu0 %v2702_v28, %s2525_s27  ;;  %s2533_s27 = smov 8  }
 0x11e   : > { %820 = vrot.lane.b32.xlu1 %v2702_v28, %s2526_s28  ;;  %932 = vrot.lane.b32.xlu0 %v2702_v28, %s2527_s29 }
 0x174   : > { %v985_v31 = vpop.permute.xlu1 %984  ;;  %v875_v32 = vpop.permute.xlu0 %874 }
 0x175   : > { %v880_v33 = vsel %vm761_vm2, %v875_v32, 0  ;;  %v990_v37 = vsel %vm761_vm2, %v985_v31, 0 }
 0x176   : > { %2315 = vmatpush3.bf16.xpose.msra.mxu0 %v880_v33 }
 0x177   : > { %2326 = vmatprep.subr.bf16.mxu0 %v2517_v1 }
 0x178   : > { %v983_v34 = vpop.permute.xlu1 %982  ;;  %v873_v35 = vpop.permute.xlu0 %872 }
 0x17c   : > { %v1093_v36 = vpop.permute.xlu1 %1092  ;;  %v1095_v39 = vpop.permute.xlu0 %1094 }
 0x17d   : > { %2317 = vmatmul.mubr.msk.bf16.vlgmr.msra.gmra.mrb[0].mxu0 %vm761_vm2, %v873_v35  ;;  %v1100_v41 = vsel %vm761_vm2, %v1095_v39, 0 }
 0x17e   : > { %2327 = vmatpush3.bf16.xpose.msra.mxu0 %v990_v37  ;;  %2328 = vmatprep.mubr.msk.bf16.mxu0 %vm2518_vm0, %v2517_v1 }
 0x17f   : > { %2338 = vmatprep.subr.bf16.mxu0 %v2517_v1 }
 0x180   : > { %v1203_v38 = vpop.permute.xlu1 %1202  ;;  %v1205_v43 = vpop.permute.xlu0 %1204 }
 0x181   : > { %v1210_v45 = vsel %vm761_vm2, %v1205_v43, 0 }
 0x184   : > { %v1313_v40 = vpop.permute.xlu1 %1312  ;;  %v1315_v48 = vpop.permute.xlu0 %1314 }
 0x185   : > { %2329 = vmatmul.mubr.msk.bf16.vlgmr.msra.gmra.mrb[4].mxu0 %vm761_vm2, %v983_v34  ;;  %v1320_v49 = vsel %vm761_vm2, %v1315_v48, 0 }
 0x186   : > { %2339 = vmatpush3.bf16.xpose.msra.mxu0 %v1100_v41  ;;  %2340 = vmatprep.mubr.msk.bf16.mxu0 %vm2518_vm0, %v2517_v1 }
 0x187   : > { %2350 = vmatprep.subr.bf16.mxu0 %v2517_v1 }
 0x188   : > { %v1423_v42 = vpop.permute.xlu1 %1422  ;;  %v1425_v50 = vpop.permute.xlu0 %1424 }
 0x189   : > { %v1430_v51 = vsel %vm761_vm2, %v1425_v50, 0 }
 0x18c   : > { %v1533_v44 = vpop.permute.xlu1 %1532  ;;  %v1535_v52 = vpop.permute.xlu0 %1534 }
 0x18d   : > { %2341 = vmatmul.mubr.msk.bf16.vlgmr.msra.gmra.mrb[8].mxu0 %vm761_vm2, %v1093_v36  ;;  %v1540_v53 = vsel %vm761_vm2, %v1535_v52, 0 }
 0x18e   : > { %2351 = vmatpush3.bf16.xpose.msra.mxu0 %v1210_v45  ;;  %2352 = vmatprep.mubr.msk.bf16.mxu0 %vm2518_vm0, %v2517_v1 }
 0x18f   : > { %2362 = vmatprep.subr.bf16.mxu0 %v2517_v1 }
 0x190   : > { %v821_v46 = vpop.permute.xlu1 %820  ;;  %v933_v26 = vpop.permute.xlu0 %932 }
 0x191   : > { %v827_v47 = vsel %vm825_vm3, %v821_v46, 0  ;;  %v938_v46 = vsel %vm825_vm3, %v933_v26, 0 }
 0x192   : > { %2309 = vmatpush3.bf16.msra.mxu1 %v827_v47 }
 0x193   : > { %2320 = vmatprep.subr.bf16.mxu1 %v2517_v1 }
 0x195   : > { %2353 = vmatmul.mubr.msk.bf16.vlgmr.msra.gmra.mrb[12].mxu0 %vm761_vm2, %v1203_v38 }
 0x196   : > { %2363 = vmatpush3.bf16.xpose.msra.mxu0 %v1320_v49  ;;  %2364 = vmatprep.mubr.msk.bf16.mxu0 %vm2518_vm0, %v2517_v1 }
 0x197   : > { %2374 = vmatprep.subr.bf16.mxu0 %v2517_v1 }
 0x19d   : > { %2365 = vmatmul.mubr.msk.bf16.vlgmr.msra.gmra.mrb[16].mxu0 %vm761_vm2, %v1313_v40 }
 0x19e   : > { %2375 = vmatpush3.bf16.xpose.msra.mxu0 %v1430_v51  ;;  %2376 = vmatprep.mubr.msk.bf16.mxu0 %vm2518_vm0, %v2517_v1 }
 0x19f   : > { %2386 = vmatprep.subr.bf16.mxu0 %v2517_v1 }
 0x1a5   : > { %2377 = vmatmul.mubr.msk.bf16.vlgmr.msra.gmra.mrb[20].mxu0 %vm761_vm2, %v1423_v42 }
 0x1a6   : > { %2387 = vmatpush3.bf16.xpose.msra.mxu0 %v1540_v53  ;;  %2388 = vmatprep.mubr.msk.bf16.mxu0 %vm2518_vm0, %v2517_v1 }
 0x1a7   : > { %2398 = vmatprep.subr.bf16.mxu0 %v2517_v1 }
 0x1ad   : > { %2389 = vmatmul.mubr.msk.bf16.vlgmr.msra.gmra.mrb[24].mxu0 %vm761_vm2, %v1533_v44 }
 0x1ae   : > { %2406 = vmatprep.mubr.msk.bf16.mxu0 %vm2518_vm0, %v2517_v1 }
 0x1de   : > { %v802_v60 = vpop.f32.mrb[8].mxu1 }
 0x1df   : > { %v803_v61 = vadd.f32 %v802_v60, %v2766_v59  ;;  %v2306_v62 = vpop.f32.mrb[9].mxu1 }
 0x1e0   : > { %v805_v63 = vpop.f32.mrb[10].mxu1 }
 0x1e1   : > { %v2307_v0 = vpop.f32.mrb[11].mxu1  ;;  %v809_v2 = vsel %vm808_vm4, %v803_v61, -inf }
 0x1e2   : > { %810 = vmax.xlane.f32.xlu0 %v809_v2 }
 0x1f8   : > { %1042 = vrot.lane.b32.xlu0 %v2702_v28, %s2528_s1 }
 0x250   : > { %v916_v3 = vpop.f32.mrb[0].mxu0 }
 0x251   : > { %v2773_v4 = vadd.f32 %v916_v3, %v2766_v59  ;;  %v2318_v6 = vpop.f32.mrb[1].mxu0 }
 0x252   : > { %v919_v7 = vpop.f32.mrb[2].mxu0 }
 0x253   : > { %v2319_v8 = vpop.f32.mrb[3].mxu0  ;;  %v922_v9 = vsel %vm808_vm4, %v2773_v4, -inf }
 0x254   : > { %923 = vmax.xlane.f32.xlu1 %v922_v9 }
 0x258   : > { %v1026_v10 = vpop.f32.mrb[4].mxu0 }
 0x259   : > { %v2778_v11 = vadd.f32 %v1026_v10, %v2766_v59  ;;  %v2330_v12 = vpop.f32.mrb[5].mxu0 }
 0x25a   : > { %v1029_v13 = vpop.f32.mrb[6].mxu0 }
 0x25b   : > { %v2331_v14 = vpop.f32.mrb[7].mxu0  ;;  %v1032_v15 = vsel %vm808_vm4, %v2778_v11, -inf }
 0x25c   : > { %1033 = vmax.xlane.f32.xlu0 %v1032_v15 }
 0x260   : > { %v1136_v16 = vpop.f32.mrb[8].mxu0 }
 0x261   : > { %v2783_v17 = vadd.f32 %v1136_v16, %v2766_v59  ;;  %v2342_v18 = vpop.f32.mrb[9].mxu0 }
 0x262   : > { %v1139_v19 = vpop.f32.mrb[10].mxu0 }
 0x263   : > { %v2343_v20 = vpop.f32.mrb[11].mxu0  ;;  %v1142_v21 = vsel %vm808_vm4, %v2783_v17, -inf }
 0x264   : > { %1143 = vmax.xlane.f32.xlu0 %v1142_v21 }
 0x265   : > { %1152 = vrot.lane.b32.xlu1 %v2702_v28, %s2529_s20 }
 0x268   : > { %v1246_v22 = vpop.f32.mrb[12].mxu0 }
 0x269   : > { %v2790_v23 = vadd.f32 %v1246_v22, %v2766_v59  ;;  %v2354_v24 = vpop.f32.mrb[13].mxu0 }
 0x26a   : > { %v1249_v25 = vpop.f32.mrb[14].mxu0 }
 0x26b   : > { %v2355_v27 = vpop.f32.mrb[15].mxu0  ;;  %v1252_v29 = vsel %vm808_vm4, %v2790_v23, -inf }
 0x26c   : > { %1253 = vmax.xlane.f32.xlu0 %v1252_v29 }
 0x26f   : > { %v811_v30 = vpop.xlane.xlu0 %810 }
 0x270   : > { %v812_v31 = vsub.f32 %v803_v61, %v811_v30  ;;  %v1356_v32 = vpop.f32.mrb[16].mxu0 }
 0x271   : > { %v2366_v33 = vpop.f32.mrb[17].mxu0  ;;  %v2814_v52 = vadd.f32 %v1356_v32, %v2766_v59 }
 0x272   : > { %v813_v34 = vmul.f32 1.442695, %v812_v31  ;;  %v1359_v35 = vpop.f32.mrb[18].mxu0 }
 0x273   : > { %v2367_v36 = vpop.f32.mrb[19].mxu0  ;;  %v1362_v53 = vsel %vm808_vm4, %v2814_v52, -inf }
 0x274   : > { %2472 = vpow2.f32 %v813_v34 }
 0x278   : > { %v1466_v37 = vpop.f32.mrb[20].mxu0 }
 0x279   : > { %v2795_v38 = vadd.f32 %v1466_v37, %v2766_v59  ;;  %v2378_v39 = vpop.f32.mrb[21].mxu0 }
 0x27a   : > { %v1469_v40 = vpop.f32.mrb[22].mxu0 }
 0x27b   : > { %v2379_v41 = vpop.f32.mrb[23].mxu0  ;;  %v1472_v42 = vsel %vm808_vm4, %v2795_v38, -inf }
 0x27c   : > { %1473 = vmax.xlane.f32.xlu0 %v1472_v42 }
 0x27e   : > { %v2799_v43 = vpop.eup %2472 }
 0x27f   : > { %v818_v44 = vpack.c.bf16 %v2799_v43, %v2799_v43  ;;  %v815_v37 = vsel %vm808_vm4, %v2799_v43, 0.0 }
 0x280   : > { %v1576_v45 = vpop.f32.mrb[24].mxu0 }
 0x281   : > { %2311 = vmatmul.mubr.msk.bf16.vlgmr.msra.gmra.mrb[12].mxu1 %vm808_vm4, %v818_v44  ;;  %v2806_v47 = vadd.f32 %v1576_v45, %v2766_v59  ;;  %v2390_v48 = vpop.f32.mrb[25].mxu0  ;;  %v1043_v59 = vpop.permute.xlu0 %1042 }
 0x282   : > { %2321 = vmatpush3.bf16.msra.mxu1 %v938_v46  ;;  %v1579_v49 = vpop.f32.mrb[26].mxu0  ;;  %2322 = vmatprep.mubr.msk.bf16.mxu1 %vm2518_vm0, %v2517_v1 }
 0x283   : > { %v2391_v50 = vpop.f32.mrb[27].mxu0  ;;  %v1582_v51 = vsel %vm808_vm4, %v2806_v47, -inf  ;;  %2332 = vmatprep.subr.bf16.mxu1 %v2517_v1 }
 0x284   : > { %1583 = vmax.xlane.f32.xlu0 %v1582_v51 }
 0x289   : > { %1363 = vmax.xlane.f32.xlu1 %v1362_v53 }
 0x29a   : > { %1372 = vrot.lane.b32.xlu1 %v2702_v28, %s2530_s22  ;;  %1262 = vrot.lane.b32.xlu0 %v2702_v28, %s2531_s23 }
 0x29e   : > { %1482 = vrot.lane.b32.xlu1 %v2702_v28, %s2532_s26 }
 0x2a2   : > { %1592 = vrot.lane.b32.xlu1 %v2702_v28, %s2533_s27  ;;  %v1048_v28 = vsel %vm825_vm3, %v1043_v59, 0 }
 0x2e1   : > { %v924_v54 = vpop.xlane.xlu1 %923 }
 0x2e2   : > { %v925_v56 = vsub.f32 %v2773_v4, %v924_v54 }
 0x2e4   : > { %v926_v57 = vmul.f32 1.442695, %v925_v56 }
 0x2e5   : > { %v1153_v8 = vpop.permute.xlu1 %1152 }
 0x2e6   : > { %2474 = vpow2.f32 %v926_v57  ;;  %v1158_v13 = vsel %vm825_vm3, %v1153_v8, 0 }
 0x2e9   : > { %v1034_v60 = vpop.xlane.xlu0 %1033 }
 0x2ea   : > { %v1035_v61 = vsub.f32 %v2778_v11, %v1034_v60 }
 0x2ec   : > { %v1036_v62 = vmul.f32 1.442695, %v1035_v61 }
 0x2ee   : > { %2476 = vpow2.f32 %v1036_v62 }
 0x2f0   : > { %v2475_v63 = vpop.eup %2474 }
 0x2f1   : > { %v1144_v0 = vpop.xlane.xlu0 %1143  ;;  %v928_v2 = vsel %vm808_vm4, %v2475_v63, 0.0  ;;  %v931_v3 = vpack.c.bf16 %v2475_v63, %v2475_v63 }
 0x2f2   : > { %v1145_v6 = vsub.f32 %v2783_v17, %v1144_v0  ;;  %929 = vadd.xlane.f32.xlu1 %v928_v2 }
 0x2f3   : > { %2323 = vmatmul.mubr.msk.bf16.vlgmr.msra.gmra.mrb[16].mxu1 %vm808_vm4, %v931_v3 }
 0x2f4   : > { %v1146_v4 = vmul.f32 1.442695, %v1145_v6  ;;  %2333 = vmatpush3.bf16.msra.mxu1 %v1048_v28  ;;  %2334 = vmatprep.mubr.msk.bf16.mxu1 %vm2518_vm0, %v2517_v1 }
 0x2f5   : > { %2344 = vmatprep.subr.bf16.mxu1 %v2517_v1 }
 0x2f6   : > { %2478 = vpow2.f32 %v1146_v4 }
 0x2f8   : > { %v2477_v7 = vpop.eup %2476 }
 0x2f9   : > { %v1254_v9 = vpop.xlane.xlu0 %1253  ;;  %v1038_v10 = vsel %vm808_vm4, %v2477_v7, 0.0  ;;  %v1041_v11 = vpack.c.bf16 %v2477_v7, %v2477_v7 }
 0x2fa   : > { %v1255_v12 = vsub.f32 %v2790_v23, %v1254_v9  ;;  %1039 = vadd.xlane.f32.xlu0 %v1038_v10 }
 0x2fb   : > { %2335 = vmatmul.mubr.msk.bf16.vlgmr.msra.gmra.mrb[20].mxu1 %vm808_vm4, %v1041_v11 }
 0x2fc   : > { %v1256_v14 = vmul.f32 1.442695, %v1255_v12  ;;  %2345 = vmatpush3.bf16.msra.mxu1 %v1158_v13  ;;  %2346 = vmatprep.mubr.msk.bf16.mxu1 %vm2518_vm0, %v2517_v1 }
 0x2fd   : > { %2356 = vmatprep.subr.bf16.mxu1 %v2517_v1 }
 0x2fe   : > { %2480 = vpow2.f32 %v1256_v14 }
 0x300   : > { %v2479_v15 = vpop.eup %2478 }
 0x301   : > { %v1148_v16 = vsel %vm808_vm4, %v2479_v15, 0.0  ;;  %v1151_v17 = vpack.c.bf16 %v2479_v15, %v2479_v15 }
 0x302   : > { %1149 = vadd.xlane.f32.xlu1 %v1148_v16 }
 0x303   : > { %2347 = vmatmul.mubr.msk.bf16.vlgmr.msra.gmra.mrb[24].mxu1 %vm808_vm4, %v1151_v17 }
 0x304   : > { %2358 = vmatprep.mubr.msk.bf16.mxu1 %vm2518_vm0, %v2517_v1 }
 0x308   : > { %v2481_v18 = vpop.eup %2480 }
 0x309   : > { %v1474_v19 = vpop.xlane.xlu0 %1473  ;;  %v1258_v20 = vsel %vm808_vm4, %v2481_v18, 0.0  ;;  %v1261_v31 = vpack.c.bf16 %v2481_v18, %v2481_v18 }
 0x30a   : > { %v1475_v21 = vsub.f32 %v2795_v38, %v1474_v19  ;;  %1259 = vadd.xlane.f32.xlu0 %v1258_v20 }
 0x30c   : > { %v1476_v22 = vmul.f32 1.442695, %v1475_v21  ;;  %v2444_v21 = vld [vmem:[%s3007_s7] sm:$0xff]  }
 0x30d   : > { %2399 = vmatpush3.bf16.msra.mxu0 %v2444_v21  ;;  %v2457_v21 = vld [vmem:[%s3011_s11 + $0x30] ss:$8 sps:$4 sm:$0xff]  }
 0x30e   : > { %2482 = vpow2.f32 %v1476_v22  ;;  %2400 = vmatprep.subr.bf16.mxu0 %v2517_v1 }
 0x311   : > { %v1584_v23 = vpop.xlane.xlu0 %1583 }
 0x312   : > { %v1585_v24 = vsub.f32 %v2806_v47, %v1584_v23  ;;  %v2445_v23 = vld [vmem:[%s3007_s7 + $0x8] sm:$0xff]  }
 0x313   : > { %2401 = vmatpush3.bf16.msra.mxu0 %v2445_v23  ;;  %v2460_v23 = vld [vmem:[%s3013_s13] sm:$0xff]  }
 0x314   : > { %v1586_v32 = vmul.f32 1.442695, %v1585_v24  ;;  %2402 = vmatprep.subr.bf16.mxu0 %v2517_v1 }
 0x315   : > { %v1263_v25 = vpop.permute.xlu0 %1262 }
 0x316   : > { %v1268_v26 = vsel %vm825_vm3, %v1263_v25, 0  ;;  %v1364_v27 = vpop.xlane.xlu1 %1363 }
 0x317   : > { %v1365_v29 = vsub.f32 %v2814_v52, %v1364_v27  ;;  %2357 = vmatpush3.bf16.msra.mxu1 %v1268_v26  ;;  %v2446_v26 = vld [vmem:[%s3007_s7 + $0x10] sm:$0xff]  }
 0x318   : > { %v2483_v30 = vpop.eup %2482  ;;  %2368 = vmatprep.subr.bf16.mxu1 %v2517_v1  ;;  %2403 = vmatpush3.bf16.msra.mxu0 %v2446_v26  ;;  %v2463_v26 = vld [vmem:[%s3013_s13 + $0x18] sm:$0xff]  }
 0x319   : > { %v1366_v33 = vmul.f32 1.442695, %v1365_v29  ;;  %v1478_v34 = vsel %vm808_vm4, %v2483_v30, 0.0  ;;  %v1481_v46 = vpack.c.bf16 %v2483_v30, %v2483_v30  ;;  %2404 = vmatprep.subr.bf16.mxu0 %v2517_v1 }
 0x31a   : > { %v1373_v35 = vpop.permute.xlu1 %1372  ;;  %1479 = vadd.xlane.f32.xlu0 %v1478_v34  ;;  %2359 = vmatmul.mubr.msk.bf16.vlgmr.msra.gmra.mrb[28].mxu1 %vm808_vm4, %v1261_v31 }
 0x31b   : > { %2484 = vpow2.f32 %v1366_v33  ;;  %v1378_v36 = vsel %vm825_vm3, %v1373_v35, 0  ;;  %2370 = vmatprep.mubr.msk.bf16.mxu1 %vm2518_vm0, %v2517_v1  ;;  %v2447_v33 = vld [vmem:[%s3007_s7 + $0x18] sm:$0xff]  }
 0x31c   : > { %2369 = vmatpush3.bf16.msra.mxu1 %v1378_v36  ;;  %2486 = vpow2.f32 %v1586_v32  ;;  %2405 = vmatpush3.bf16.msra.mxu0 %v2447_v33  ;;  %v2469_v33 = vld [vmem:[%s3013_s13 + $0x48] sm:$0xff]  }
 0x31d   : > { %2380 = vmatprep.subr.bf16.mxu1 %v2517_v1 }
 0x31e   : > { %816 = vadd.xlane.f32.xlu0 %v815_v37  ;;  %v1483_v39 = vpop.permute.xlu1 %1482 }
 0x31f   : > { %v1488_v44 = vsel %vm825_vm3, %v1483_v39, 0 }
 0x322   : > { %v1593_v45 = vpop.permute.xlu1 %1592 }
 0x323   : > { %v1598_v47 = vsel %vm825_vm3, %v1593_v45, 0 }
 0x325   : > { %v2485_v38 = vpop.eup %2484 }
 0x326   : > { %v1368_v40 = vsel %vm808_vm4, %v2485_v38, 0.0  ;;  %v1371_v41 = vpack.c.bf16 %v2485_v38, %v2485_v38  ;;  %v2487_v42 = vpop.eup %2486 }
 0x327   : > { %1369 = vadd.xlane.f32.xlu1 %v1368_v40  ;;  %v1588_v43 = vsel %vm808_vm4, %v2487_v42, 0.0  ;;  %v1591_v48 = vpack.c.bf16 %v2487_v42, %v2487_v42 }
 0x328   : > { %2371 = vmatmul.mubr.msk.bf16.vlgmr.msra.gmra.mrb[32].mxu1 %vm808_vm4, %v1371_v41 }
 0x329   : > { %2381 = vmatpush3.bf16.msra.mxu1 %v1488_v44  ;;  %2382 = vmatprep.mubr.msk.bf16.mxu1 %vm2518_vm0, %v2517_v1 }
 0x32a   : > { %2392 = vmatprep.subr.bf16.mxu1 %v2517_v1 }
 0x32b   : > { %1589 = vadd.xlane.f32.xlu1 %v1588_v43 }
 0x330   : > { %2383 = vmatmul.mubr.msk.bf16.vlgmr.msra.gmra.mrb[36].mxu1 %vm808_vm4, %v1481_v46 }
 0x331   : > { %2393 = vmatpush3.bf16.msra.mxu1 %v1598_v47  ;;  %2394 = vmatprep.mubr.msk.bf16.mxu1 %vm2518_vm0, %v2517_v1 }
 0x338   : > { %2395 = vmatmul.mubr.msk.bf16.vlgmr.msra.gmra.mrb[40].mxu1 %vm808_vm4, %v1591_v48 }
 0x354   : > { %v2872_v49 = vpop.f32.mrb[12].mxu1 }
 0x355   : > { %v2312_v50 = vpop.f32.mrb[13].mxu1 }
 0x356   : > { %v866_v51 = vpop.f32.mrb[14].mxu1 }
 0x357   : > { %v2313_v52 = vpop.f32.mrb[15].mxu1 }
 0x37f   : > { %v930_v53 = vpop.xlane.xlu1 %929 }
 0x380   : > { %2488 = vrcp.f32 %v930_v53 }
 0x387   : > { %v1040_v54 = vpop.xlane.xlu0 %1039 }
 0x388   : > { %2490 = vrcp.f32 %v1040_v54 }
 0x38a   : > { %v2489_v56 = vpop.eup %2488 }
 0x38f   : > { %v1150_v62 = vpop.xlane.xlu1 %1149 }
 0x390   : > { %2492 = vrcp.f32 %v1150_v62 }
 0x392   : > { %v2491_v0 = vpop.eup %2490 }
 0x397   : > { %v1260_v13 = vpop.xlane.xlu0 %1259 }
 0x398   : > { %2494 = vrcp.f32 %v1260_v13 }
 0x39a   : > { %v2493_v7 = vpop.eup %2492 }
 0x3a2   : > { %v2495_v14 = vpop.eup %2494 }
 0x3a7   : > { %v1480_v22 = vpop.xlane.xlu0 %1479 }
 0x3ab   : > { %v817_v45 = vpop.xlane.xlu0 %816 }
 0x3b4   : > { %v1370_v16 = vpop.xlane.xlu1 %1369 }
 0x3b5   : > { %2496 = vrcp.f32 %v1370_v16  ;;  %v2448_v16 = vld [vmem:[%s3011_s11] ss:$8 sps:$4 sm:$0xff]  }
 0x3b6   : > { %2498 = vrcp.f32 %v1480_v22  ;;  %v2534_v22 = vmov 0  }
 0x3b7   : > { %1893 = vmatprep.mubr.bf16.mxu1 %v2534_v22  ;;  %2012 = vmatprep.subr.bf16.mxu0 %v2534_v22 }
 0x3b8   : > { %v1590_v31 = vpop.xlane.xlu1 %1589 }
 0x3b9   : > { %2500 = vrcp.f32 %v1590_v31  ;;  %v2467_v31 = vld [vmem:[%s3013_s13 + $0x38] sm:$0xff]  }
 0x3ba   : > { %2502 = vrcp.f32 %v817_v45  ;;  %v1806_v45 = vld [vmem:[%s3012_s12] sm:$0x3] }
 0x3bf   : > { %v2497_v24 = vpop.eup %2496 }
 0x3c0   : > { %v2499_v34 = vpop.eup %2498 }
 0x3c3   : > { %v2501_v40 = vpop.eup %2500 }
 0x3c4   : > { %v2503_v48 = vpop.eup %2502 }
 0x3c5   : > { %v870_v51 = vmul.f32 %v2503_v48, %v2872_v49  ;;  %v2195_v49 = vld [vmem:[%s3008_s8] ss:$0 sm:$0xff] }
 0x3c6   : > { %v974_v57 = vpop.f32.mrb[16].mxu1 }
 0x3c7   : > { %v981_v59 = vmul.f32 %v2489_v56, %v974_v57  ;;  %v2324_v60 = vpop.f32.mrb[17].mxu1 }
 0x3c8   : > { %v977_v61 = vpop.f32.mrb[18].mxu1 }
 0x3c9   : > { %1643 = vrot.lane.b32.xlu1 %v981_v59, %s2533_s27  ;;  %v2325_v63 = vpop.f32.mrb[19].mxu1 }
 0x3ce   : > { %v1084_v2 = vpop.f32.mrb[20].mxu1 }
 0x3cf   : > { %v1091_v3 = vmul.f32 %v2491_v0, %v1084_v2  ;;  %v2336_v6 = vpop.f32.mrb[21].mxu1 }
 0x3d0   : > { %v1087_v28 = vpop.f32.mrb[22].mxu1 }
 0x3d1   : > { %1647 = vrot.lane.b32.xlu0 %v1091_v3, %s2532_s26  ;;  %v2337_v4 = vpop.f32.mrb[23].mxu1 }
 0x3d6   : > { %v1194_v8 = vpop.f32.mrb[24].mxu1 }
 0x3d7   : > { %v1201_v9 = vmul.f32 %v2493_v7, %v1194_v8  ;;  %v2348_v10 = vpop.f32.mrb[25].mxu1 }
 0x3d8   : > { %v1197_v11 = vpop.f32.mrb[26].mxu1 }
 0x3d9   : > { %1651 = vrot.lane.b32.xlu1 %v1201_v9, %s2530_s22  ;;  %v2349_v12 = vpop.f32.mrb[27].mxu1 }
 0x3ed   : > { %v1304_v15 = vpop.f32.mrb[28].mxu1 }
 0x3ee   : > { %v1311_v17 = vmul.f32 %v2495_v14, %v1304_v15  ;;  %v2360_v18 = vpop.f32.mrb[29].mxu1  ;;  %v2450_v15 = vld [vmem:[%s3011_s11 + $0x4] ss:$8 sps:$4 sm:$0xff]  }
 0x3ef   : > { %v1307_v19 = vpop.f32.mrb[30].mxu1  ;;  %1861 = vmatprep.subr.bf16.mxu1 %v2450_v15  ;;  %v2456_v18 = vld [vmem:[%s3011_s11 + $0x24] ss:$8 sps:$4 sm:$0xff]   ;;  %v2227_v15 = vld [vmem:[%s3016_s16] ss:$0 sm:$0xff] }
 0x3f0   : > { %1655 = vrot.lane.b32.xlu1 %v1311_v17, %s2531_s23  ;;  %v2361_v20 = vpop.f32.mrb[31].mxu1  ;;  %1862 = vmatpush1.bf16.msra.mxu1 %v2448_v16  ;;  %v2451_v17 = vld [vmem:[%s3011_s11 + $0x10] ss:$8 sps:$4 sm:$0xff]   ;;  %v2454_v19 = vld [vmem:[%s3011_s11 + $0x20] ss:$8 sps:$4 sm:$0xff]  }
 0x3f1   : > { %v2459_v20 = vld [vmem:[%s3011_s11 + $0x34] ss:$8 sps:$4 sm:$0xff]  }
 0x3fb   : > { %v1414_v25 = vpop.f32.mrb[32].mxu1 }
 0x3fc   : > { %v1421_v27 = vmul.f32 %v2497_v24, %v1414_v25  ;;  %v2372_v29 = vpop.f32.mrb[33].mxu1  ;;  %v2461_v24 = vld [vmem:[%s3013_s13 + $0x8] sm:$0xff]   ;;  %v2462_v25 = vld [vmem:[%s3013_s13 + $0x10] sm:$0xff]  }
 0x3fd   : > { %v1417_v30 = vpop.f32.mrb[34].mxu1  ;;  %v2465_v29 = vld [vmem:[%s3013_s13 + $0x28] sm:$0xff]  }
 0x3fe   : > { %1659 = vrot.lane.b32.xlu0 %v1421_v27, %s2529_s20  ;;  %v2373_v32 = vpop.f32.mrb[35].mxu1  ;;  %v2464_v27 = vld [vmem:[%s3013_s13 + $0x20] sm:$0xff]   ;;  %v2466_v30 = vld [vmem:[%s3013_s13 + $0x30] sm:$0xff]  }
 0x3ff   : > { %v2468_v32 = vld [vmem:[%s3013_s13 + $0x40] sm:$0xff]  }
 0x403   : > { %v1524_v35 = vpop.f32.mrb[36].mxu1 }
 0x404   : > { %v1531_v36 = vmul.f32 %v2499_v34, %v1524_v35  ;;  %v2384_v37 = vpop.f32.mrb[37].mxu1 }
 0x405   : > { %v1527_v38 = vpop.f32.mrb[38].mxu1 }
 0x406   : > { %1663 = vrot.lane.b32.xlu1 %v1531_v36, %s2528_s1  ;;  %v2385_v39 = vpop.f32.mrb[39].mxu1  ;;  %v2201_v38 = vld [vmem:[%s3009_s9] ss:$0 sm:$0xff]  ;;  %s577_s1 = scalar_lea.vmem %s3017_s17, %s2163_s18 }
 0x40b   : > { %v1634_v41 = vpop.f32.mrb[40].mxu1 }
 0x40c   : > { %v1641_v42 = vmul.f32 %v2501_v40, %v1634_v41  ;;  %v2396_v44 = vpop.f32.mrb[41].mxu1  ;;  %v2202_v40 = vld [vmem:[%s3010_s10] ss:$0 sm:$0xff] }
 0x40d   : > { %v1637_v43 = vpop.f32.mrb[42].mxu1 }
 0x40e   : > { %1667 = vrot.lane.b32.xlu0 %v1641_v42, %s2527_s29  ;;  %v2397_v1 = vpop.f32.mrb[43].mxu1  ;;  %v2470_v43 = vld [vmem:[%s3013_s13 + $0x50] sm:$0xff]  }
 0x40f   : > { %v2471_v1 = vld [vmem:[%s3013_s13 + $0x58] sm:$0xff]  }
 0x43b   : > { %v1644_v46 = vpop.permute.xlu1 %1643 }
 0x43c   : > { %v1670_v53 = vsel %vm761_vm2, %v870_v51, %v1644_v46  ;;  %v1814_v46 = vsub.s32 1, %v2761_v55 }
 0x43e   : > { %v1815_v48 = vrot.slane %v1806_v45, %v1814_v46 }
 0x443   : > { %v1648_v50 = vpop.permute.xlu0 %1647 }
 0x444   : > { %v1672_v54 = vsel %vm1671_vm5, %v1670_v53, %v1648_v50 }
 0x44b   : > { %v1652_v47 = vpop.permute.xlu1 %1651 }
 0x44c   : > { %v1674_v57 = vsel %vm1673_vm6, %v1672_v54, %v1652_v47  ;;  %v1811_v47 = vrot.slane %v1806_v45, %v758_v58 }
 0x462   : > { %v1656_v52 = vpop.permute.xlu1 %1655 }
 0x463   : > { %v1676_v60 = vsel %vm1675_vm7, %v1674_v57, %v1656_v52 }
 0x470   : > { %v1660_v56 = vpop.permute.xlu0 %1659 }
 0x471   : > { %v1678_v61 = vsel %vm1677_vm8, %v1676_v60, %v1660_v56 }
 0x478   : > { %v1664_v59 = vpop.permute.xlu1 %1663 }
 0x479   : > { %v1680_v62 = vsel %vm1679_vm9, %v1678_v61, %v1664_v59 }
 0x480   : > { %v1668_v63 = vpop.permute.xlu0 %1667 }
 0x481   : > { %v1682_v0 = vsel %vm1681_vm10, %v1680_v62, %v1668_v63  ;;  %v2212_v62 = vld [vmem:[%s3014_s14] ss:$0 sm:$0xff] }
 0x482   : > { %v1683_v2 = vpack.c.bf16 %v1682_v0, %v1682_v0 }
 0x484   : > { %2407 = vmatmul.mubr.msk.bf16.vlgmr.msra.gmra.mrb[28].mxu0 %vm625_vm1, %v1683_v2 }
 0x485   : > { %2013 = vmatpush1.bf16.msra.mxu0 %v2460_v23 }
 0x486   : > { %2014 = vmatprep.subr.bf16.mxu0 %v2534_v22 }
 0x489   : > { %2015 = vmatpush1.bf16.msra.mxu0 %v2461_v24 }
 0x48a   : > { %2016 = vmatprep.subr.bf16.mxu0 %v2534_v22 }
 0x48d   : > { %2017 = vmatpush1.bf16.msra.mxu0 %v2462_v25 }
 0x48e   : > { %2018 = vmatprep.subr.bf16.mxu0 %v2534_v22 }
 0x491   : > { %2019 = vmatpush1.bf16.msra.mxu0 %v2463_v26 }
 0x492   : > { %2020 = vmatprep.subr.bf16.mxu0 %v2534_v22 }
 0x495   : > { %2021 = vmatpush1.bf16.msra.mxu0 %v2464_v27 }
 0x496   : > { %2022 = vmatprep.subr.bf16.mxu0 %v2534_v22 }
 0x499   : > { %2023 = vmatpush1.bf16.msra.mxu0 %v2465_v29 }
 0x49a   : > { %2024 = vmatprep.subr.bf16.mxu0 %v2534_v22 }
 0x49d   : > { %2025 = vmatpush1.bf16.msra.mxu0 %v2466_v30 }
 0x49e   : > { %2026 = vmatprep.subr.bf16.mxu0 %v2534_v22 }
 0x4a1   : > { %2027 = vmatpush1.bf16.msra.mxu0 %v2467_v31 }
 0x4a2   : > { %2028 = vmatprep.subr.bf16.mxu0 %v2534_v22 }
 0x4a5   : > { %2029 = vmatpush1.bf16.msra.mxu0 %v2468_v32 }
 0x4a6   : > { %2030 = vmatprep.subr.bf16.mxu0 %v2534_v22 }
 0x4a9   : > { %2031 = vmatpush1.bf16.msra.mxu0 %v2469_v33 }
 0x4aa   : > { %2032 = vmatprep.subr.bf16.mxu0 %v2534_v22 }
 0x4ad   : > { %2033 = vmatpush1.bf16.msra.mxu0 %v2470_v43 }
 0x4ae   : > { %2034 = vmatprep.subr.bf16.mxu0 %v2534_v22 }
 0x4b1   : > { %2035 = vmatpush1.bf16.msra.mxu0 %v2471_v1 }
 0x557   : > { %v1760_v3 = vpop.f32.mrb[28].mxu0 }
 0x558   : > { %v1761_v6 = vadd.f32 %v2195_v49, %v1760_v3  ;;  %v2408_v28 = vpop.f32.mrb[29].mxu0 }
 0x559   : > { %v1763_v4 = vpop.f32.mrb[30].mxu0 }
 0x55a   : > { %v2409_v7 = vpop.f32.mrb[31].mxu0  ;;  %v1766_v8 = vadd.f32 %v1761_v6, %v2664_v5  ;;  %v2453_v5 = vld [vmem:[%s3011_s11 + $0x14] ss:$8 sps:$4 sm:$0xff]  }
 0x55b   : > { %1863 = vmatprep.subr.bf16.mxu1 %v2453_v5 }
 0x55c   : > { %v1767_v9 = vsel %vm625_vm1, %v1766_v8, 0.0  ;;  %1864 = vmatpush1.bf16.msra.mxu1 %v2451_v17  ;;  %v2508_v17 = vld [vmem:[%s2658_s21] sm:$0xff] }
 0x55d   : > { %1768 = vadd.xlane.f32.xlu1 %v1767_v9  ;;  %1865 = vmatprep.subr.bf16.mxu1 %v2456_v18 }
 0x560   : > { %1866 = vmatpush1.bf16.msra.mxu1 %v2454_v19 }
 0x561   : > { %1867 = vmatprep.subr.bf16.mxu1 %v2459_v20 }
 0x564   : > { %1868 = vmatpush1.bf16.msra.mxu1 %v2457_v21 }
 0x5ea   : > { %v1769_v10 = vpop.xlane.xlu1 %1768 }
 0x5eb   : > { %v1771_v11 = vmul.f32 0.015625, %v1769_v10 }
 0x5ed   : > { %v1772_v12 = vsub.f32 %v1766_v8, %v1771_v11 }
 0x5ef   : > { %v1773_v13 = vmul.f32 %v1772_v12, %v1772_v12 }
 0x5f1   : > { %v1774_v14 = vsel %vm625_vm1, %v1773_v13, 0.0  ;;  %v2226_v13 = vld [vmem:[%s3015_s15] ss:$0 sm:$0xff] }
 0x5f2   : > { %1775 = vadd.xlane.f32.xlu0 %v1774_v14 }
 0x67f   : > { %v1776_v34 = vpop.xlane.xlu0 %1775 }
 0x680   : > { %v1777_v35 = vmul.f32 0.015625, %v1776_v34 }
 0x682   : > { %v1778_v36 = vadd.f32 1e-05, %v1777_v35 }
 0x684   : > { %2504 = vrsqrt.f32 %v1778_v36 }
 0x68e   : > { %v2505_v37 = vpop.eup %2504 }
 0x68f   : > { %v1780_v39 = vmul.f32 %v2505_v37, %v1772_v12 }
 0x691   : > { %v1788_v41 = vmul.f32 %v2201_v38, %v1780_v39 }
 0x693   : > { %v1796_v42 = vadd.f32 %v2202_v40, %v1788_v41 }
 0x695   : > { %v1797_v44 = vpack.c.bf16 %v1796_v42, %v1796_v42 }
 0x697   : > { %2211 = vmatmul.mubr.msk.bf16.vlgmr.msra.gmra.mrb[44].mxu1 %vm625_vm1, %v1797_v44 }
 0x76a   : > { %v1895_v50 = vpop.f32.mrb[44].mxu1 }
 0x76b   : > { %v1896_v51 = vadd.f32 %v1895_v50, %v1811_v47  ;;  %v1897_v52 = vpop.f32.mrb[45].mxu1 }
 0x76c   : > { %v1898_v53 = vadd.f32 %v1897_v52, %v1815_v48  ;;  %v1899_v54 = vpop.f32.mrb[46].mxu1 }
 0x76d   : > { %v1902_v56 = vmax.f32 %v1896_v51, 0.0  ;;  %v1900_v57 = vpop.f32.mrb[47].mxu1 }
 0x76e   : > { %v1903_v59 = vmax.f32 %v1898_v53, 0.0 }
 0x76f   : > { %v1904_v61 = vpack.c.bf16 %v1902_v56, %v1902_v56 }
 0x770   : > { %v1905_v60 = vpack.c.bf16 %v1903_v59, %v1903_v59 }
 0x772   : > { %2225 = vmatprep.mubr.msk.bf16.mxu0 %vm625_vm1, %v1905_v60 }
 0x773   : > { %2045 = vmatmul.mubr.bf16.vlgmr.msra.gmra.mrb[32].mxu0 %v1904_v61 }
 0x846   : > { %v2046_v55 = vpop.f32.mrb[32].mxu0 }
 0x847   : > { %v2047_v58 = vadd.f32 %v2212_v62, %v2046_v55  ;;  %v2048_v63 = vpop.f32.mrb[33].mxu0 }
 0x848   : > { %v2049_v0 = vpop.f32.mrb[34].mxu0 }
 0x849   : > { %v2050_v2 = vpop.f32.mrb[35].mxu0  ;;  %v2052_v49 = vadd.f32 %v2047_v58, %v1796_v42 }
 0x84b   : > { %v2053_v3 = vsel %vm625_vm1, %v2052_v49, 0.0 }
 0x84c   : > { %2054 = vadd.xlane.f32.xlu0 %v2053_v3 }
 0x8d9   : > { %v2055_v6 = vpop.xlane.xlu0 %2054 }
 0x8da   : > { %v2056_v28 = vmul.f32 0.015625, %v2055_v6 }
 0x8dc   : > { %v2057_v4 = vsub.f32 %v2052_v49, %v2056_v28 }
 0x8de   : > { %v2058_v7 = vmul.f32 %v2057_v4, %v2057_v4 }
 0x8e0   : > { %v2059_v8 = vsel %vm625_vm1, %v2058_v7, 0.0 }
 0x8e1   : > { %2060 = vadd.xlane.f32.xlu1 %v2059_v8 }
 0x96e   : > { %v2061_v9 = vpop.xlane.xlu1 %2060 }
 0x96f   : > { %v2062_v10 = vmul.f32 0.015625, %v2061_v9 }
 0x971   : > { %v2063_v11 = vadd.f32 1e-05, %v2062_v10 }
 0x973   : > { %2506 = vrsqrt.f32 %v2063_v11 }
 0x97d   : > { %v2507_v12 = vpop.eup %2506 }
 0x97e   : > { %v2065_v14 = vmul.f32 %v2507_v12, %v2057_v4 }
 0x980   : > { %v2073_v16 = vmul.f32 %v2226_v13, %v2065_v14 }
 0x982   : > { %v2081_v5 = vadd.f32 %v2227_v15, %v2073_v16 }
 0x984   : > { %v2082_v18 = vadd.f32 %v2508_v17, %v2081_v5 }
 0x986   : > { %2083 = vst.msk [vmem:[%s577_s1] sm:$0xff] %vm625_vm1, %v2082_v18 }
 0x987 PF: > { %s27_s24 = sadd.s32 1, %s2515_s24  }
 0x988   : > { %p24_p4 = scmp.ge.s32.totalorder %s27_s24, 4  }
 0x98a   :  { %26 = sbr.rel (!%p24_p4) target bundleno = 3 (0x3), region = 124 }

// kernel: bi_cross_attention_forward.8
= control target key start
LH: loop header
LB: loop body
LE: loop exit
PB: predicated region body
PF: predicated region fallthrough
CT: control target
= control target key end

     0   :  { %s2884_s24 = smov 0   ;;  %s3349_s0 = inlined_call_operand.vmem [shape: f32[2,12,64], index: 0, kind: input, shape index: {}]   ;;  %s3350_s1 = inlined_call_operand.vmem [shape: f32[2,8,64], index: 1, kind: input, shape index: {}]   ;;  %s3351_s2 = inlined_call_operand.vmem [shape: f32[2,1,8], index: 2, kind: input, shape index: {}]   ;;  %s3352_s3 = inlined_call_operand.vmem [shape: bf16[64,64], index: 3, kind: input, shape index: {}]   ;;  %s3353_s4 = inlined_call_operand.vmem [shape: f32[1,64], index: 4, kind: input, shape index: {}]   ;;  %s3354_s5 = inlined_call_operand.vmem [shape: bf16[64,128], index: 5, kind: input, shape index: {}]   ;;  %s3355_s6 = inlined_call_operand.vmem [shape: f32[1,128], index: 6, kind: input, shape index: {}]   ;;  %s3356_s7 = inlined_call_operand.vmem [shape: bf16[64,64], index: 7, kind: input, shape index: {}]   ;;  %s3357_s8 = inlined_call_operand.vmem [shape: f32[1,64], index: 8, kind: input, shape index: {}]   ;;  %s3358_s9 = inlined_call_operand.vmem [shape: f32[1,64], index: 9, kind: input, shape index: {}]   ;;  %s3359_s10 = inlined_call_operand.vmem [shape: f32[1,64], index: 10, kind: input, shape index: {}]   ;;  %s3360_s11 = inlined_call_operand.vmem [shape: bf16[64,192], index: 11, kind: input, shape index: {}]   ;;  %s3361_s12 = inlined_call_operand.vmem [shape: f32[1,192], index: 12, kind: input, shape index: {}]   ;;  %s3362_s13 = inlined_call_operand.vmem [shape: bf16[192,64], index: 13, kind: input, shape index: {}]   ;;  %s3363_s14 = inlined_call_operand.vmem [shape: f32[1,64], index: 14, kind: input, shape index: {}]   ;;  %s3364_s15 = inlined_call_operand.vmem [shape: f32[1,64], index: 15, kind: input, shape index: {}]   ;;  %s3365_s16 = inlined_call_operand.vmem [shape: f32[1,64], index: 16, kind: input, shape index: {}]   ;;  %s3366_s17 = inlined_call_operand.vmem [shape: f32[2,12,64], index: 17, kind: output, shape index: {}]  }
   0x1   :  { %3367 = sst [smem:[#allocation2_spill]] %s3349_s0 }
   0x2   :  { %3368 = sst [smem:[#allocation3_spill]] %s3350_s1 }
   0x3 LB: > { %s2343_s25 = sadd.s32 4294967295, %s2774_s24   ;;  %p2347_p0 = scmp.ge.s32.totalorder %s2774_s24, 1  ;;  %s2774_s24 = sphi %s2884_s24, %s27_s24  }
   0x4   : > { %p504_p1 = scmp.lt.s32.totalorder %s2774_s24, 3 }
   0x6   : > { %p505_p2 = pnand %p2347_p0, %p504_p1 }
   0x7   : > { %v2658_v0 = vld [vmem:[%s3352_s3] sm:$0xff] (!%p505_p2)   ;;  %v2776_v1 = vmov (!%p505_p2), 0.0   ;;  %v2659_v2 = vld [vmem:[%s3352_s3 + $0x8] sm:$0xff] (!%p505_p2)   ;;  %vm2777_vm0 = vmmov (!%p505_p2), 0   ;;  %p563_p3 = scmp.lt.s32.totalorder (!%p505_p2), %s2343_s25, 1  ;;  %v2660_v3 = vld [vmem:[%s3352_s3 + $0x10] sm:$0xff] (!%p505_p2)   ;;  %v759_v55 = vlaneseq (!%p505_p2) }
   0x8   : > { %508 = sbr.rel (%p505_p2) target bundleno = 2465 (0x9a1), region = 88  ;;  %2465 = vmatprep.subr.bf16.mxu1 (!%p505_p2), %v2776_v1  ;;  %2501 = vmatprep.subr.bf16.mxu0 (!%p505_p2), %v2776_v1  ;;  %s3369_s20 = sld [smem:[#allocation2_spill]] (!%p505_p2)  ;;  %v2661_v4 = vld [vmem:[%s3352_s3 + $0x18] sm:$0xff] (!%p505_p2)   ;;  %v2662_v7 = vld [vmem:[%s3354_s5] sm:$0xff] (!%p505_p2)   ;;  %vm627_vm1 = vcmask (!%p505_p2), 523264   ;;  %v2663_v9 = vld [vmem:[%s3354_s5 + $0x8] sm:$0xff] (!%p505_p2)  }
   0x9   : > { %2466 = vmatpush3.bf16.msra.mxu1 (!%p505_p2), %v2658_v0  ;;  %2473 = vmatprep.mubr.msk.bf16.mxu1 (!%p505_p2), %vm2777_vm0, %v2776_v1  ;;  %v2664_v10 = vld [vmem:[%s3354_s5 + $0x10] sm:$0xff] (!%p505_p2)   ;;  %s3370_s22 = sld [smem:[#allocation3_spill]] (!%p505_p2)  ;;  %v2665_v11 = vld [vmem:[%s3354_s5 + $0x18] sm:$0xff] (!%p505_p2)   ;;  %v2353_v14 = vld [vmem:[%s3353_s4] ss:$0 sm:$0xff] (!%p505_p2)  ;;  %vm764_vm2 = vcmask (!%p505_p2), 64512  }
   0xa   : > { %2467 = vmatprep.subr.bf16.mxu1 (!%p505_p2), %v2776_v1  ;;  %2503 = vmatprep.mubr.msk.bf16.mxu0 (!%p505_p2), %vm2777_vm0, %v2776_v1  ;;  %v2359_v24 = vld [vmem:[%s3355_s6] ss:$0 sm:$0xff] (!%p505_p2)  ;;  %s2778_s19 = smov (!%p505_p2), 112   ;;  %s2779_s1 = smov (!%p505_p2), 120   ;;  %vm838_vm3 = vcmask (!%p505_p2), 1043456   ;;  %v3019_v56 = vshrl.u32 (!%p505_p2), %v759_v55, 7 }
   0xb   : > { %s2783_s26 = smov (!%p505_p2), 80   ;;  %s2784_s27 = smov (!%p505_p2), 72   ;;  %vm815_vm4 = vcmask (!%p505_p2), 60416   ;;  %vm1807_vm5 = vcmask (!%p505_p2), 130048   ;;  %vm1810_vm6 = vcmask (!%p505_p2), 195584   ;;  %vm1813_vm7 = vcmask (!%p505_p2), 261120  }
   0xc   : > { %s2785_s29 = smov (!%p505_p2), 64   ;;  %s2786_s0 = smov (!%p505_p2), 56   ;;  %v761_v59 = vsub.s32 (!%p505_p2), 0, %v3019_v56  ;;  %vm1816_vm8 = vcmask (!%p505_p2), 326656   ;;  %vm1819_vm9 = vcmask (!%p505_p2), 392192   ;;  %vm1822_vm10 = vcmask (!%p505_p2), 457728  }
   0xd   : > { %2468 = vmatpush3.bf16.msra.mxu1 (!%p505_p2), %v2659_v2  ;;  %vm1914_vm11 = vcmask (!%p505_p2), 519168  }
   0xe   : > { %2469 = vmatprep.subr.bf16.mxu1 (!%p505_p2), %v2776_v1 }
   0xf   : > { %s3372_s25 = smov (!%p563_p3, %s2343_s25), 1 }
  0x10   : > { %s2416_s18 = sshll.u32 %s3372_s25, 4  ;;  %s2350_s28 = sshll.u32 %s3372_s25, 3 }
  0x11   : > { %s2917_s21 = scalar_lea.vmem %s3369_s20, %s2416_s18  ;;  %2470 = vmatpush3.bf16.msra.mxu1 %v2660_v3  ;;  %s571_s23 = scalar_lea.vmem %s3370_s22, %s2350_s28 }
  0x12   : > { %v581_v5 = vld [vmem:[%s2917_s21] sm:$0xff]  ;;  %v582_v6 = vld [vmem:[%s2917_s21 + $0x8] sm:$0xf]  ;;  %2471 = vmatprep.subr.bf16.mxu1 %v2776_v1  ;;  %s2780_s20 = smov 104   ;;  %s2781_s22 = smov 96  }
  0x13   : > { %v583_v8 = vpack.c.bf16 %v582_v6, %v581_v5  ;;  %v584_v12 = vld [vmem:[%s571_s23] sm:$0xff]  ;;  %s2782_s23 = smov 88   ;;  %s2787_s28 = smov 48  }
  0x14   : > { %v585_v13 = vpack.c.bf16 %v584_v12, %v584_v12 }
  0x15   : > { %2472 = vmatpush3.bf16.msra.mxu1 %v2661_v4 }
  0x16   : > { %2477 = vmatprep.subr.bf16.mxu1 %v2776_v1 }
  0x18   : > { %2474 = vmatmul.mubr.msk.bf16.vlgmr.msra.gmra.mrb[0].mxu1 %vm627_vm1, %v583_v8 }
  0x19   : > { %2478 = vmatpush3.bf16.msra.mxu1 %v2662_v7  ;;  %2485 = vmatprep.mubr.msk.bf16.mxu1 %vm2777_vm0, %v2776_v1 }
  0x1a   : > { %2479 = vmatprep.subr.bf16.mxu1 %v2776_v1 }
  0x1d   : > { %2480 = vmatpush3.bf16.msra.mxu1 %v2663_v9 }
  0x1e   : > { %2481 = vmatprep.subr.bf16.mxu1 %v2776_v1 }
  0x21   : > { %2482 = vmatpush3.bf16.msra.mxu1 %v2664_v10 }
  0x22   : > { %2483 = vmatprep.subr.bf16.mxu1 %v2776_v1 }
  0x25   : > { %2484 = vmatpush3.bf16.msra.mxu1 %v2665_v11 }
  0x26   : > { %2489 = vmatprep.subr.bf16.mxu1 %v2776_v1 }
  0x28   : > { %2486 = vmatmul.mubr.msk.bf16.vlgmr.msra.gmra.mrb[4].mxu1 %vm627_vm1, %v585_v13 }
  0x29   : > { %2491 = vmatprep.mubr.msk.bf16.mxu1 %vm2777_vm0, %v2776_v1 }
  0xeb   : > { %v665_v15 = vpop.f32.mrb[0].mxu1 }
  0xec   : > { %v666_v16 = vadd.f32 %v2353_v14, %v665_v15  ;;  %v2475_v17 = vpop.f32.mrb[1].mxu1 }
  0xed   : > { %v668_v18 = vpop.f32.mrb[2].mxu1 }
  0xee   : > { %v672_v19 = vmul.f32 0.35355338, %v666_v16  ;;  %v669_v20 = vadd.f32 %v2353_v14, %v668_v18  ;;  %v2476_v21 = vpop.f32.mrb[3].mxu1 }
  0xf0   : > { %v673_v22 = vmul.f32 0.35355338, %v669_v20 }
  0xf2   : > { %v674_v23 = vpack.c.bf16 %v673_v22, %v672_v19 }
  0xfb   : > { %v751_v25 = vpop.f32.mrb[4].mxu1 }
  0xfc   : > { %v752_v26 = vadd.f32 %v2359_v24, %v751_v25  ;;  %v2487_v27 = vpop.f32.mrb[5].mxu1 }
  0xfd   : > { %v754_v28 = vpop.f32.mrb[6].mxu1 }
  0xfe   : > { %v2958_v29 = vpack.c.bf16 %v752_v26, %v752_v26  ;;  %v2488_v30 = vpop.f32.mrb[7].mxu1 }
 0x100   : > { %1013 = vrot.lane.b32.xlu1 %v2958_v29, %s2778_s19  ;;  %890 = vrot.lane.b32.xlu0 %v2958_v29, %s2779_s1  ;;  %v769_v31 = vsel %vm764_vm2, %v2958_v29, 0 }
 0x101   : > { %2490 = vmatpush3.bf16.xpose.msra.mxu1 %v769_v31 }
 0x102   : > { %2495 = vmatprep.subr.bf16.mxu1 %v2776_v1 }
 0x104   : > { %1011 = vrot.lane.b32.xlu1 %v674_v23, %s2778_s19  ;;  %888 = vrot.lane.b32.xlu0 %v674_v23, %s2779_s1  ;;  %s574_s1 = scalar_lea.vmem %s3351_s2, %s3372_s25 }
 0x105   : > { %v586_v57 = vld [vmem:[%s574_s1] sm:$0x1] }
 0x106   : > { %v587_v58 = vmul.f32 -1e+09, %v586_v57 }
 0x108   : > { %1134 = vrot.lane.b32.xlu1 %v674_v23, %s2780_s20  ;;  %1136 = vrot.lane.b32.xlu0 %v2958_v29, %s2780_s20  ;;  %v3024_v60 = vrot.slane %v587_v58, %v761_v59  ;;  %s2788_s20 = smov 40  }
 0x109   : > { %2492 = vmatmul.mubr.msk.bf16.vlgmr.msra.gmra.mrb[8].mxu1 %vm764_vm2, %v674_v23 }
 0x10a   : > { %2497 = vmatprep.mubr.msk.bf16.mxu1 %vm2777_vm0, %v2776_v1 }
 0x10c   : > { %1257 = vrot.lane.b32.xlu1 %v674_v23, %s2781_s22  ;;  %1259 = vrot.lane.b32.xlu0 %v2958_v29, %s2781_s22  ;;  %s2789_s22 = smov 32  }
 0x110   : > { %1380 = vrot.lane.b32.xlu1 %v674_v23, %s2782_s23  ;;  %1382 = vrot.lane.b32.xlu0 %v2958_v29, %s2782_s23  ;;  %s2790_s23 = smov 24  }
 0x114   : > { %1503 = vrot.lane.b32.xlu1 %v674_v23, %s2783_s26  ;;  %1505 = vrot.lane.b32.xlu0 %v2958_v29, %s2783_s26  ;;  %s2791_s26 = smov 16  }
 0x118   : > { %1626 = vrot.lane.b32.xlu1 %v674_v23, %s2784_s27  ;;  %1628 = vrot.lane.b32.xlu0 %v2958_v29, %s2784_s27  ;;  %s2792_s27 = smov 8  }
 0x11c   : > { %833 = vrot.lane.b32.xlu1 %v2958_v29, %s2785_s29  ;;  %958 = vrot.lane.b32.xlu0 %v2958_v29, %s2786_s0 }
 0x120   : > { %1081 = vrot.lane.b32.xlu1 %v2958_v29, %s2787_s28 }
 0x172   : > { %v1014_v32 = vpop.permute.xlu1 %1013  ;;  %v891_v33 = vpop.permute.xlu0 %890 }
 0x173   : > { %v896_v34 = vsel %vm764_vm2, %v891_v33, 0  ;;  %v1019_v38 = vsel %vm764_vm2, %v1014_v32, 0 }
 0x174   : > { %2502 = vmatpush3.bf16.xpose.msra.mxu0 %v896_v34 }
 0x175   : > { %2513 = vmatprep.subr.bf16.mxu0 %v2776_v1 }
 0x176   : > { %v1012_v35 = vpop.permute.xlu1 %1011  ;;  %v889_v36 = vpop.permute.xlu0 %888 }
 0x17a   : > { %v1135_v37 = vpop.permute.xlu1 %1134  ;;  %v1137_v40 = vpop.permute.xlu0 %1136 }
 0x17b   : > { %2504 = vmatmul.mubr.msk.bf16.vlgmr.msra.gmra.mrb[0].mxu0 %vm764_vm2, %v889_v36  ;;  %v1142_v42 = vsel %vm764_vm2, %v1137_v40, 0 }
 0x17c   : > { %2514 = vmatpush3.bf16.xpose.msra.mxu0 %v1019_v38  ;;  %2515 = vmatprep.mubr.msk.bf16.mxu0 %vm2777_vm0, %v2776_v1 }
 0x17d   : > { %2525 = vmatprep.subr.bf16.mxu0 %v2776_v1 }
 0x17e   : > { %v1258_v39 = vpop.permute.xlu1 %1257  ;;  %v1260_v44 = vpop.permute.xlu0 %1259 }
 0x17f   : > { %v1265_v46 = vsel %vm764_vm2, %v1260_v44, 0 }
 0x182   : > { %v1381_v41 = vpop.permute.xlu1 %1380  ;;  %v1383_v49 = vpop.permute.xlu0 %1382 }
 0x183   : > { %2516 = vmatmul.mubr.msk.bf16.vlgmr.msra.gmra.mrb[4].mxu0 %vm764_vm2, %v1012_v35  ;;  %v1388_v50 = vsel %vm764_vm2, %v1383_v49, 0 }
 0x184   : > { %2526 = vmatpush3.bf16.xpose.msra.mxu0 %v1142_v42  ;;  %2527 = vmatprep.mubr.msk.bf16.mxu0 %vm2777_vm0, %v2776_v1 }
 0x185   : > { %2537 = vmatprep.subr.bf16.mxu0 %v2776_v1 }
 0x186   : > { %v1504_v43 = vpop.permute.xlu1 %1503  ;;  %v1506_v51 = vpop.permute.xlu0 %1505 }
 0x187   : > { %v1511_v52 = vsel %vm764_vm2, %v1506_v51, 0 }
 0x18a   : > { %v1627_v45 = vpop.permute.xlu1 %1626  ;;  %v1629_v53 = vpop.permute.xlu0 %1628 }
 0x18b   : > { %2528 = vmatmul.mubr.msk.bf16.vlgmr.msra.gmra.mrb[8].mxu0 %vm764_vm2, %v1135_v37  ;;  %v1634_v54 = vsel %vm764_vm2, %v1629_v53, 0 }
 0x18c   : > { %2538 = vmatpush3.bf16.xpose.msra.mxu0 %v1265_v46  ;;  %2539 = vmatprep.mubr.msk.bf16.mxu0 %vm2777_vm0, %v2776_v1 }
 0x18d   : > { %2549 = vmatprep.subr.bf16.mxu0 %v2776_v1 }
 0x18e   : > { %v834_v47 = vpop.permute.xlu1 %833  ;;  %v959_v35 = vpop.permute.xlu0 %958 }
 0x18f   : > { %v840_v48 = vsel %vm838_vm3, %v834_v47, 0 }
 0x190   : > { %2496 = vmatpush3.bf16.msra.mxu1 %v840_v48 }
 0x191   : > { %2507 = vmatprep.subr.bf16.mxu1 %v2776_v1 }
 0x193   : > { %2540 = vmatmul.mubr.msk.bf16.vlgmr.msra.gmra.mrb[12].mxu0 %vm764_vm2, %v1258_v39  ;;  %v3068_v39 = vpop.permute.xlu1 %1081 }
 0x194   : > { %2550 = vmatpush3.bf16.xpose.msra.mxu0 %v1388_v50  ;;  %2551 = vmatprep.mubr.msk.bf16.mxu0 %vm2777_vm0, %v2776_v1 }
 0x195   : > { %2561 = vmatprep.subr.bf16.mxu0 %v2776_v1 }
 0x19b   : > { %2552 = vmatmul.mubr.msk.bf16.vlgmr.msra.gmra.mrb[16].mxu0 %vm764_vm2, %v1381_v41 }
 0x19c   : > { %2562 = vmatpush3.bf16.xpose.msra.mxu0 %v1511_v52  ;;  %2563 = vmatprep.mubr.msk.bf16.mxu0 %vm2777_vm0, %v2776_v1 }
 0x19d   : > { %2573 = vmatprep.subr.bf16.mxu0 %v2776_v1 }
 0x1a3   : > { %2564 = vmatmul.mubr.msk.bf16.vlgmr.msra.gmra.mrb[20].mxu0 %vm764_vm2, %v1504_v43 }
 0x1a4   : > { %2574 = vmatpush3.bf16.xpose.msra.mxu0 %v1634_v54  ;;  %2575 = vmatprep.mubr.msk.bf16.mxu0 %vm2777_vm0, %v2776_v1 }
 0x1a5   : > { %2585 = vmatprep.subr.bf16.mxu0 %v2776_v1 }
 0x1ab   : > { %2576 = vmatmul.mubr.msk.bf16.vlgmr.msra.gmra.mrb[24].mxu0 %vm764_vm2, %v1627_v45 }
 0x1ac   : > { %2593 = vmatprep.mubr.msk.bf16.mxu0 %vm2777_vm0, %v2776_v1 }
 0x1dc   : > { %v805_v61 = vpop.f32.mrb[8].mxu1 }
 0x1dd   : > { %v806_v62 = vadd.f32 %v805_v61, %v3024_v60  ;;  %v2493_v63 = vpop.f32.mrb[9].mxu1 }
 0x1de   : > { %v808_v0 = vpop.f32.mrb[10].mxu1 }
 0x1df   : > { %v809_v2 = vadd.f32 %v808_v0, %v3024_v60  ;;  %v2494_v3 = vpop.f32.mrb[11].mxu1  ;;  %v812_v4 = vsel %vm764_vm2, %v806_v62, -inf }
 0x1e0   : > { %813 = vmax.xlane.f32.xlu0 %v812_v4 }
 0x1e1   : > { %v816_v5 = vsel %vm815_vm4, %v809_v2, -inf }
 0x1e2   : > { %817 = vmax.xlane.f32.xlu1 %v816_v5 }
 0x24e   : > { %v932_v6 = vpop.f32.mrb[0].mxu0 }
 0x24f   : > { %v3031_v7 = vadd.f32 %v932_v6, %v3024_v60  ;;  %v2505_v8 = vpop.f32.mrb[1].mxu0 }
 0x250   : > { %v935_v9 = vpop.f32.mrb[2].mxu0 }
 0x251   : > { %v3034_v10 = vadd.f32 %v935_v9, %v3024_v60  ;;  %v2506_v11 = vpop.f32.mrb[3].mxu0  ;;  %v939_v12 = vsel %vm764_vm2, %v3031_v7, -inf }
 0x252   : > { %940 = vmax.xlane.f32.xlu0 %v939_v12  ;;  %v964_v12 = vsel %vm838_vm3, %v959_v35, 0 }
 0x253   : > { %v942_v13 = vsel %vm815_vm4, %v3034_v10, -inf }
 0x256   : > { %v1055_v14 = vpop.f32.mrb[4].mxu0  ;;  %943 = vmax.xlane.f32.xlu0 %v942_v13 }
 0x257   : > { %v3041_v15 = vadd.f32 %v1055_v14, %v3024_v60  ;;  %v2517_v16 = vpop.f32.mrb[5].mxu0 }
 0x258   : > { %v1058_v17 = vpop.f32.mrb[6].mxu0 }
 0x259   : > { %v3044_v18 = vadd.f32 %v1058_v17, %v3024_v60  ;;  %v2518_v19 = vpop.f32.mrb[7].mxu0  ;;  %v1062_v20 = vsel %vm764_vm2, %v3041_v15, -inf }
 0x25a   : > { %1063 = vmax.xlane.f32.xlu1 %v1062_v20 }
 0x25b   : > { %v1065_v21 = vsel %vm815_vm4, %v3044_v18, -inf }
 0x25c   : > { %1066 = vmax.xlane.f32.xlu0 %v1065_v21 }
 0x25e   : > { %v1178_v22 = vpop.f32.mrb[8].mxu0 }
 0x25f   : > { %v3051_v23 = vadd.f32 %v1178_v22, %v3024_v60  ;;  %v2529_v24 = vpop.f32.mrb[9].mxu0 }
 0x260   : > { %v1181_v25 = vpop.f32.mrb[10].mxu0 }
 0x261   : > { %v3054_v26 = vadd.f32 %v1181_v25, %v3024_v60  ;;  %v2530_v27 = vpop.f32.mrb[11].mxu0  ;;  %v1185_v28 = vsel %vm764_vm2, %v3051_v23, -inf }
 0x262   : > { %1186 = vmax.xlane.f32.xlu1 %v1185_v28 }
 0x263   : > { %v1188_v30 = vsel %vm815_vm4, %v3054_v26, -inf }
 0x264   : > { %1189 = vmax.xlane.f32.xlu0 %v1188_v30 }
 0x266   : > { %v1301_v31 = vpop.f32.mrb[12].mxu0 }
 0x267   : > { %v3061_v32 = vadd.f32 %v1301_v31, %v3024_v60  ;;  %v2541_v33 = vpop.f32.mrb[13].mxu0 }
 0x268   : > { %v1304_v34 = vpop.f32.mrb[14].mxu0 }
 0x269   : > { %v3064_v36 = vadd.f32 %v1304_v34, %v3024_v60  ;;  %v2542_v37 = vpop.f32.mrb[15].mxu0  ;;  %v1308_v38 = vsel %vm764_vm2, %v3061_v32, -inf }
 0x26a   : > { %1309 = vmax.xlane.f32.xlu0 %v1308_v38 }
 0x26b   : > { %v1311_v41 = vsel %vm815_vm4, %v3064_v36, -inf }
 0x26d   : > { %v814_v40 = vpop.xlane.xlu0 %813 }
 0x26e   : > { %v819_v42 = vsub.f32 %v806_v62, %v814_v40  ;;  %v1424_v43 = vpop.f32.mrb[16].mxu0  ;;  %1312 = vmax.xlane.f32.xlu0 %v1311_v41 }
 0x26f   : > { %v3073_v44 = vadd.f32 %v1424_v43, %v3024_v60  ;;  %v818_v45 = vpop.xlane.xlu1 %817  ;;  %v2553_v46 = vpop.f32.mrb[17].mxu0 }
 0x270   : > { %v821_v47 = vmul.f32 1.442695, %v819_v42  ;;  %v820_v48 = vsub.f32 %v809_v2, %v818_v45  ;;  %v1427_v49 = vpop.f32.mrb[18].mxu0  ;;  %v1087_v42 = vsel %vm838_vm3, %v3068_v39, 0 }
 0x271   : > { %v3076_v50 = vadd.f32 %v1427_v49, %v3024_v60  ;;  %v2554_v51 = vpop.f32.mrb[19].mxu0  ;;  %v1431_v52 = vsel %vm764_vm2, %v3073_v44, -inf }
 0x272   : > { %v823_v53 = vmul.f32 1.442695, %v820_v48  ;;  %1432 = vmax.xlane.f32.xlu1 %v1431_v52  ;;  %2694 = vpow2.f32 %v821_v47 }
 0x273   : > { %v1434_v54 = vsel %vm815_vm4, %v3076_v50, -inf }
 0x274   : > { %2696 = vpow2.f32 %v823_v53  ;;  %1435 = vmax.xlane.f32.xlu0 %v1434_v54 }
 0x276   : > { %v1547_v55 = vpop.f32.mrb[20].mxu0 }
 0x277   : > { %v3083_v57 = vadd.f32 %v1547_v55, %v3024_v60  ;;  %v2565_v58 = vpop.f32.mrb[21].mxu0 }
 0x278   : > { %v1550_v61 = vpop.f32.mrb[22].mxu0 }
 0x279   : > { %v3086_v62 = vadd.f32 %v1550_v61, %v3024_v60  ;;  %v2566_v63 = vpop.f32.mrb[23].mxu0  ;;  %v1554_v0 = vsel %vm764_vm2, %v3083_v57, -inf }
 0x27a   : > { %1555 = vmax.xlane.f32.xlu0 %v1554_v0 }
 0x27b   : > { %v1557_v3 = vsel %vm815_vm4, %v3086_v62, -inf }
 0x27c   : > { %v3090_v2 = vpop.eup %2694 }
 0x27e   : > { %v3094_v4 = vpop.eup %2696  ;;  %v1670_v5 = vpop.f32.mrb[24].mxu0  ;;  %1558 = vmax.xlane.f32.xlu0 %v1557_v3 }
 0x27f   : > { %v3097_v6 = vadd.f32 %v1670_v5, %v3024_v60  ;;  %v2577_v8 = vpop.f32.mrb[25].mxu0  ;;  %v831_v9 = vpack.c.bf16 %v3094_v4, %v3090_v2 }
 0x280   : > { %v1673_v11 = vpop.f32.mrb[26].mxu0 }
 0x281   : > { %2498 = vmatmul.mubr.msk.bf16.vlgmr.msra.gmra.mrb[12].mxu1 %vm764_vm2, %v831_v9  ;;  %v2578_v13 = vpop.f32.mrb[27].mxu0  ;;  %v1677_v14 = vsel %vm764_vm2, %v3097_v6, -inf  ;;  %v3117_v16 = vadd.f32 %v1673_v11, %v3024_v60 }
 0x282   : > { %2508 = vmatpush3.bf16.msra.mxu1 %v964_v12  ;;  %1678 = vmax.xlane.f32.xlu0 %v1677_v14 }
 0x283   : > { %1204 = vrot.lane.b32.xlu1 %v2958_v29, %s2788_s20  ;;  %2509 = vmatprep.mubr.msk.bf16.mxu1 %vm2777_vm0, %v2776_v1  ;;  %v1680_v17 = vsel %vm815_vm4, %v3117_v16, -inf }
 0x284   : > { %2519 = vmatprep.subr.bf16.mxu1 %v2776_v1 }
 0x298   : > { %1327 = vrot.lane.b32.xlu0 %v2958_v29, %s2789_s22 }
 0x29c   : > { %1450 = vrot.lane.b32.xlu0 %v2958_v29, %s2790_s23 }
 0x2a0   : > { %1573 = vrot.lane.b32.xlu0 %v2958_v29, %s2791_s26 }
 0x2a4   : > { %1696 = vrot.lane.b32.xlu0 %v2958_v29, %s2792_s27 }
 0x2a7   : > { %1681 = vmax.xlane.f32.xlu1 %v1680_v17 }
 0x2df   : > { %v941_v19 = vpop.xlane.xlu0 %940 }
 0x2e0   : > { %v945_v20 = vsub.f32 %v3031_v7, %v941_v19 }
 0x2e2   : > { %v947_v21 = vmul.f32 1.442695, %v945_v20 }
 0x2e3   : > { %v944_v22 = vpop.xlane.xlu0 %943 }
 0x2e4   : > { %2698 = vpow2.f32 %v947_v21  ;;  %v946_v24 = vsub.f32 %v3034_v10, %v944_v22 }
 0x2e6   : > { %v949_v25 = vmul.f32 1.442695, %v946_v24 }
 0x2e7   : > { %v1064_v27 = vpop.xlane.xlu1 %1063 }
 0x2e8   : > { %2700 = vpow2.f32 %v949_v25  ;;  %v1068_v60 = vsub.f32 %v3041_v15, %v1064_v27 }
 0x2e9   : > { %v1067_v28 = vpop.xlane.xlu0 %1066 }
 0x2ea   : > { %v1070_v30 = vmul.f32 1.442695, %v1068_v60  ;;  %v1069_v29 = vsub.f32 %v3044_v18, %v1067_v28 }
 0x2ec   : > { %2702 = vpow2.f32 %v1070_v30  ;;  %v1072_v31 = vmul.f32 1.442695, %v1069_v29 }
 0x2ee   : > { %v2699_v33 = vpop.eup %2698  ;;  %2704 = vpow2.f32 %v1072_v31 }
 0x2ef   : > { %v1187_v34 = vpop.xlane.xlu1 %1186  ;;  %v951_v7 = vsel %vm764_vm2, %v2699_v33, 0.0 }
 0x2f0   : > { %v1191_v35 = vsub.f32 %v3051_v23, %v1187_v34  ;;  %952 = vadd.xlane.f32.xlu0 %v951_v7 }
 0x2f1   : > { %v1190_v10 = vpop.xlane.xlu0 %1189 }
 0x2f2   : > { %v2701_v37 = vpop.eup %2700  ;;  %v1193_v38 = vmul.f32 1.442695, %v1191_v35  ;;  %v1192_v40 = vsub.f32 %v3054_v26, %v1190_v10 }
 0x2f3   : > { %v954_v15 = vsel %vm815_vm4, %v2701_v37, 0.0  ;;  %v957_v41 = vpack.c.bf16 %v2701_v37, %v2699_v33 }
 0x2f4   : > { %2706 = vpow2.f32 %v1193_v38  ;;  %v1195_v18 = vmul.f32 1.442695, %v1192_v40  ;;  %955 = vadd.xlane.f32.xlu1 %v954_v15 }
 0x2f5   : > { %2510 = vmatmul.mubr.msk.bf16.vlgmr.msra.gmra.mrb[16].mxu1 %vm764_vm2, %v957_v41  ;;  %v825_v41 = vsel %vm764_vm2, %v3090_v2, 0.0 }
 0x2f6   : > { %v2703_v43 = vpop.eup %2702  ;;  %2708 = vpow2.f32 %v1195_v18  ;;  %2520 = vmatpush3.bf16.msra.mxu1 %v1087_v42  ;;  %2521 = vmatprep.mubr.msk.bf16.mxu1 %vm2777_vm0, %v2776_v1 }
 0x2f7   : > { %v1310_v23 = vpop.xlane.xlu0 %1309  ;;  %v1074_v26 = vsel %vm764_vm2, %v2703_v43, 0.0  ;;  %2531 = vmatprep.subr.bf16.mxu1 %v2776_v1 }
 0x2f8   : > { %v2705_v45 = vpop.eup %2704  ;;  %v1314_v46 = vsub.f32 %v3061_v32, %v1310_v23  ;;  %1075 = vadd.xlane.f32.xlu1 %v1074_v26 }
 0x2f9   : > { %v1077_v39 = vsel %vm815_vm4, %v2705_v45, 0.0  ;;  %v1080_v49 = vpack.c.bf16 %v2705_v45, %v2703_v43 }
 0x2fa   : > { %v1316_v47 = vmul.f32 1.442695, %v1314_v46 }
 0x2fb   : > { %v1313_v48 = vpop.xlane.xlu0 %1312 }
 0x2fc   : > { %2710 = vpow2.f32 %v1316_v47  ;;  %v1315_v51 = vsub.f32 %v3064_v36, %v1313_v48  ;;  %1078 = vadd.xlane.f32.xlu1 %v1077_v39  ;;  %v828_v48 = vsel %vm815_vm4, %v3094_v4, 0.0 }
 0x2fd   : > { %2522 = vmatmul.mubr.msk.bf16.vlgmr.msra.gmra.mrb[20].mxu1 %vm764_vm2, %v1080_v49 }
 0x2fe   : > { %v2707_v52 = vpop.eup %2706  ;;  %v1318_v53 = vmul.f32 1.442695, %v1315_v51  ;;  %2533 = vmatprep.mubr.msk.bf16.mxu1 %vm2777_vm0, %v2776_v1 }
 0x2ff   : > { %v1433_v54 = vpop.xlane.xlu1 %1432  ;;  %v1197_v32 = vsel %vm764_vm2, %v2707_v52, 0.0 }
 0x300   : > { %v2709_v55 = vpop.eup %2708  ;;  %2712 = vpow2.f32 %v1318_v53  ;;  %v1437_v58 = vsub.f32 %v3073_v44, %v1433_v54  ;;  %1198 = vadd.xlane.f32.xlu1 %v1197_v32 }
 0x301   : > { %v1436_v61 = vpop.xlane.xlu0 %1435  ;;  %v1200_v3 = vsel %vm815_vm4, %v2709_v55, 0.0  ;;  %v1203_v11 = vpack.c.bf16 %v2709_v55, %v2707_v52 }
 0x302   : > { %v1439_v63 = vmul.f32 1.442695, %v1437_v58  ;;  %v1438_v36 = vsub.f32 %v3076_v50, %v1436_v61 }
 0x303   : > { %v1205_v0 = vpop.permute.xlu1 %1204 }
 0x304   : > { %2714 = vpow2.f32 %v1439_v63  ;;  %v1441_v5 = vmul.f32 1.442695, %v1438_v36  ;;  %v1210_v8 = vsel %vm838_vm3, %v1205_v0, 0  ;;  %1201 = vadd.xlane.f32.xlu1 %v1200_v3 }
 0x305   : > { %2532 = vmatpush3.bf16.msra.mxu1 %v1210_v8 }
 0x306   : > { %v2711_v9 = vpop.eup %2710  ;;  %2716 = vpow2.f32 %v1441_v5  ;;  %2543 = vmatprep.subr.bf16.mxu1 %v2776_v1 }
 0x307   : > { %v1556_v44 = vpop.xlane.xlu0 %1555  ;;  %v1320_v12 = vsel %vm764_vm2, %v2711_v9, 0.0 }
 0x308   : > { %v1560_v13 = vsub.f32 %v3083_v57, %v1556_v44  ;;  %1321 = vadd.xlane.f32.xlu1 %v1320_v12  ;;  %2534 = vmatmul.mubr.msk.bf16.vlgmr.msra.gmra.mrb[24].mxu1 %vm764_vm2, %v1203_v11 }
 0x309   : > { %2545 = vmatprep.mubr.msk.bf16.mxu1 %vm2777_vm0, %v2776_v1 }
 0x30a   : > { %v2713_v50 = vpop.eup %2712  ;;  %v1562_v14 = vmul.f32 1.442695, %v1560_v13 }
 0x30b   : > { %v1559_v17 = vpop.xlane.xlu0 %1558  ;;  %v1323_v19 = vsel %vm815_vm4, %v2713_v50, 0.0  ;;  %v1326_v31 = vpack.c.bf16 %v2713_v50, %v2711_v9 }
 0x30c   : > { %2718 = vpow2.f32 %v1562_v14  ;;  %v1561_v20 = vsub.f32 %v3086_v62, %v1559_v17  ;;  %1324 = vadd.xlane.f32.xlu1 %v1323_v19 }
 0x30e   : > { %v2715_v21 = vpop.eup %2714  ;;  %v1564_v22 = vmul.f32 1.442695, %v1561_v20 }
 0x30f   : > { %v1679_v24 = vpop.xlane.xlu0 %1678  ;;  %v1443_v57 = vsel %vm764_vm2, %v2715_v21, 0.0 }
 0x310   : > { %v2717_v25 = vpop.eup %2716  ;;  %2720 = vpow2.f32 %v1564_v22  ;;  %v1683_v27 = vsub.f32 %v3097_v6, %v1679_v24  ;;  %1444 = vadd.xlane.f32.xlu1 %v1443_v57 }
 0x311   : > { %v1446_v60 = vsel %vm815_vm4, %v2717_v25, 0.0  ;;  %v1449_v38 = vpack.c.bf16 %v2717_v25, %v2715_v21 }
 0x312   : > { %v1685_v28 = vmul.f32 1.442695, %v1683_v27  ;;  %1447 = vadd.xlane.f32.xlu0 %v1446_v60 }
 0x313   : > { %v1328_v30 = vpop.permute.xlu0 %1327 }
 0x314   : > { %2722 = vpow2.f32 %v1685_v28  ;;  %v1333_v29 = vsel %vm838_vm3, %v1328_v30, 0 }
 0x315   : > { %2544 = vmatpush3.bf16.msra.mxu1 %v1333_v29 }
 0x316   : > { %v2719_v62 = vpop.eup %2718  ;;  %2555 = vmatprep.subr.bf16.mxu1 %v2776_v1 }
 0x317   : > { %v1451_v33 = vpop.permute.xlu0 %1450  ;;  %v1566_v34 = vsel %vm764_vm2, %v2719_v62, 0.0 }
 0x318   : > { %v1456_v7 = vsel %vm838_vm3, %v1451_v33, 0  ;;  %1567 = vadd.xlane.f32.xlu1 %v1566_v34  ;;  %2546 = vmatmul.mubr.msk.bf16.vlgmr.msra.gmra.mrb[28].mxu1 %vm764_vm2, %v1326_v31 }
 0x319   : > { %2556 = vmatpush3.bf16.msra.mxu1 %v1456_v7  ;;  %2557 = vmatprep.mubr.msk.bf16.mxu1 %vm2777_vm0, %v2776_v1 }
 0x31a   : > { %v2721_v6 = vpop.eup %2720  ;;  %2567 = vmatprep.subr.bf16.mxu1 %v2776_v1 }
 0x31b   : > { %v1569_v35 = vsel %vm815_vm4, %v2721_v6, 0.0  ;;  %v1574_v10 = vpop.permute.xlu0 %1573  ;;  %v1572_v42 = vpack.c.bf16 %v2721_v6, %v2719_v62 }
 0x31c   : > { %1570 = vadd.xlane.f32.xlu0 %v1569_v35  ;;  %v1579_v15 = vsel %vm838_vm3, %v1574_v10, 0 }
 0x31e   : > { %v2723_v37 = vpop.eup %2722 }
 0x31f   : > { %v1689_v40 = vsel %vm764_vm2, %v2723_v37, 0.0  ;;  %v1697_v18 = vpop.permute.xlu0 %1696 }
 0x320   : > { %1690 = vadd.xlane.f32.xlu1 %v1689_v40  ;;  %2558 = vmatmul.mubr.msk.bf16.vlgmr.msra.gmra.mrb[32].mxu1 %vm764_vm2, %v1449_v38  ;;  %v1702_v43 = vsel %vm838_vm3, %v1697_v18, 0 }
 0x321   : > { %2568 = vmatpush3.bf16.msra.mxu1 %v1579_v15  ;;  %2569 = vmatprep.mubr.msk.bf16.mxu1 %vm2777_vm0, %v2776_v1 }
 0x322   : > { %2579 = vmatprep.subr.bf16.mxu1 %v2776_v1 }
 0x324   : > { %826 = vadd.xlane.f32.xlu1 %v825_v41 }
 0x328   : > { %2570 = vmatmul.mubr.msk.bf16.vlgmr.msra.gmra.mrb[36].mxu1 %vm764_vm2, %v1572_v42 }
 0x329   : > { %2580 = vmatpush3.bf16.msra.mxu1 %v1702_v43  ;;  %2581 = vmatprep.mubr.msk.bf16.mxu1 %vm2777_vm0, %v2776_v1 }
 0x334   : > { %v1682_v23 = vpop.xlane.xlu1 %1681 }
 0x335   : > { %v1684_v26 = vsub.f32 %v3117_v16, %v1682_v23 }
 0x337   : > { %v1687_v45 = vmul.f32 1.442695, %v1684_v26 }
 0x339   : > { %2724 = vpow2.f32 %v1687_v45 }
 0x343   : > { %v2725_v46 = vpop.eup %2724 }
 0x344   : > { %v1692_v47 = vsel %vm815_vm4, %v2725_v46, 0.0  ;;  %v1695_v2 = vpack.c.bf16 %v2725_v46, %v2723_v37 }
 0x345   : > { %1693 = vadd.xlane.f32.xlu0 %v1692_v47 }
 0x346   : > { %2582 = vmatmul.mubr.msk.bf16.vlgmr.msra.gmra.mrb[40].mxu1 %vm764_vm2, %v1695_v2 }
 0x349   : > { %829 = vadd.xlane.f32.xlu0 %v828_v48  ;;  %v2666_v48 = vld [vmem:[%s3356_s7] sm:$0xff]  }
 0x34a   : > { %2586 = vmatpush3.bf16.msra.mxu0 %v2666_v48 }
 0x34b   : > { %2587 = vmatprep.subr.bf16.mxu0 %v2776_v1 }
 0x354   : > { %v3186_v39 = vpop.f32.mrb[12].mxu1 }
 0x355   : > { %v2499_v49 = vpop.f32.mrb[13].mxu1 }
 0x356   : > { %v3188_v51 = vpop.f32.mrb[14].mxu1 }
 0x357   : > { %v2500_v52 = vpop.f32.mrb[15].mxu1 }
 0x358   : > { %v2667_v52 = vld [vmem:[%s3356_s7 + $0x8] sm:$0xff]  }
 0x359   : > { %2588 = vmatpush3.bf16.msra.mxu0 %v2667_v52 }
 0x35a   : > { %2589 = vmatprep.subr.bf16.mxu0 %v2776_v1 }
 0x37d   : > { %v953_v53 = vpop.xlane.xlu0 %952 }
 0x37e   : > { %2726 = vrcp.f32 %v953_v53 }
 0x381   : > { %v956_v16 = vpop.xlane.xlu1 %955 }
 0x382   : > { %2728 = vrcp.f32 %v956_v16 }
 0x385   : > { %v1076_v54 = vpop.xlane.xlu1 %1075 }
 0x386   : > { %2730 = vrcp.f32 %v1076_v54 }
 0x388   : > { %v2727_v58 = vpop.eup %2726 }
 0x389   : > { %v1079_v32 = vpop.xlane.xlu1 %1078 }
 0x38a   : > { %2732 = vrcp.f32 %v1079_v32 }
 0x38c   : > { %v2729_v63 = vpop.eup %2728 }
 0x38d   : > { %v1199_v4 = vpop.xlane.xlu1 %1198 }
 0x38e   : > { %2734 = vrcp.f32 %v1199_v4 }
 0x390   : > { %v2731_v44 = vpop.eup %2730 }
 0x391   : > { %v1202_v9 = vpop.xlane.xlu1 %1201 }
 0x392   : > { %2736 = vrcp.f32 %v1202_v9 }
 0x394   : > { %v2733_v13 = vpop.eup %2732 }
 0x395   : > { %v1322_v21 = vpop.xlane.xlu1 %1321 }
 0x396   : > { %2738 = vrcp.f32 %v1322_v21 }
 0x398   : > { %v2735_v24 = vpop.eup %2734 }
 0x399   : > { %v1325_v29 = vpop.xlane.xlu1 %1324 }
 0x39a   : > { %2740 = vrcp.f32 %v1325_v29 }
 0x39c   : > { %v2737_v25 = vpop.eup %2736 }
 0x39d   : > { %v1445_v31 = vpop.xlane.xlu1 %1444 }
 0x39e   : > { %2742 = vrcp.f32 %v1445_v31 }
 0x39f   : > { %v1448_v33 = vpop.xlane.xlu0 %1447 }
 0x3a0   : > { %2744 = vrcp.f32 %v1448_v33  ;;  %v2739_v7 = vpop.eup %2738 }
 0x3a4   : > { %v2741_v35 = vpop.eup %2740 }
 0x3a5   : > { %v1568_v15 = vpop.xlane.xlu1 %1567 }
 0x3a6   : > { %2746 = vrcp.f32 %v1568_v15 }
 0x3a8   : > { %v2743_v43 = vpop.eup %2742 }
 0x3a9   : > { %v1571_v41 = vpop.xlane.xlu0 %1570 }
 0x3aa   : > { %2748 = vrcp.f32 %v1571_v41  ;;  %v2745_v26 = vpop.eup %2744 }
 0x3b0   : > { %v2747_v53 = vpop.eup %2746 }
 0x3b4   : > { %v2749_v32 = vpop.eup %2748 }
 0x3c8   : > { %v1000_v55 = vpop.f32.mrb[16].mxu1 }
 0x3c9   : > { %v2511_v61 = vpop.f32.mrb[17].mxu1  ;;  %v1008_v0 = vmul.f32 %v2727_v58, %v1000_v55  ;;  %v2668_v58 = vld [vmem:[%s3356_s7 + $0x10] sm:$0xff]  }
 0x3ca   : > { %v1003_v36 = vpop.f32.mrb[18].mxu1  ;;  %2590 = vmatpush3.bf16.msra.mxu0 %v2668_v58 }
 0x3cb   : > { %v1010_v3 = vmul.f32 %v2729_v63, %v1003_v36  ;;  %v2512_v5 = vpop.f32.mrb[19].mxu1  ;;  %2591 = vmatprep.subr.bf16.mxu0 %v2776_v1 }
 0x3cc   : > { %v2669_v5 = vld [vmem:[%s3356_s7 + $0x18] sm:$0xff]  }
 0x3cd   : > { %v2623_v8 = vpack.i.bf16 %v1010_v3, %v1008_v0  ;;  %v1691_v0 = vpop.xlane.xlu1 %1690 }
 0x3ce   : > { %2750 = vrcp.f32 %v1691_v0  ;;  %2592 = vmatpush3.bf16.msra.mxu0 %v2669_v5  ;;  %v3234_v5 = vld [vmem:[%s2917_s21 + $0x8] sm:$0xf] }
 0x3cf   : > { %2624 = vrot.lane.b32.xlu1 %v2623_v8, %s2792_s27 }
 0x3d0   : > { %v1123_v11 = vpop.f32.mrb[20].mxu1 }
 0x3d1   : > { %v2523_v12 = vpop.f32.mrb[21].mxu1  ;;  %v1131_v14 = vmul.f32 %v2731_v44, %v1123_v11  ;;  %v827_v1 = vpop.xlane.xlu1 %826 }
 0x3d2   : > { %v1126_v50 = vpop.f32.mrb[22].mxu1  ;;  %v1694_v3 = vpop.xlane.xlu0 %1693 }
 0x3d3   : > { %v1133_v17 = vmul.f32 %v2733_v13, %v1126_v50  ;;  %v2524_v19 = vpop.f32.mrb[23].mxu1  ;;  %2752 = vrcp.f32 %v1694_v3 }
 0x3d4   : > { %2754 = vrcp.f32 %v827_v1 }
 0x3d5   : > { %v2628_v20 = vpack.i.bf16 %v1133_v17, %v1131_v14 }
 0x3d6   : > { %v830_v19 = vpop.xlane.xlu0 %829 }
 0x3d7   : > { %2629 = vrot.lane.b32.xlu0 %v2628_v20, %s2791_s26  ;;  %2756 = vrcp.f32 %v830_v19 }
 0x3d8   : > { %v2751_v9 = vpop.eup %2750 }
 0x3db   : > { %v1246_v22 = vpop.f32.mrb[24].mxu1 }
 0x3dc   : > { %v2535_v57 = vpop.f32.mrb[25].mxu1  ;;  %v1254_v60 = vmul.f32 %v2735_v24, %v1246_v22 }
 0x3dd   : > { %v1249_v27 = vpop.f32.mrb[26].mxu1  ;;  %v2753_v44 = vpop.eup %2752 }
 0x3de   : > { %v1256_v28 = vmul.f32 %v2737_v25, %v1249_v27  ;;  %v2536_v30 = vpop.f32.mrb[27].mxu1  ;;  %v2755_v24 = vpop.eup %2754 }
 0x3e0   : > { %v2633_v62 = vpack.i.bf16 %v1256_v28, %v1254_v60  ;;  %v884_v28 = vmul.f32 %v2755_v24, %v3186_v39  ;;  %v2675_v24 = vld [vmem:[%s3360_s11 + $0x14] ss:$8 sps:$4 sm:$0xff]  }
 0x3e1   : > { %v2757_v25 = vpop.eup %2756 }
 0x3e2   : > { %2634 = vrot.lane.b32.xlu1 %v2633_v62, %s2790_s23  ;;  %v886_v31 = vmul.f32 %v2757_v25, %v3188_v51  ;;  %v2678_v25 = vld [vmem:[%s3360_s11 + $0x24] ss:$8 sps:$4 sm:$0xff]  }
 0x3eb   : > { %v1369_v34 = vpop.f32.mrb[28].mxu1 }
 0x3ec   : > { %v2547_v6 = vpop.f32.mrb[29].mxu1  ;;  %v1377_v37 = vmul.f32 %v2739_v7, %v1369_v34 }
 0x3ed   : > { %v1372_v10 = vpop.f32.mrb[30].mxu1 }
 0x3ee   : > { %v1379_v38 = vmul.f32 %v2741_v35, %v1372_v10  ;;  %v2548_v40 = vpop.f32.mrb[31].mxu1 }
 0x3f0   : > { %v2638_v18 = vpack.i.bf16 %v1379_v38, %v1377_v37 }
 0x3f2   : > { %2639 = vrot.lane.b32.xlu1 %v2638_v18, %s2789_s22  ;;  %s579_s22 = scalar_lea.vmem %s3366_s17, %s2416_s18 }
 0x3f3   : > { %v1492_v42 = vpop.f32.mrb[32].mxu1 }
 0x3f4   : > { %v2559_v23 = vpop.f32.mrb[33].mxu1  ;;  %v1500_v46 = vmul.f32 %v2743_v43, %v1492_v42 }
 0x3f5   : > { %v1495_v45 = vpop.f32.mrb[34].mxu1 }
 0x3f6   : > { %v1502_v47 = vmul.f32 %v2745_v26, %v1495_v45  ;;  %v2560_v2 = vpop.f32.mrb[35].mxu1 }
 0x3f8   : > { %v2643_v49 = vpack.i.bf16 %v1502_v47, %v1500_v46 }
 0x3fa   : > { %2644 = vrot.lane.b32.xlu0 %v2643_v49, %s2788_s20 }
 0x3fb   : > { %v1615_v16 = vpop.f32.mrb[36].mxu1 }
 0x3fc   : > { %v2571_v54 = vpop.f32.mrb[37].mxu1  ;;  %v1623_v61 = vmul.f32 %v2747_v53, %v1615_v16 }
 0x3fd   : > { %v1618_v55 = vpop.f32.mrb[38].mxu1  ;;  %v2381_v54 = vld [vmem:[%s3357_s8] ss:$0 sm:$0xff] }
 0x3fe   : > { %v1625_v63 = vmul.f32 %v2749_v32, %v1618_v55  ;;  %v2572_v4 = vpop.f32.mrb[39].mxu1 }
 0x400   : > { %v2648_v36 = vpack.i.bf16 %v1625_v63, %v1623_v61 }
 0x402   : > { %2649 = vrot.lane.b32.xlu1 %v2648_v36, %s2787_s28  ;;  %v3229_v36 = vld [vmem:[%s2917_s21] sm:$0xff] }
 0x419   : > { %v1738_v8 = vpop.f32.mrb[40].mxu1 }
 0x41a   : > { %v2583_v11 = vpop.f32.mrb[41].mxu1  ;;  %v1746_v13 = vmul.f32 %v2751_v9, %v1738_v8 }
 0x41b   : > { %v1741_v12 = vpop.f32.mrb[42].mxu1 }
 0x41c   : > { %v1748_v50 = vmul.f32 %v2753_v44, %v1741_v12  ;;  %v2584_v14 = vpop.f32.mrb[43].mxu1 }
 0x41e   : > { %v2653_v17 = vpack.i.bf16 %v1748_v50, %v1746_v13 }
 0x420   : > { %2654 = vrot.lane.b32.xlu0 %v2653_v17, %s2786_s0 }
 0x441   : > { %v2625_v20 = vpop.permute.xlu1 %2624 }
 0x442   : > { %v2627_v27 = vunpack.i.h.bf16 %v2625_v20  ;;  %v2626_v60 = vunpack.i.l.bf16 %v2625_v20 }
 0x444   : > { %v1806_v10 = vsel %vm764_vm2, %v886_v31, %v2627_v27  ;;  %v1805_v37 = vsel %vm764_vm2, %v884_v28, %v2626_v60  ;;  %v2676_v27 = vld [vmem:[%s3360_s11 + $0x20] ss:$8 sps:$4 sm:$0xff]   ;;  %v2681_v60 = vld [vmem:[%s3360_s11 + $0x34] ss:$8 sps:$4 sm:$0xff]   ;;  %v2679_v28 = vld [vmem:[%s3360_s11 + $0x30] ss:$8 sps:$4 sm:$0xff]  }
 0x445   : > { %v2684_v31 = vld [vmem:[%s3362_s13 + $0x10] sm:$0xff]  }
 0x449   : > { %v2630_v22 = vpop.permute.xlu0 %2629 }
 0x44a   : > { %v2632_v30 = vunpack.i.h.bf16 %v2630_v22  ;;  %v2631_v29 = vunpack.i.l.bf16 %v2630_v22  ;;  %v2670_v22 = vld [vmem:[%s3360_s11] ss:$8 sps:$4 sm:$0xff]  }
 0x44c   : > { %v1809_v40 = vsel %vm1807_vm5, %v1806_v10, %v2632_v30  ;;  %v1808_v15 = vsel %vm1807_vm5, %v1805_v37, %v2631_v29  ;;  %v2793_v30 = vmov 0   ;;  %v2682_v29 = vld [vmem:[%s3362_s13] sm:$0xff]  }
 0x44d   : > { %2053 = vmatprep.mubr.bf16.mxu1 %v2793_v30  ;;  %2176 = vmatprep.subr.bf16.mxu0 %v2793_v30  ;;  %v2690_v10 = vld [vmem:[%s3362_s13 + $0x40] sm:$0xff]  }
 0x454   : > { %v2635_v21 = vpop.permute.xlu1 %2634 }
 0x455   : > { %v2637_v33 = vunpack.i.h.bf16 %v2635_v21  ;;  %v2636_v34 = vunpack.i.l.bf16 %v2635_v21  ;;  %v2672_v21 = vld [vmem:[%s3360_s11 + $0x4] ss:$8 sps:$4 sm:$0xff]  }
 0x456   : > { %2021 = vmatprep.subr.bf16.mxu1 %v2672_v21 }
 0x457   : > { %v1812_v18 = vsel %vm1810_vm6, %v1809_v40, %v2637_v33  ;;  %v1811_v42 = vsel %vm1810_vm6, %v1808_v15, %v2636_v34  ;;  %2022 = vmatpush1.bf16.msra.mxu1 %v2670_v22  ;;  %v2685_v33 = vld [vmem:[%s3362_s13 + $0x18] sm:$0xff]   ;;  %v2686_v34 = vld [vmem:[%s3362_s13 + $0x20] sm:$0xff]  }
 0x458   : > { %2023 = vmatprep.subr.bf16.mxu1 %v2675_v24 }
 0x464   : > { %v2640_v57 = vpop.permute.xlu1 %2639 }
 0x465   : > { %v2642_v6 = vunpack.i.h.bf16 %v2640_v57  ;;  %v2641_v35 = vunpack.i.l.bf16 %v2640_v57  ;;  %v2673_v57 = vld [vmem:[%s3360_s11 + $0x10] ss:$8 sps:$4 sm:$0xff]  }
 0x466   : > { %2024 = vmatpush1.bf16.msra.mxu1 %v2673_v57 }
 0x467   : > { %v1815_v43 = vsel %vm1813_vm7, %v1812_v18, %v2642_v6  ;;  %v1814_v23 = vsel %vm1813_vm7, %v1811_v42, %v2641_v35  ;;  %2025 = vmatprep.subr.bf16.mxu1 %v2678_v25  ;;  %v2688_v6 = vld [vmem:[%s3362_s13 + $0x30] sm:$0xff]   ;;  %v2689_v35 = vld [vmem:[%s3362_s13 + $0x38] sm:$0xff]   ;;  %v2387_v18 = vld [vmem:[%s3358_s9] ss:$0 sm:$0xff] }
 0x46a   : > { %2026 = vmatpush1.bf16.msra.mxu1 %v2676_v27 }
 0x46b   : > { %2027 = vmatprep.subr.bf16.mxu1 %v2681_v60 }
 0x46c   : > { %v2645_v62 = vpop.permute.xlu0 %2644 }
 0x46d   : > { %v2647_v38 = vunpack.i.h.bf16 %v2645_v62  ;;  %v2646_v39 = vunpack.i.l.bf16 %v2645_v62  ;;  %v2683_v62 = vld [vmem:[%s3362_s13 + $0x8] sm:$0xff]  }
 0x46e   : > { %2028 = vmatpush1.bf16.msra.mxu1 %v2679_v28 }
 0x46f   : > { %v1818_v45 = vsel %vm1816_vm8, %v1815_v43, %v2647_v38  ;;  %v1817_v46 = vsel %vm1816_vm8, %v1814_v23, %v2646_v39 }
 0x474   : > { %v2650_v7 = vpop.permute.xlu1 %2649 }
 0x475   : > { %v2652_v41 = vunpack.i.h.bf16 %v2650_v7  ;;  %v2651_v51 = vunpack.i.l.bf16 %v2650_v7  ;;  %v2687_v7 = vld [vmem:[%s3362_s13 + $0x28] sm:$0xff]  }
 0x477   : > { %v1821_v48 = vsel %vm1819_vm9, %v1818_v45, %v2652_v41  ;;  %v1820_v49 = vsel %vm1819_vm9, %v1817_v46, %v2651_v51  ;;  %v2388_v45 = vld [vmem:[%s3359_s10] ss:$0 sm:$0xff] }
 0x492   : > { %v2655_v26 = vpop.permute.xlu0 %2654 }
 0x493   : > { %v2657_v47 = vunpack.i.h.bf16 %v2655_v26  ;;  %v2656_v2 = vunpack.i.l.bf16 %v2655_v26 }
 0x495   : > { %v1824_v52 = vsel %vm1822_vm10, %v1821_v48, %v2657_v47  ;;  %v1823_v16 = vsel %vm1822_vm10, %v1820_v49, %v2656_v2  ;;  %v2691_v49 = vld [vmem:[%s3362_s13 + $0x48] sm:$0xff]  }
 0x496   : > { %v1825_v53 = vpack.c.bf16 %v1824_v52, %v1823_v16  ;;  %v2692_v52 = vld [vmem:[%s3362_s13 + $0x50] sm:$0xff]   ;;  %v2693_v16 = vld [vmem:[%s3362_s13 + $0x58] sm:$0xff]  }
 0x498   : > { %2594 = vmatmul.mubr.msk.bf16.vlgmr.msra.gmra.mrb[28].mxu0 %vm627_vm1, %v1825_v53  ;;  %v1966_v53 = vld [vmem:[%s3361_s12] sm:$0x3] }
 0x499   : > { %2177 = vmatpush1.bf16.msra.mxu0 %v2682_v29 }
 0x49a   : > { %2178 = vmatprep.subr.bf16.mxu0 %v2793_v30 }
 0x49d   : > { %2179 = vmatpush1.bf16.msra.mxu0 %v2683_v62 }
 0x49e   : > { %2180 = vmatprep.subr.bf16.mxu0 %v2793_v30 }
 0x4a1   : > { %2181 = vmatpush1.bf16.msra.mxu0 %v2684_v31 }
 0x4a2   : > { %2182 = vmatprep.subr.bf16.mxu0 %v2793_v30 }
 0x4a5   : > { %2183 = vmatpush1.bf16.msra.mxu0 %v2685_v33 }
 0x4a6   : > { %2184 = vmatprep.subr.bf16.mxu0 %v2793_v30 }
 0x4a9   : > { %2185 = vmatpush1.bf16.msra.mxu0 %v2686_v34 }
 0x4aa   : > { %2186 = vmatprep.subr.bf16.mxu0 %v2793_v30 }
 0x4ad   : > { %2187 = vmatpush1.bf16.msra.mxu0 %v2687_v7 }
 0x4ae   : > { %2188 = vmatprep.subr.bf16.mxu0 %v2793_v30 }
 0x4b1   : > { %2189 = vmatpush1.bf16.msra.mxu0 %v2688_v6 }
 0x4b2   : > { %2190 = vmatprep.subr.bf16.mxu0 %v2793_v30 }
 0x4b5   : > { %2191 = vmatpush1.bf16.msra.mxu0 %v2689_v35 }
 0x4b6   : > { %2192 = vmatprep.subr.bf16.mxu0 %v2793_v30 }
 0x4b9   : > { %2193 = vmatpush1.bf16.msra.mxu0 %v2690_v10 }
 0x4ba   : > { %2194 = vmatprep.subr.bf16.mxu0 %v2793_v30 }
 0x4bd   : > { %2195 = vmatpush1.bf16.msra.mxu0 %v2691_v49 }
 0x4be   : > { %2196 = vmatprep.subr.bf16.mxu0 %v2793_v30 }
 0x4c1   : > { %2197 = vmatpush1.bf16.msra.mxu0 %v2692_v52 }
 0x4c2   : > { %2198 = vmatprep.subr.bf16.mxu0 %v2793_v30 }
 0x4c5   : > { %2199 = vmatpush1.bf16.msra.mxu0 %v2693_v16 }
 0x56b   : > { %v1902_v32 = vpop.f32.mrb[28].mxu0 }
 0x56c   : > { %v1903_v55 = vadd.f32 %v2381_v54, %v1902_v32  ;;  %v2595_v58 = vpop.f32.mrb[29].mxu0  ;;  %v1971_v32 = vrot.slane %v1966_v53, %v761_v59 }
 0x56d   : > { %v1905_v61 = vpop.f32.mrb[30].mxu0 }
 0x56e   : > { %v1906_v63 = vadd.f32 %v2381_v54, %v1905_v61  ;;  %v2596_v4 = vpop.f32.mrb[31].mxu0  ;;  %v1909_v0 = vadd.f32 %v3229_v36, %v1903_v55  ;;  %v1974_v54 = vsub.s32 1, %v3019_v56  ;;  %v2398_v56 = vld [vmem:[%s3363_s14] ss:$0 sm:$0xff] }
 0x570   : > { %v1911_v3 = vsel %vm627_vm1, %v1909_v0, 0.0  ;;  %v1910_v8 = vadd.f32 %v3234_v5, %v1906_v63  ;;  %v1975_v55 = vrot.slane %v1966_v53, %v1974_v54 }
 0x571   : > { %1912 = vadd.xlane.f32.xlu1 %v1911_v3 }
 0x572   : > { %v1915_v9 = vsel %vm1914_vm11, %v1910_v8, 0.0 }
 0x573   : > { %1916 = vadd.xlane.f32.xlu0 %v1915_v9 }
 0x5fe   : > { %v1913_v11 = vpop.xlane.xlu1 %1912 }
 0x5ff   : > { %v1919_v44 = vmul.f32 0.015625, %v1913_v11 }
 0x600   : > { %v1917_v12 = vpop.xlane.xlu0 %1916 }
 0x601   : > { %v3238_v13 = vsub.f32 %v1909_v0, %v1919_v44  ;;  %v1920_v50 = vmul.f32 0.015625, %v1917_v12 }
 0x603   : > { %v3240_v14 = vsub.f32 %v1910_v8, %v1920_v50  ;;  %v1923_v17 = vmul.f32 %v3238_v13, %v3238_v13 }
 0x605   : > { %v1925_v1 = vsel %vm627_vm1, %v1923_v17, 0.0  ;;  %v1924_v19 = vmul.f32 %v3240_v14, %v3240_v14 }
 0x606   : > { %1926 = vadd.xlane.f32.xlu0 %v1925_v1 }
 0x607   : > { %v1928_v20 = vsel %vm1914_vm11, %v1924_v19, 0.0 }
 0x608   : > { %1929 = vadd.xlane.f32.xlu1 %v1928_v20 }
 0x693   : > { %v1927_v37 = vpop.xlane.xlu0 %1926 }
 0x694   : > { %v1931_v38 = vmul.f32 0.015625, %v1927_v37 }
 0x695   : > { %v1930_v39 = vpop.xlane.xlu1 %1929 }
 0x696   : > { %v1933_v40 = vadd.f32 1e-05, %v1931_v38  ;;  %v1932_v15 = vmul.f32 0.015625, %v1930_v39 }
 0x698   : > { %2758 = vrsqrt.f32 %v1933_v40  ;;  %v1934_v41 = vadd.f32 1e-05, %v1932_v15  ;;  %v2412_v15 = vld [vmem:[%s3364_s15] ss:$0 sm:$0xff] }
 0x69a   : > { %2760 = vrsqrt.f32 %v1934_v41 }
 0x6a2   : > { %v2759_v51 = vpop.eup %2758 }
 0x6a3   : > { %v1937_v42 = vmul.f32 %v2759_v51, %v3238_v13 }
 0x6a4   : > { %v2761_v43 = vpop.eup %2760 }
 0x6a5   : > { %v1946_v23 = vmul.f32 %v2387_v18, %v1937_v42  ;;  %v1938_v26 = vmul.f32 %v2761_v43, %v3240_v14 }
 0x6a7   : > { %v1947_v46 = vmul.f32 %v2387_v18, %v1938_v26  ;;  %v1955_v47 = vadd.f32 %v2388_v45, %v1946_v23  ;;  %v2413_v18 = vld [vmem:[%s3365_s16] ss:$0 sm:$0xff] }
 0x6a9   : > { %v1956_v2 = vadd.f32 %v2388_v45, %v1947_v46 }
 0x6ab   : > { %v1957_v48 = vpack.c.bf16 %v1956_v2, %v1955_v47 }
 0x6ad   : > { %2397 = vmatmul.mubr.msk.bf16.vlgmr.msra.gmra.mrb[44].mxu1 %vm627_vm1, %v1957_v48 }
 0x780   : > { %v2055_v58 = vpop.f32.mrb[44].mxu1 }
 0x781   : > { %v2056_v61 = vadd.f32 %v2055_v58, %v1971_v32  ;;  %v2057_v63 = vpop.f32.mrb[45].mxu1 }
 0x782   : > { %v2058_v4 = vadd.f32 %v2057_v63, %v1975_v55  ;;  %v2059_v0 = vpop.f32.mrb[46].mxu1 }
 0x783   : > { %v2060_v3 = vadd.f32 %v2059_v0, %v1971_v32  ;;  %v2061_v8 = vpop.f32.mrb[47].mxu1  ;;  %v2064_v11 = vmax.f32 %v2056_v61, 0.0 }
 0x784   : > { %v2062_v9 = vadd.f32 %v2061_v8, %v1975_v55  ;;  %v2065_v12 = vmax.f32 %v2058_v4, 0.0 }
 0x785   : > { %v2066_v44 = vmax.f32 %v2060_v3, 0.0 }
 0x786   : > { %v2067_v13 = vmax.f32 %v2062_v9, 0.0 }
 0x787   : > { %v2068_v50 = vpack.c.bf16 %v2066_v44, %v2064_v11 }
 0x788   : > { %v2069_v14 = vpack.c.bf16 %v2067_v13, %v2065_v12 }
 0x78a   : > { %2411 = vmatprep.mubr.msk.bf16.mxu0 %vm627_vm1, %v2069_v14 }
 0x78b   : > { %2209 = vmatmul.mubr.bf16.vlgmr.msra.gmra.mrb[32].mxu0 %v2068_v50 }
 0x85e   : > { %v2210_v59 = vpop.f32.mrb[32].mxu0 }
 0x85f   : > { %v2211_v17 = vadd.f32 %v2398_v56, %v2210_v59  ;;  %v2212_v1 = vpop.f32.mrb[33].mxu0 }
 0x860   : > { %v2213_v19 = vpop.f32.mrb[34].mxu0 }
 0x861   : > { %v2214_v20 = vadd.f32 %v2398_v56, %v2213_v19  ;;  %v2215_v21 = vpop.f32.mrb[35].mxu0  ;;  %v2217_v22 = vadd.f32 %v2211_v17, %v1955_v47 }
 0x863   : > { %v2219_v24 = vsel %vm627_vm1, %v2217_v22, 0.0  ;;  %v2218_v57 = vadd.f32 %v2214_v20, %v1956_v2 }
 0x864   : > { %2220 = vadd.xlane.f32.xlu0 %v2219_v24 }
 0x865   : > { %v2222_v25 = vsel %vm1914_vm11, %v2218_v57, 0.0 }
 0x866   : > { %2223 = vadd.xlane.f32.xlu1 %v2222_v25 }
 0x8f1   : > { %v2221_v27 = vpop.xlane.xlu0 %2220 }
 0x8f2   : > { %v2225_v60 = vmul.f32 0.015625, %v2221_v27 }
 0x8f3   : > { %v2224_v28 = vpop.xlane.xlu1 %2223 }
 0x8f4   : > { %v2227_v30 = vsub.f32 %v2217_v22, %v2225_v60  ;;  %v2226_v29 = vmul.f32 0.015625, %v2224_v28 }
 0x8f6   : > { %v2228_v62 = vsub.f32 %v2218_v57, %v2226_v29  ;;  %v2229_v31 = vmul.f32 %v2227_v30, %v2227_v30 }
 0x8f8   : > { %v2231_v33 = vsel %vm627_vm1, %v2229_v31, 0.0  ;;  %v2230_v34 = vmul.f32 %v2228_v62, %v2228_v62 }
 0x8f9   : > { %2232 = vadd.xlane.f32.xlu0 %v2231_v33 }
 0x8fa   : > { %v2234_v7 = vsel %vm1914_vm11, %v2230_v34, 0.0 }
 0x8fb   : > { %2235 = vadd.xlane.f32.xlu1 %v2234_v7 }
 0x986   : > { %v2233_v6 = vpop.xlane.xlu0 %2232 }
 0x987   : > { %v2237_v35 = vmul.f32 0.015625, %v2233_v6 }
 0x988   : > { %v2236_v10 = vpop.xlane.xlu1 %2235 }
 0x989   : > { %v2239_v37 = vadd.f32 1e-05, %v2237_v35  ;;  %v2238_v38 = vmul.f32 0.015625, %v2236_v10 }
 0x98b   : > { %2762 = vrsqrt.f32 %v2239_v37  ;;  %v2240_v39 = vadd.f32 1e-05, %v2238_v38 }
 0x98d   : > { %2764 = vrsqrt.f32 %v2240_v39 }
 0x995   : > { %v2763_v40 = vpop.eup %2762 }
 0x996   : > { %v2243_v41 = vmul.f32 %v2763_v40, %v2227_v30 }
 0x997   : > { %v2765_v51 = vpop.eup %2764 }
 0x998   : > { %v2252_v42 = vmul.f32 %v2412_v15, %v2243_v41  ;;  %v2244_v43 = vmul.f32 %v2765_v51, %v2228_v62 }
 0x99a   : > { %v2261_v23 = vadd.f32 %v2413_v18, %v2252_v42  ;;  %v2253_v26 = vmul.f32 %v2412_v15, %v2244_v43 }
 0x99c   : > { %v2263_v45 = vadd.f32 %v3229_v36, %v2261_v23  ;;  %v2262_v46 = vadd.f32 %v2413_v18, %v2253_v26 }
 0x99e   : > { %2265 = vst.msk [vmem:[%s579_s22] sm:$0xff] %vm627_vm1, %v2263_v45  ;;  %v2264_v47 = vadd.f32 %v3234_v5, %v2262_v46 }
 0x9a0   : > { %2266 = vst.msk [vmem:[%s579_s22 + $0x8] sm:$0xf] %vm1914_vm11, %v2264_v47 }
 0x9a1 PF: > { %s27_s24 = sadd.s32 1, %s2774_s24  }
 0x9a2   : > { %p24_p4 = scmp.ge.s32.totalorder %s27_s24, 4  }
 0x9a4   :  { %26 = sbr.rel (!%p24_p4) target bundleno = 3 (0x3), region = 124 }

</bundles_post_ra>
